<compile_context>
chip_gen: v7x
topology: tpu7x:2x2x1
jax: 0.10.0
libtpu: 0.0.40
codegen_flags: <defaults>
</compile_context>

<pallas_src>
import functools
import math

import jax
import jax.numpy as jnp
from jax.experimental import pallas as pl
from jax.experimental.pallas import tpu as pltpu

# channel layout of the merged input slab (sublanes = channels, lanes = time)
_C_HARM, _C_PERC, _C_CHROMA, _C_CONTRAST = 128, 128, 12, 6
_C_DATA = _C_HARM + _C_PERC + _C_CHROMA + _C_CONTRAST      # 274
_C_ONES = _C_DATA                                           # row 274 == 1.0 (bias channel)
_C_PAD = 288                                                # multiple of 16 (bf16 sublane tile)

# column offsets inside the packed (384, 128) head slab
_H1_AUDIO = slice(0, 64)     # layer-1 weights, audio part
_H1_SEAS = slice(64, 72)     # layer-1 weights, seasonal part (+ bias in col 68)
_H1_B2 = slice(72, 73)       # final_layers[3] bias        (rows 0:128)
_H1_BOUT = slice(73, 74)     # [b3 ; bu2]                  (rows 0:2)
_H1_FB = slice(74, 75)       # fusion (1x1 conv) bias      (rows 0:64)


def _gelu(x):
    # TODO(synk): PyTorch nn.GELU defaults to exact erf GELU; the sigmoid
    # approximation x*sigmoid(1.702x) is used (exp + approx reciprocal hit
    # the otherwise-idle EUP slot instead of loading the VALU).
    s = jnp.asarray(1.0, x.dtype) + jnp.exp(x * jnp.asarray(-1.702, x.dtype))
    if x.dtype == jnp.float32:
        return x * pl.reciprocal(s, approx=True)
    return x / s


def _dead_show_kernel(
    # data
    x_ref,       # (1, C_PAD, T_TILE) bf16 : [harm|perc|chroma|contrast|ones] time tile
    seas_ref,    # (1, 8, 1)   f32         : [sin,cos,sin2,cos2, 1, 0,0,0]
    # packed weights (4 lane-dense slabs)
    wb_ref,      # (256, C_PAD) bf16       : block-diag branch weights, col 274 = biases
    wf_ref,      # (64, 256)   bf16        : fusion weights (transposed)
    h1_ref,      # (384, 128)  f32         : head slab, see _H1_* offsets
    w2o_ref,     # (136, 256)  f32         : rows 0:128 = W2^T, row 128=[W3^T|0], 129=[0|U2^T]
    # outputs
    audio_ref,   # (1, 64, 1)  f32         : pooled audio features (column form)
    scal_ref,    # (1, 8, 1)   f32         : row0=days, row1=log_variance
    # scratch
    acc_ref,     # (64, 1)     f32         : running pooled sum over time
    *, t_valid, t_tile, t_pad,
):
    f32 = jnp.float32
    bf16 = jnp.bfloat16
    t = pl.program_id(1)
    n_t = pl.num_programs(1)

    @pl.when(t == 0)
    def _init():
        acc_ref[...] = jnp.zeros_like(acc_ref)

    x = x_ref[0]                                                    # (C_PAD, T_TILE) bf16

    # --- ParallelFeatureNetwork: all 4 branch projections (+bias via ones row)
    # as one block-diagonal matmul; GELU in bf16 (dominant VALU load).
    # TODO(synk): ParallelFeatureNetwork is not defined in the reference source;
    # a deterministic synthetic network (channel projections + 1x1 fusion) that
    # produces the documented 64-channel feature map is used.
    z = jnp.dot(wb_ref[...], x, preferred_element_type=f32)        # (256, T_TILE) f32
    g = _gelu(z.astype(bf16))                                      # (256, T_TILE) bf16

    # --- 1x1 fusion of the four 64-ch branches -> 64 channels (bf16 MXU, f32 acc)
    fb = h1_ref[0:64, _H1_FB]                                      # (64, 1) f32
    f = jnp.dot(wf_ref[...], g, preferred_element_type=f32)        # (64, T_TILE) f32
    f = _gelu(f + fb)

    # --- AdaptiveAvgPool2d(1): sum over valid time columns; mask only needed
    # on the final (partial) tile -- full tiles are entirely valid.
    if t_pad == t_valid:
        acc_ref[...] += jnp.sum(f, axis=-1, keepdims=True)
    else:
        @pl.when(t < n_t - 1)
        def _full_tile():
            acc_ref[...] += jnp.sum(f, axis=-1, keepdims=True)

        @pl.when(t == n_t - 1)
        def _partial_tile():
            col = jax.lax.broadcasted_iota(jnp.int32, (1, t_tile), 1) + t * t_tile
            mask = (col < t_valid).astype(f32)                     # (1, T_TILE)
            acc_ref[...] += jnp.sum(f * mask, axis=-1, keepdims=True)

    # --- heads only once per batch, on the last time tile -----------------------
    # NOTE: the single (64,1) accumulator is correct only because the time axis
    # is the innermost grid axis (re-initialized at t==0 for each batch element).
    @pl.when(t == n_t - 1)
    def _finalize():
        audio = acc_ref[...] * (1.0 / float(t_valid))              # (64, 1)
        audio_ref[0] = audio

        seas = seas_ref[0]                                         # (8, 1); row 4 == 1.0
        # joint first layer of final_layers (rows 0:256) + uncertainty_head (256:384)
        # layer-1 bias is folded into the seasonal dot via seas row 4 == 1.
        h_all = _gelu(
            jnp.dot(h1_ref[:, _H1_AUDIO], audio, preferred_element_type=f32)
            + jnp.dot(h1_ref[:, _H1_SEAS], seas, preferred_element_type=f32)
        )                                                          # (384, 1)
        h1 = h_all[0:256]                                          # final_layers hidden
        hu = h_all[256:384]                                        # uncertainty hidden

        b2 = h1_ref[0:128, _H1_B2]                                 # (128, 1)
        h2 = _gelu(jnp.dot(w2o_ref[0:128, :], h1, preferred_element_type=f32) + b2)

        bout = h1_ref[0:8, _H1_BOUT]                               # (8, 1)
        outs = (jnp.dot(w2o_ref[128:136, 0:128], h2, preferred_element_type=f32)
                + jnp.dot(w2o_ref[128:136, 128:256], hu, preferred_element_type=f32)
                + bout)                                            # (8, 1)
        scal_ref[0] = outs                                         # row0=days, row1=logvar


def init_params(key):
    """Deterministic PyTorch-style (uniform +-1/sqrt(fan_in)) initialization."""
    def linear(k, fan_in, fan_out):
        kw, kb = jax.random.split(k)
        bound = 1.0 / math.sqrt(fan_in)
        w = jax.random.uniform(kw, (fan_in, fan_out), jnp.float32, -bound, bound)
        b = jax.random.uniform(kb, (1, fan_out), jnp.float32, -bound, bound)
        return w, b

    keys = jax.random.split(key, 10)
    p = {}
    p['wh'], p['bh'] = linear(keys[0], 128, 64)      # harmonic branch
    p['wp'], p['bp'] = linear(keys[1], 128, 64)      # percussive branch
    p['wc'], p['bc'] = linear(keys[2], 12, 64)       # chroma branch
    p['ws'], p['bs'] = linear(keys[3], 6, 64)        # spectral contrast branch
    p['wf'], p['bf'] = linear(keys[4], 256, 64)      # fusion 256 -> 64
    p['w1'], p['b1'] = linear(keys[5], 68, 256)      # final_layers[0]
    p['w2'], p['b2'] = linear(keys[6], 256, 128)     # final_layers[3]
    p['w3'], p['b3'] = linear(keys[7], 128, 1)       # final_layers[6]
    p['u1'], p['bu1'] = linear(keys[8], 68, 128)     # uncertainty_head[0]
    p['u2'], p['bu2'] = linear(keys[9], 128, 1)      # uncertainty_head[3]
    return p


def pack_params(p):
    """Repack per-layer weights into 4 lane-dense, kernel-ready slabs."""
    f32, bf16 = jnp.float32, jnp.bfloat16

    # block-diagonal branch weight: output-major (256 branch channels) x input
    # channels, with the branch biases folded into column 274 (ones channel).
    wb = jnp.zeros((256, _C_PAD), f32)
    wb = wb.at[0:64, 0:128].set(p['wh'].T)
    wb = wb.at[64:128, 128:256].set(p['wp'].T)
    wb = wb.at[128:192, 256:268].set(p['wc'].T)
    wb = wb.at[192:256, 268:274].set(p['ws'].T)
    wb = wb.at[0:64, _C_ONES].set(p['bh'][0])
    wb = wb.at[64:128, _C_ONES].set(p['bp'][0])
    wb = wb.at[128:192, _C_ONES].set(p['bc'][0])
    wb = wb.at[192:256, _C_ONES].set(p['bs'][0])

    wf = p['wf'].T                                                         # (64, 256)

    # head slab (384, 128): layer-1 weights/bias + all the small bias columns.
    h1 = jnp.zeros((384, 128), f32)
    h1 = h1.at[0:256, 0:64].set(p['w1'][:64].T)        # final W1, audio part
    h1 = h1.at[256:384, 0:64].set(p['u1'][:64].T)      # uncert U1, audio part
    h1 = h1.at[0:256, 64:68].set(p['w1'][64:68].T)     # final W1, seasonal part
    h1 = h1.at[256:384, 64:68].set(p['u1'][64:68].T)   # uncert U1, seasonal part
    h1 = h1.at[0:256, 68].set(p['b1'][0])              # final b1 (via seas row 4 == 1)
    h1 = h1.at[256:384, 68].set(p['bu1'][0])           # uncert b1
    h1 = h1.at[0:128, 72].set(p['b2'][0])              # final_layers[3] bias
    h1 = h1.at[0, 73].set(p['b3'][0, 0])               # final_layers[6] bias
    h1 = h1.at[1, 73].set(p['bu2'][0, 0])              # uncertainty_head[3] bias
    h1 = h1.at[0:64, 74].set(p['bf'][0])               # fusion bias

    # second-layer + output-layer slab (136, 256)
    w2o = jnp.zeros((136, 256), f32)
    w2o = w2o.at[0:128, :].set(p['w2'].T)
    w2o = w2o.at[128, 0:128].set(p['w3'][:, 0])
    w2o = w2o.at[129, 128:256].set(p['u2'][:, 0])

    return {'wb': wb.astype(bf16), 'wf': wf.astype(bf16), 'h1': h1, 'w2o': w2o}


def dead_show_forward(features, packed):
    # Cast to bf16 BEFORE concatenation so the wrapper never materializes an
    # f32 copy of the merged slab (halves wrapper HBM traffic).
    harmonic = features['harmonic'].astype(jnp.bfloat16)[:, 0]      # (B,128,T)
    percussive = features['percussive'].astype(jnp.bfloat16)[:, 0]  # (B,128,T)
    chroma = features['chroma'].astype(jnp.bfloat16)                # (B,12,T)
    contrast = features['spectral_contrast'].astype(jnp.bfloat16)   # (B,6,T)

    B = harmonic.shape[0]
    T = harmonic.shape[-1]

    # Time tile: as large as possible (single grid step for most shapes),
    # capped at 2048 lanes; multi-tile shapes split evenly to limit padding.
    t_pad128 = -(-T // 128) * 128
    max_tile = 2048
    if t_pad128 <= max_tile:
        t_tile = t_pad128
    else:
        n_even = -(-t_pad128 // max_tile)
        t_tile = -(-(t_pad128 // 128) // n_even) * 128
    t_pad = -(-T // t_tile) * t_tile
    n_tt = t_pad // t_tile

    # Merged channel-major slab; time stays the minor (lane) dim -> no transpose
    # of the large tensors. Row 274 is a ones channel that activates the branch
    # biases folded into the weight slab.
    ones_row = jnp.ones((B, 1, T), jnp.bfloat16)
    x = jnp.concatenate([harmonic, percussive, chroma, contrast, ones_row], axis=1)
    x = jnp.pad(x, ((0, 0), (0, _C_PAD - (_C_DATA + 1)), (0, t_pad - T)))

    # SeasonalPatternModule (glue, tiny):
    # TODO(synk): SeasonalPatternModule is not defined in the reference source;
    # synthetic annual sin/cos harmonics producing the documented (B, 4) output.
    date = features.get('date', jnp.zeros((B,), jnp.float32)).astype(jnp.float32)
    day = jnp.remainder(date, 365.0)
    ang = 2.0 * jnp.pi * day / 365.0
    seasonal = jnp.stack(
        [jnp.sin(ang), jnp.cos(ang), jnp.sin(2.0 * ang), jnp.cos(2.0 * ang)], axis=1)  # (B,4)
    # row 4 == 1.0 activates the head layer-1 bias packed in the head slab.
    seas_in = jnp.concatenate(
        [seasonal, jnp.ones((B, 1), jnp.float32), jnp.zeros((B, 3), jnp.float32)],
        axis=1).reshape(B, 8, 1)                                                       # (B,8,1)

    kernel = functools.partial(_dead_show_kernel, t_valid=T, t_tile=t_tile, t_pad=t_pad)

    weight_args = (packed['wb'], packed['wf'], packed['h1'], packed['w2o'])

    def _const_spec(a):
        nd = a.ndim
        return pl.BlockSpec(a.shape, lambda b, t, _nd=nd: (0,) * _nd)

    in_specs = (
        [pl.BlockSpec((1, _C_PAD, t_tile), lambda b, t: (b, 0, t)),
         pl.BlockSpec((1, 8, 1), lambda b, t: (b, 0, 0))]
        + [_const_spec(a) for a in weight_args]
    )
    out_shapes = (
        jax.ShapeDtypeStruct((B, 64, 1), jnp.float32),
        jax.ShapeDtypeStruct((B, 8, 1), jnp.float32),
    )
    out_specs = (
        pl.BlockSpec((1, 64, 1), lambda b, t: (b, 0, 0)),
        pl.BlockSpec((1, 8, 1), lambda b, t: (b, 0, 0)),
    )

    audio_out, scal_out = pl.pallas_call(
        kernel,
        out_shape=out_shapes,
        grid=(B, n_tt),
        in_specs=in_specs,
        out_specs=out_specs,
        scratch_shapes=[pltpu.VMEM((64, 1), jnp.float32)],
        compiler_params=pltpu.CompilerParams(
            dimension_semantics=("parallel", "arbitrary"),
            vmem_limit_bytes=32 * 1024 * 1024,
        ),
    )(x, seas_in, *weight_args)

    audio_features = audio_out[:, :, 0]                             # (B, 64)
    days = scal_out[:, 0, :]                                        # (B, 1)
    log_variance = scal_out[:, 1, :]                                # (B, 1)

    return {
        'days': days,
        'log_variance': log_variance,
        'era_logits': jnp.zeros((B, 7), jnp.float32),
        'audio_features': audio_features,
        'seasonal_features': seasonal,
        'date': date,
        'year_logits': jnp.zeros((B, 30), jnp.float32),
    }


if __name__ == "__main__":
    key = jax.random.PRNGKey(0)
    pkey, k_h, k_p, k_c, k_s, k_d = jax.random.split(key, 6)
    params = init_params(pkey)
    packed = pack_params(params)

    B, F, T = 2, 128, 50  # shapes implied by _ensure_required_features
    features = {
        'harmonic': jax.random.normal(k_h, (B, 1, F, T), jnp.float32),
        'percussive': jax.random.normal(k_p, (B, 1, F, T), jnp.float32),
        'chroma': jax.random.normal(k_c, (B, 12, T), jnp.float32),
        'spectral_contrast': jax.random.normal(k_s, (B, 6, T), jnp.float32),
        'date': jax.random.uniform(k_d, (B,), jnp.float32, 0.0, 10000.0),
    }

    out = dead_show_forward(features, packed)
    out = jax.tree_util.tree_map(jax.block_until_ready, out)

    assert out['days'].shape == (B, 1)
    assert out['log_variance'].shape == (B, 1)
    assert out['audio_features'].shape == (B, 64)
    assert out['seasonal_features'].shape == (B, 4)
    assert out['era_logits'].shape == (B, 7)
    assert out['year_logits'].shape == (B, 30)
    assert out['date'].shape == (B,)
    assert bool(jnp.isfinite(out['days']).all())
    assert bool(jnp.isfinite(out['log_variance']).all())
    assert bool(jnp.isfinite(out['audio_features']).all())

    print("KERNEL_OK")
</pallas_src>

<mosaic_0001>
module attributes {stable_mosaic.version = 11 : i64} {
  func.func @_dead_show_kernel(%arg0: i32, %arg1: i32, %arg2: memref<1x288x128xbf16, #tpu.memory_space<vmem>>, %arg3: memref<1x8x1xf32, #tpu.memory_space<vmem>>, %arg4: memref<256x288xbf16, #tpu.memory_space<vmem>>, %arg5: memref<64x256xbf16, #tpu.memory_space<vmem>>, %arg6: memref<384x128xf32, #tpu.memory_space<vmem>>, %arg7: memref<136x256xf32, #tpu.memory_space<vmem>>, %arg8: memref<1x64x1xf32, #tpu.memory_space<vmem>>, %arg9: memref<1x8x1xf32, #tpu.memory_space<vmem>>, %arg10: memref<64x1xf32, #tpu.memory_space<vmem>>) attributes {dimension_semantics = [#tpu.dimension_semantics<parallel>, #tpu.dimension_semantics<arbitrary>], iteration_bounds = array<i64: 2, 1>, scalar_prefetch = 0 : i64, scratch_operands = 1 : i64, tpu.core_type = #tpu.core_type<tc>, window_params = [{transform_indices = @transform_0, window_bounds = array<i64: 1, 288, 128>}, {transform_indices = @transform_1, window_bounds = array<i64: 1, 8, 1>}, {pipeline_mode = #tpu.pipeline_mode<synchronous>, transform_indices = @transform_2, window_bounds = array<i64: 256, 288>}, {pipeline_mode = #tpu.pipeline_mode<synchronous>, transform_indices = @transform_3, window_bounds = array<i64: 64, 256>}, {pipeline_mode = #tpu.pipeline_mode<synchronous>, transform_indices = @transform_4, window_bounds = array<i64: 384, 128>}, {pipeline_mode = #tpu.pipeline_mode<synchronous>, transform_indices = @transform_5, window_bounds = array<i64: 136, 256>}, {transform_indices = @transform_6, window_bounds = array<i64: 1, 64, 1>}, {transform_indices = @transform_7, window_bounds = array<i64: 1, 8, 1>}]} {
    %c0_i32 = arith.constant 0 : i32
    %0 = arith.cmpi eq, %arg1, %c0_i32 : i32
    %1 = arith.extui %0 : i1 to i32
    %c0_i32_0 = arith.constant 0 : i32
    %2 = arith.cmpi ne, %1, %c0_i32_0 : i32
    scf.if %2 {
      %cst_19 = arith.constant 0.000000e+00 : f32
      %35 = vector.broadcast %cst_19 : f32 to vector<64x1xf32>
      %c0_20 = arith.constant 0 : index
      %c0_21 = arith.constant 0 : index
      %36 = vector.load %arg10[%c0_20, %c0_21] : memref<64x1xf32, #tpu.memory_space<vmem>>, vector<64x1xf32>
      tpu.vector_store %arg10[%c0_20, %c0_21], %35 {strides = array<i32>} : memref<64x1xf32, #tpu.memory_space<vmem>>, vector<64x1xf32>,
    } else {
    }
    %c0 = arith.constant 0 : index
    %c0_1 = arith.constant 0 : index
    %c0_2 = arith.constant 0 : index
    %3 = vector.load %arg2[%c0, %c0_1, %c0_2] : memref<1x288x128xbf16, #tpu.memory_space<vmem>>, vector<1x288x128xbf16>
    %4 = vector.shape_cast %3 : vector<1x288x128xbf16> to vector<288x128xbf16>
    %c0_3 = arith.constant 0 : index
    %c0_4 = arith.constant 0 : index
    %5 = vector.load %arg4[%c0_3, %c0_4] : memref<256x288xbf16, #tpu.memory_space<vmem>>, vector<256x288xbf16>
    %cst = arith.constant dense<0.000000e+00> : vector<256x128xf32>
    %6 = tpu.matmul %5, %4, %cst {dimension_numbers = #tpu.dot_dimension_numbers<[1], [0], [0], [1], [0, 0, 1, 1], [], []>} : vector<256x288xbf16>, vector<288x128xbf16>, vector<256x128xf32> -> vector<256x128xf32>
    %7 = arith.truncf %6 : vector<256x128xf32> to vector<256x128xbf16>
    %cst_5 = arith.constant -1.703130e+00 : bf16
    %8 = vector.broadcast %cst_5 : bf16 to vector<256x128xbf16>
    %9 = arith.mulf %7, %8 : vector<256x128xbf16>
    %10 = math.exp %9 : vector<256x128xbf16>
    %cst_6 = arith.constant 1.000000e+00 : bf16
    %11 = vector.broadcast %cst_6 : bf16 to vector<256x128xbf16>
    %12 = arith.addf %11, %10 : vector<256x128xbf16>
    %13 = arith.divf %7, %12 : vector<256x128xbf16>
    %c0_7 = arith.constant 0 : index
    %c74 = arith.constant 74 : index
    %14 = vector.load %arg6[%c0_7, %c74] : memref<384x128xf32, #tpu.memory_space<vmem>>, vector<64x1xf32>
    %c0_8 = arith.constant 0 : index
    %c0_9 = arith.constant 0 : index
    %15 = vector.load %arg5[%c0_8, %c0_9] : memref<64x256xbf16, #tpu.memory_space<vmem>>, vector<64x256xbf16>
    %cst_10 = arith.constant dense<0.000000e+00> : vector<64x128xf32>
    %16 = tpu.matmul %15, %13, %cst_10 {dimension_numbers = #tpu.dot_dimension_numbers<[1], [0], [0], [1], [0, 0, 1, 1], [], []>} : vector<64x256xbf16>, vector<256x128xbf16>, vector<64x128xf32> -> vector<64x128xf32>
    %17 = vector.broadcast %14 : vector<64x1xf32> to vector<64x128xf32>
    %18 = arith.addf %16, %17 : vector<64x128xf32>
    %cst_11 = arith.constant -1.702000e+00 : f32
    %19 = vector.broadcast %cst_11 : f32 to vector<64x128xf32>
    %20 = arith.mulf %18, %19 : vector<64x128xf32>
    %21 = math.exp %20 : vector<64x128xf32>
    %cst_12 = arith.constant 1.000000e+00 : f32
    %22 = vector.broadcast %cst_12 : f32 to vector<64x128xf32>
    %23 = arith.addf %22, %21 : vector<64x128xf32>
    %24 = tpu.reciprocal %23 {approx = true} : vector<64x128xf32> -> vector<64x128xf32>
    %25 = arith.mulf %18, %24 : vector<64x128xf32>
    %c0_i32_13 = arith.constant 0 : i32
    %26 = arith.cmpi slt, %arg1, %c0_i32_13 : i32
    %27 = arith.extui %26 : i1 to i32
    %c0_i32_14 = arith.constant 0 : i32
    %28 = arith.cmpi ne, %27, %c0_i32_14 : i32
    scf.if %28 {
      %c0_19 = arith.constant 0 : index
      %c0_20 = arith.constant 0 : index
      %35 = vector.load %arg10[%c0_19, %c0_20] : memref<64x1xf32, #tpu.memory_space<vmem>>, vector<64x1xf32>
      %cst_21 = arith.constant dense<0.000000e+00> : vector<64xf32>
      %36 = vector.multi_reduction <add>, %25, %cst_21 [1] : vector<64x128xf32> to vector<64xf32>
      %37 = vector.shape_cast %36 : vector<64xf32> to vector<64x1xf32>
      %38 = arith.addf %35, %37 : vector<64x1xf32>
      %c0_22 = arith.constant 0 : index
      %c0_23 = arith.constant 0 : index
      %39 = vector.load %arg10[%c0_22, %c0_23] : memref<64x1xf32, #tpu.memory_space<vmem>>, vector<64x1xf32>
      tpu.vector_store %arg10[%c0_22, %c0_23], %38 {strides = array<i32>} : memref<64x1xf32, #tpu.memory_space<vmem>>, vector<64x1xf32>,
    } else {
    }
    %c0_i32_15 = arith.constant 0 : i32
    %29 = arith.cmpi eq, %arg1, %c0_i32_15 : i32
    %30 = arith.extui %29 : i1 to i32
    %c0_i32_16 = arith.constant 0 : i32
    %31 = arith.cmpi ne, %30, %c0_i32_16 : i32
    scf.if %31 {
      %35 = tpu.iota {dimensions = array<i32: 1>} : vector<1x128xi32>
      %c128_i32 = arith.constant 128 : i32
      %36 = arith.muli %arg1, %c128_i32 : i32
      %37 = vector.broadcast %36 : i32 to vector<1x128xi32>
      %38 = arith.addi %35, %37 : vector<1x128xi32>
      %c50_i32 = arith.constant 50 : i32
      %39 = vector.broadcast %c50_i32 : i32 to vector<1x128xi32>
      %40 = arith.cmpi slt, %38, %39 : vector<1x128xi32>
      %41 = arith.extui %40 : vector<1x128xi1> to vector<1x128xi32>
      %42 = arith.sitofp %41 : vector<1x128xi32> to vector<1x128xf32>
      %c0_19 = arith.constant 0 : index
      %c0_20 = arith.constant 0 : index
      %43 = vector.load %arg10[%c0_19, %c0_20] : memref<64x1xf32, #tpu.memory_space<vmem>>, vector<64x1xf32>
      %44 = vector.broadcast %42 : vector<1x128xf32> to vector<64x128xf32>
      %45 = arith.mulf %25, %44 : vector<64x128xf32>
      %cst_21 = arith.constant dense<0.000000e+00> : vector<64xf32>
      %46 = vector.multi_reduction <add>, %45, %cst_21 [1] : vector<64x128xf32> to vector<64xf32>
      %47 = vector.shape_cast %46 : vector<64xf32> to vector<64x1xf32>
      %48 = arith.addf %43, %47 : vector<64x1xf32>
      %c0_22 = arith.constant 0 : index
      %c0_23 = arith.constant 0 : index
      %49 = vector.load %arg10[%c0_22, %c0_23] : memref<64x1xf32, #tpu.memory_space<vmem>>, vector<64x1xf32>
      tpu.vector_store %arg10[%c0_22, %c0_23], %48 {strides = array<i32>} : memref<64x1xf32, #tpu.memory_space<vmem>>, vector<64x1xf32>,
    } else {
    }
    %c0_i32_17 = arith.constant 0 : i32
    %32 = arith.cmpi eq, %arg1, %c0_i32_17 : i32
    %33 = arith.extui %32 : i1 to i32
    %c0_i32_18 = arith.constant 0 : i32
    %34 = arith.cmpi ne, %33, %c0_i32_18 : i32
    scf.if %34 {
      %c0_19 = arith.constant 0 : index
      %c0_20 = arith.constant 0 : index
      %35 = vector.load %arg10[%c0_19, %c0_20] : memref<64x1xf32, #tpu.memory_space<vmem>>, vector<64x1xf32>
      %cst_21 = arith.constant 2.000000e-02 : f32
      %36 = vector.broadcast %cst_21 : f32 to vector<64x1xf32>
      %37 = arith.mulf %35, %36 : vector<64x1xf32>
      %c0_22 = arith.constant 0 : index
      %c0_23 = arith.constant 0 : index
      %c0_24 = arith.constant 0 : index
      %38 = vector.load %arg8[%c0_22, %c0_23, %c0_24] : memref<1x64x1xf32, #tpu.memory_space<vmem>>, vector<1x64x1xf32>
      %39 = vector.shape_cast %38 : vector<1x64x1xf32> to vector<64x1xf32>
      %40 = vector.shape_cast %37 : vector<64x1xf32> to vector<1x64x1xf32>
      tpu.vector_store %arg8[%c0_22, %c0_23, %c0_24], %40 {strides = array<i32>} : memref<1x64x1xf32, #tpu.memory_space<vmem>>, vector<1x64x1xf32>,
      %c0_25 = arith.constant 0 : index
      %c0_26 = arith.constant 0 : index
      %c0_27 = arith.constant 0 : index
      %41 = vector.load %arg3[%c0_25, %c0_26, %c0_27] : memref<1x8x1xf32, #tpu.memory_space<vmem>>, vector<1x8x1xf32>
      %42 = vector.shape_cast %41 : vector<1x8x1xf32> to vector<8x1xf32>
      %c0_28 = arith.constant 0 : index
      %c0_29 = arith.constant 0 : index
      %43 = vector.load %arg6[%c0_28, %c0_29] : memref<384x128xf32, #tpu.memory_space<vmem>>, vector<384x64xf32>
      %cst_30 = arith.constant dense<0.000000e+00> : vector<384x1xf32>
      %44 = tpu.matmul %43, %37, %cst_30 {dimension_numbers = #tpu.dot_dimension_numbers<[1], [0], [0], [1], [0, 0, 1, 1], [], []>} : vector<384x64xf32>, vector<64x1xf32>, vector<384x1xf32> -> vector<384x1xf32>
      %c0_31 = arith.constant 0 : index
      %c64 = arith.constant 64 : index
      %45 = vector.load %arg6[%c0_31, %c64] : memref<384x128xf32, #tpu.memory_space<vmem>>, vector<384x8xf32>
      %cst_32 = arith.constant dense<0.000000e+00> : vector<384x1xf32>
      %46 = tpu.matmul %45, %42, %cst_32 {dimension_numbers = #tpu.dot_dimension_numbers<[1], [0], [0], [1], [0, 0, 1, 1], [], []>} : vector<384x8xf32>, vector<8x1xf32>, vector<384x1xf32> -> vector<384x1xf32>
      %47 = arith.addf %44, %46 : vector<384x1xf32>
      %cst_33 = arith.constant -1.702000e+00 : f32
      %48 = vector.broadcast %cst_33 : f32 to vector<384x1xf32>
      %49 = arith.mulf %47, %48 : vector<384x1xf32>
      %50 = math.exp %49 : vector<384x1xf32>
      %cst_34 = arith.constant 1.000000e+00 : f32
      %51 = vector.broadcast %cst_34 : f32 to vector<384x1xf32>
      %52 = arith.addf %51, %50 : vector<384x1xf32>
      %53 = tpu.reciprocal %52 {approx = true} : vector<384x1xf32> -> vector<384x1xf32>
      %54 = arith.mulf %47, %53 : vector<384x1xf32>
      %55 = vector.extract_strided_slice %54 {offsets = [0, 0], sizes = [256, 1], strides = [1, 1]} : vector<384x1xf32> to vector<256x1xf32>
      %56 = vector.extract_strided_slice %54 {offsets = [256, 0], sizes = [128, 1], strides = [1, 1]} : vector<384x1xf32> to vector<128x1xf32>
      %c0_35 = arith.constant 0 : index
      %c72 = arith.constant 72 : index
      %57 = vector.load %arg6[%c0_35, %c72] : memref<384x128xf32, #tpu.memory_space<vmem>>, vector<128x1xf32>
      %c0_36 = arith.constant 0 : index
      %c0_37 = arith.constant 0 : index
      %58 = vector.load %arg7[%c0_36, %c0_37] : memref<136x256xf32, #tpu.memory_space<vmem>>, vector<128x256xf32>
      %cst_38 = arith.constant dense<0.000000e+00> : vector<128x1xf32>
      %59 = tpu.matmul %58, %55, %cst_38 {dimension_numbers = #tpu.dot_dimension_numbers<[1], [0], [0], [1], [0, 0, 1, 1], [], []>} : vector<128x256xf32>, vector<256x1xf32>, vector<128x1xf32> -> vector<128x1xf32>
      %60 = arith.addf %59, %57 : vector<128x1xf32>
      %cst_39 = arith.constant -1.702000e+00 : f32
      %61 = vector.broadcast %cst_39 : f32 to vector<128x1xf32>
      %62 = arith.mulf %60, %61 : vector<128x1xf32>
      %63 = math.exp %62 : vector<128x1xf32>
      %cst_40 = arith.constant 1.000000e+00 : f32
      %64 = vector.broadcast %cst_40 : f32 to vector<128x1xf32>
      %65 = arith.addf %64, %63 : vector<128x1xf32>
      %66 = tpu.reciprocal %65 {approx = true} : vector<128x1xf32> -> vector<128x1xf32>
      %67 = arith.mulf %60, %66 : vector<128x1xf32>
      %c0_41 = arith.constant 0 : index
      %c73 = arith.constant 73 : index
      %68 = vector.load %arg6[%c0_41, %c73] : memref<384x128xf32, #tpu.memory_space<vmem>>, vector<8x1xf32>
      %c128 = arith.constant 128 : index
      %c0_42 = arith.constant 0 : index
      %69 = vector.load %arg7[%c128, %c0_42] : memref<136x256xf32, #tpu.memory_space<vmem>>, vector<8x128xf32>
      %cst_43 = arith.constant dense<0.000000e+00> : vector<8x1xf32>
      %70 = tpu.matmul %69, %67, %cst_43 {dimension_numbers = #tpu.dot_dimension_numbers<[1], [0], [0], [1], [0, 0, 1, 1], [], []>} : vector<8x128xf32>, vector<128x1xf32>, vector<8x1xf32> -> vector<8x1xf32>
      %c128_44 = arith.constant 128 : index
      %c128_45 = arith.constant 128 : index
      %71 = vector.load %arg7[%c128_44, %c128_45] : memref<136x256xf32, #tpu.memory_space<vmem>>, vector<8x128xf32>
      %cst_46 = arith.constant dense<0.000000e+00> : vector<8x1xf32>
      %72 = tpu.matmul %71, %56, %cst_46 {dimension_numbers = #tpu.dot_dimension_numbers<[1], [0], [0], [1], [0, 0, 1, 1], [], []>} : vector<8x128xf32>, vector<128x1xf32>, vector<8x1xf32> -> vector<8x1xf32>
      %73 = arith.addf %70, %72 : vector<8x1xf32>
      %74 = arith.addf %73, %68 : vector<8x1xf32>
      %c0_47 = arith.constant 0 : index
      %c0_48 = arith.constant 0 : index
      %c0_49 = arith.constant 0 : index
      %75 = vector.load %arg9[%c0_47, %c0_48, %c0_49] : memref<1x8x1xf32, #tpu.memory_space<vmem>>, vector<1x8x1xf32>
      %76 = vector.shape_cast %75 : vector<1x8x1xf32> to vector<8x1xf32>
      %77 = vector.shape_cast %74 : vector<8x1xf32> to vector<1x8x1xf32>
      tpu.vector_store %arg9[%c0_47, %c0_48, %c0_49], %77 {strides = array<i32>} : memref<1x8x1xf32, #tpu.memory_space<vmem>>, vector<1x8x1xf32>,
    } else {
    }
    return
  }
  func.func @transform_0(%arg0: i32, %arg1: i32) -> (i32, i32, i32) {
    %c0_i32 = arith.constant 0 : i32
    %c0_i32_0 = arith.constant 0 : i32
    return %arg0, %c0_i32, %arg1 : i32, i32, i32
  }
  func.func @transform_1(%arg0: i32, %arg1: i32) -> (i32, i32, i32) {
    %c0_i32 = arith.constant 0 : i32
    %c0_i32_0 = arith.constant 0 : i32
    %c0_i32_1 = arith.constant 0 : i32
    return %arg0, %c0_i32, %c0_i32_0 : i32, i32, i32
  }
  func.func @transform_2(%arg0: i32, %arg1: i32) -> (i32, i32) {
    %c0_i32 = arith.constant 0 : i32
    %c0_i32_0 = arith.constant 0 : i32
    %c0_i32_1 = arith.constant 0 : i32
    return %c0_i32, %c0_i32_0 : i32, i32
  }
  func.func @transform_3(%arg0: i32, %arg1: i32) -> (i32, i32) {
    %c0_i32 = arith.constant 0 : i32
    %c0_i32_0 = arith.constant 0 : i32
    %c0_i32_1 = arith.constant 0 : i32
    return %c0_i32, %c0_i32_0 : i32, i32
  }
  func.func @transform_4(%arg0: i32, %arg1: i32) -> (i32, i32) {
    %c0_i32 = arith.constant 0 : i32
    %c0_i32_0 = arith.constant 0 : i32
    %c0_i32_1 = arith.constant 0 : i32
    return %c0_i32, %c0_i32_0 : i32, i32
  }
  func.func @transform_5(%arg0: i32, %arg1: i32) -> (i32, i32) {
    %c0_i32 = arith.constant 0 : i32
    %c0_i32_0 = arith.constant 0 : i32
    %c0_i32_1 = arith.constant 0 : i32
    return %c0_i32, %c0_i32_0 : i32, i32
  }
  func.func @transform_6(%arg0: i32, %arg1: i32) -> (i32, i32, i32) {
    %c0_i32 = arith.constant 0 : i32
    %c0_i32_0 = arith.constant 0 : i32
    %c0_i32_1 = arith.constant 0 : i32
    return %arg0, %c0_i32, %c0_i32_0 : i32, i32, i32
  }
  func.func @transform_7(%arg0: i32, %arg1: i32) -> (i32, i32, i32) {
    %c0_i32 = arith.constant 0 : i32
    %c0_i32_0 = arith.constant 0 : i32
    %c0_i32_1 = arith.constant 0 : i32
    return %arg0, %c0_i32, %c0_i32_0 : i32, i32, i32
  }
}

</mosaic_0001>

<bundles_post_ra>
// kernel: tpu_custom_call.1
= control target key start
LH: loop header
LB: loop body
LE: loop exit
PB: predicated region body
PF: predicated region fallthrough
CT: control target
= control target key end

     0   :  { %13 = vsyncpa [#allocation4], 0  ;;  %s6680_s0 = inlined_call_operand.vmem [shape: bf16[2,288,128], index: 0, kind: input, shape index: {}]   ;;  %s6681_s1 = inlined_call_operand.vmem [shape: f32[2,8,1], index: 1, kind: input, shape index: {}]   ;;  %s6682_s2 = inlined_call_operand.vmem [shape: bf16[256,288], index: 2, kind: input, shape index: {}]   ;;  %s6683_s3 = inlined_call_operand.hbm [shape: bf16[64,256], index: 3, kind: input, shape index: {}]   ;;  %s6684_s4 = inlined_call_operand.vmem [shape: f32[384,128], index: 4, kind: input, shape index: {}]   ;;  %s6685_s5 = inlined_call_operand.hbm [shape: f32[136,256], index: 5, kind: input, shape index: {}]   ;;  %s6686_s6 = inlined_call_operand.vmem [shape: f32[2,64,1], index: 6, kind: output, shape index: {0}]   ;;  %s6687_s7 = inlined_call_operand.vmem [shape: f32[2,8,1], index: 7, kind: output, shape index: {1}]  }
   0x1   :  { %14 = vsyncpa [#allocation6], 0  ;;  %s5258_s24 = smov 0   ;;  %s5260_s25 = smov 0  }
   0x2   :  { %s5262_s26 = smov 0  }
   0x3 LB: > { %s3583_s27 = sadd.s32 4294967295, %s5203_s26   ;;  %s32_s28 = sadd.s32 1, %s5199_s25  ;;  %s5203_s26 = sphi %s5262_s26, %s20_s26   ;;  %s5199_s25 = sphi %s5260_s25, %s6697_s25   ;;  %s5195_s24 = sphi %s5258_s24, %s6696_s24  }
   0x4   : > { %p34_p0 = scmp.ge.s32.totalorder %s32_s28, 2  ;;  %p3585_p1 = scmp.ge.s32.totalorder %s5203_s26, 1 }
   0x5   : > { %p227_p2 = scmp.lt.s32.totalorder %s5203_s26, 3  ;;  %p5283_p4 = scmp.eq.s32.totalorder %s3583_s27, 0 }
   0x6   : > { %s6699_s28 = smov (%p34_p0, %s32_s28), 0  ;;  %s5205_s8 = smov [#allocation3]  }
   0x7   : > { %p5279_p3 = pnand %p3585_p1, %p227_p2  ;;  %s242_s9 = sshll.u32 %s5205_s8, 4  ;;  %s243_s9 = int_to_ptr.vmem [resolvable:$true] %s242_s9 }
   0x8   : > { %s6692_s30 = scalar_select %p5283_p4, 1, 0 }
   0x9   : > { %s6691_s29 = scalar_select %p5279_p3, 1, 0 }
   0xa   : > { %p4601_p5 = pneg %p5279_p3  ;;  %s5206_s11 = smov [#allocation5]  }
   0xb   : > { %s258_s12 = sshll.u32 %s5206_s11, 4  ;;  %s5117_s15 = scalar_lea.hbm %s6683_s3, 1024  ;;  %s5295_s12 = int_to_ptr.vmem [resolvable:$true] %s258_s12 }
   0xc   : > { %p5291_p6 = pnand %p5283_p4, %p4601_p5  ;;  %p5118_p7 = scmp.ne.s32.totalorder %s6683_s3, %s5117_s15 }
   0xd   : > { %p5124_p11 = scmp.lt.u32.totalorder %s5117_s15, %s6683_s3 }
   0xe   : > { %p5119_p8 = pneg %p5291_p6 }
  0x10   : > { %p5120_p9 = pnand %p5119_p8, %p5118_p7 }
  0x12   : > { %p5121_p10 = pneg %p5120_p9 }
  0x14   : > { %p5126_p12 = pnand %p5124_p11, %p5121_p10 }
  0x16   : > { %5129 = shalt.err (!%p5126_p12)
}
  0x17   : > { %s5130_s20 = scalar_lea.vmem %s243_s9, 1024  ;;  %p5138_p2 = scmp.lt.s32.totalorder %s243_s9, %s243_s9 }
  0x18   : > { %p5131_p13 = scmp.ne.s32.totalorder %s243_s9, %s5130_s20  ;;  %p5139_p5 = scmp.lt.s32.totalorder %s5130_s20, %s5130_s20 }
  0x1a   : > { %p5133_p0 = pnand %p5131_p13, %p5119_p8  ;;  %p5140_p4 = por %p5139_p5, %p5138_p2 }
  0x1c   : > { %p5134_p1 = pneg %p5133_p0 }
  0x1e   : > { %p5141_p3 = pnand %p5140_p4, %p5134_p1 }
  0x20   : > { %5144 = shalt.err (!%p5141_p3)
}
  0x21   : > { %s5207_s21 = smov 128   ;;  %s5208_s22 = smov 8  }
  0x22   : > { %4604 = dma.hbm_to_vmem [thread:$0]  (!%p5291_p6), %s6683_s3, 1024, %s243_s9, [#allocation4], %s5207_s21, %s5207_s21, %s5208_s22  }
  0x23   : > { %s5145_s13 = scalar_lea.hbm %s6685_s5, 4352 }
  0x24   : > { %p5146_p7 = scmp.ne.s32.totalorder %s6685_s5, %s5145_s13  ;;  %p5152_p9 = scmp.lt.u32.totalorder %s5145_s13, %s6685_s5 }
  0x26   : > { %p5148_p3 = pnand %p5146_p7, %p5119_p8 }
  0x28   : > { %p5149_p4 = pneg %p5148_p3 }
  0x2a   : > { %p5154_p10 = pnand %p5152_p9, %p5149_p4 }
  0x2c   : > { %5157 = shalt.err (!%p5154_p10)
}
  0x2d   : > { %s5158_s9 = scalar_lea.vmem %s5295_s12, 4352  ;;  %p5166_p0 = scmp.lt.s32.totalorder %s5295_s12, %s5295_s12 }
  0x2e   : > { %p5159_p11 = scmp.ne.s32.totalorder %s5295_s12, %s5158_s9  ;;  %p5167_p1 = scmp.lt.s32.totalorder %s5158_s9, %s5158_s9 }
  0x30   : > { %p5161_p12 = pnand %p5159_p11, %p5119_p8  ;;  %p5168_p2 = por %p5167_p1, %p5166_p0 }
  0x32   : > { %p5162_p13 = pneg %p5161_p12 }
  0x34   : > { %p5169_p5 = pnand %p5168_p2, %p5162_p13 }
  0x36   : > { %5172 = shalt.err (!%p5169_p5)
}
  0x37   : > { %s5209_s18 = smov 256   ;;  %s5210_s19 = smov 16  }
  0x38   : > { %4607 = dma.hbm_to_vmem [thread:$0]  (!%p5291_p6), %s6685_s5, 4352, %s5295_s12, [#allocation6], %s5209_s18, %s5209_s18, %s5210_s19  }
  0x39   : > { %p6694_p7 = scmp.ne.s32.totalorder %s6691_s29, 0 }
  0x3a   : > { %p6695_p8 = scmp.ne.s32.totalorder (!%p6694_p7), %s6692_s30, 0 }
  0x3b   : > { %292 = sbr.rel (%p6694_p7) target bundleno = 1795 (0x703), region = 44 }
  0x42   : > { %5186 = dma.done.wait (%p6695_p8), [#allocation4], 1024  }
  0x43   : > { %5188 = vsyncadd (%p6695_p8), [#allocation4], 4294966272 }
  0x44   : > { %5190 = dma.done.wait (%p6695_p8), [#allocation6], 4352  }
  0x45   : > { %5192 = vsyncadd (%p6695_p8), [#allocation6], 4294962944  ;;  %p339_p3 = scmp.lt.s32.totalorder %s5195_s24, 1  ;;  %v4669_v11 = vld [vmem:[%s6682_s2 + $0x4] ss:$12 sps:$4 sm:$0xff]   ;;  %vm824_vm0 = vcmask 261120  }
  0x46   : > { %905 = vmatprep.mubr.bf16.mxu0 %v4669_v11  ;;  %v4667_v19 = vld [vmem:[%s6682_s2] ss:$12 sps:$4 sm:$0xff]   ;;  %v4696_v20 = vld [vmem:[%s6682_s2 + $0xc8] ss:$12 sps:$4 sm:$0xff]   ;;  %v4704_v23 = vld [vmem:[%s6682_s2 + $0xf8] ss:$12 sps:$4 sm:$0xff]  }
  0x47   : > { %s6701_s24 = smov (!%p339_p3, %s5195_s24), 1  ;;  %v4670_v21 = vld [vmem:[%s6682_s2 + $0x1c] ss:$12 sps:$4 sm:$0xff]   ;;  %4196 = vmatprep.mubr.msk.bf16.mxu1 %vm824_vm0, %v4696_v20  ;;  %v4697_v22 = vld [vmem:[%s6682_s2 + $0xe0] ss:$12 sps:$4 sm:$0xff]   ;;  %s5212_s12 = smov 64  }
  0x48   : > { %s4592_s29 = smul.u32 144, %s6701_s24  ;;  %v4672_v24 = vld [vmem:[%s6682_s2 + $0x18] ss:$12 sps:$4 sm:$0xff]   ;;  %v4673_v25 = vld [vmem:[%s6682_s2 + $0x34] ss:$12 sps:$4 sm:$0xff]   ;;  %s3593_s8 = sshll.u32 %s6701_s24, 3 }
  0x49   : > { %v4705_v26 = vld [vmem:[%s6682_s2 + $0x110] ss:$12 sps:$4 sm:$0xff]   ;;  %v4712_v27 = vld [vmem:[%s6682_s2 + $0x128] ss:$12 sps:$4 sm:$0xff]   ;;  %v4676_v29 = vld [vmem:[%s6682_s2 + $0x4c] ss:$12 sps:$4 sm:$0xff]   ;;  %s350_s14 = scalar_lea.vmem %s6681_s1, %s3593_s8  ;;  %s359_s30 = scalar_lea.vmem %s6687_s7, %s3593_s8 }
  0x4a   : > { %s5362_s22 = scalar_lea.vmem %s6680_s0, %s4592_s29  ;;  %v4675_v28 = vld [vmem:[%s6682_s2 + $0x30] ss:$12 sps:$4 sm:$0xff]   ;;  %v4713_v30 = vld [vmem:[%s6682_s2 + $0x140] ss:$12 sps:$4 sm:$0xff]   ;;  %v4720_v31 = vld [vmem:[%s6682_s2 + $0x158] ss:$12 sps:$4 sm:$0xff]  }
  0x4b   : > { %v4651_v0 = vld [vmem:[%s5362_s22 + $0x40] sm:$0xff]   ;;  %v4653_v2 = vld [vmem:[%s5362_s22 + $0x48] sm:$0xff]   ;;  %v4655_v4 = vld [vmem:[%s5362_s22 + $0x50] sm:$0xff]   ;;  %vm1854_vm1 = vcmask 64512   ;;  %vm367_vm2 = vcmask 7168   ;;  %s3786_s18 = sshll.u32 %s6701_s24, 6 }
  0x4c   : > { %v4652_v1 = vld [vmem:[%s5362_s22] sm:$0xff]   ;;  %3787 = vmatprep.subr.bf16.mxu0 %v4651_v0  ;;  %v4654_v3 = vld [vmem:[%s5362_s22 + $0x8] sm:$0xff]   ;;  %v4656_v5 = vld [vmem:[%s5362_s22 + $0x10] sm:$0xff]   ;;  %vm2256_vm4 = vcmask 523264   ;;  %s5215_s13 = smov 56   ;;  %vm5216_vm5 = vmmov 0  }
  0x4d   : > { %3788 = vmatpush3.bf16.msra.mxu0 %v4652_v1  ;;  %v4657_v6 = vld [vmem:[%s5362_s22 + $0x58] sm:$0xff]   ;;  %v4659_v8 = vld [vmem:[%s5362_s22 + $0x60] sm:$0xff]   ;;  %v4661_v10 = vld [vmem:[%s5362_s22 + $0x68] sm:$0xff]  }
  0x4e   : > { %3789 = vmatprep.subr.bf16.mxu0 %v4653_v2  ;;  %v4658_v7 = vld [vmem:[%s5362_s22 + $0x18] sm:$0xff]   ;;  %v4660_v9 = vld [vmem:[%s5362_s22 + $0x20] sm:$0xff]   ;;  %v4662_v12 = vld [vmem:[%s5362_s22 + $0x28] sm:$0xff]  }
  0x4f   : > { %v4663_v13 = vld [vmem:[%s5362_s22 + $0x70] sm:$0xff]   ;;  %v4665_v15 = vld [vmem:[%s5362_s22 + $0x78] sm:$0xff]   ;;  %v4691_v17 = vld [vmem:[%s5362_s22 + $0x80] sm:$0xff]  }
  0x50   : > { %v4664_v14 = vld [vmem:[%s5362_s22 + $0x30] sm:$0xff]   ;;  %v4666_v16 = vld [vmem:[%s5362_s22 + $0x38] sm:$0xff]   ;;  %v4692_v18 = vld [vmem:[%s5362_s22 + $0x88] sm:$0xff]   ;;  %4540 = vmatprep.subr.bf16.mxu1 %v4691_v17 }
  0x51   : > { %3790 = vmatpush3.bf16.msra.mxu0 %v4654_v3  ;;  %4542 = vmatpush3.bf16.msra.mxu1 %v4691_v17  ;;  %v4678_v32 = vld [vmem:[%s6682_s2 + $0x48] ss:$12 sps:$4 sm:$0xff]   ;;  %v4679_v33 = vld [vmem:[%s6682_s2 + $0x64] ss:$12 sps:$4 sm:$0xff]   ;;  %v4681_v35 = vld [vmem:[%s6682_s2 + $0x60] ss:$12 sps:$4 sm:$0xff]  }
  0x52   : > { %3791 = vmatprep.subr.bf16.mxu0 %v4655_v4  ;;  %4541 = vmatprep.subr.bf16.mxu1 %v4692_v18  ;;  %v4721_v34 = vld [vmem:[%s6682_s2 + $0x170] ss:$12 sps:$4 sm:$0xff]   ;;  %v4684_v37 = vld [vmem:[%s6682_s2 + $0x78] ss:$12 sps:$4 sm:$0xff]   ;;  %v4685_v38 = vld [vmem:[%s6682_s2 + $0x94] ss:$12 sps:$4 sm:$0xff]  }
  0x53   : > { %v4682_v36 = vld [vmem:[%s6682_s2 + $0x7c] ss:$12 sps:$4 sm:$0xff]   ;;  %v4688_v40 = vld [vmem:[%s6682_s2 + $0xac] ss:$12 sps:$4 sm:$0xff]   ;;  %v4693_v42 = vld [vmem:[%s6682_s2 + $0xc4] ss:$12 sps:$4 sm:$0xff]  }
  0x54   : > { %v4687_v39 = vld [vmem:[%s6682_s2 + $0x90] ss:$12 sps:$4 sm:$0xff]   ;;  %v4690_v41 = vld [vmem:[%s6682_s2 + $0xa8] ss:$12 sps:$4 sm:$0xff]   ;;  %v4695_v43 = vld [vmem:[%s6682_s2 + $0xc0] ss:$12 sps:$4 sm:$0xff]  }
  0x55   : > { %3792 = vmatpush3.bf16.msra.mxu0 %v4656_v5  ;;  %4543 = vmatpush3.bf16.msra.mxu1 %v4692_v18  ;;  %v4698_v44 = vld [vmem:[%s6682_s2 + $0xdc] ss:$12 sps:$4 sm:$0xff]   ;;  %v4700_v45 = vld [vmem:[%s6682_s2 + $0xd8] ss:$12 sps:$4 sm:$0xff]   ;;  %v4701_v46 = vld [vmem:[%s6682_s2 + $0xf4] ss:$12 sps:$4 sm:$0xff]  }
  0x56   : > { %3793 = vmatprep.subr.bf16.mxu0 %v4657_v6  ;;  %v4703_v47 = vld [vmem:[%s6682_s2 + $0xf0] ss:$12 sps:$4 sm:$0xff]   ;;  %v4706_v48 = vld [vmem:[%s6682_s2 + $0x10c] ss:$12 sps:$4 sm:$0xff]   ;;  %v4708_v49 = vld [vmem:[%s6682_s2 + $0x108] ss:$12 sps:$4 sm:$0xff]  }
  0x57   : > { %v4709_v50 = vld [vmem:[%s6682_s2 + $0x124] ss:$12 sps:$4 sm:$0xff]   ;;  %v4711_v51 = vld [vmem:[%s6682_s2 + $0x120] ss:$12 sps:$4 sm:$0xff]   ;;  %v4714_v52 = vld [vmem:[%s6682_s2 + $0x13c] ss:$12 sps:$4 sm:$0xff]  }
  0x58   : > { %4197 = vmatmul.mubr.msk.bf16.vlgmr.msra.gmra.mrb[0].mxu1 %vm824_vm0, %v4697_v22  ;;  %v4716_v53 = vld [vmem:[%s6682_s2 + $0x138] ss:$12 sps:$4 sm:$0xff]   ;;  %v4717_v54 = vld [vmem:[%s6682_s2 + $0x154] ss:$12 sps:$4 sm:$0xff]   ;;  %v4719_v55 = vld [vmem:[%s6682_s2 + $0x150] ss:$12 sps:$4 sm:$0xff]  }
  0x59   : > { %3794 = vmatpush3.bf16.msra.mxu0 %v4658_v7  ;;  %4200 = vmatprep.mubr.msk.bf16.mxu1 %vm824_vm0, %v4704_v23  ;;  %v4722_v56 = vld [vmem:[%s6682_s2 + $0x16c] ss:$12 sps:$4 sm:$0xff]   ;;  %v4724_v57 = vld [vmem:[%s6682_s2 + $0x168] ss:$12 sps:$4 sm:$0xff]   ;;  %v4728_v61 = vld [vmem:[%s6682_s2 + $0x50] ss:$12 sps:$4 sm:$0xff]  }
  0x5a   : > { %3795 = vmatprep.subr.bf16.mxu0 %v4659_v8  ;;  %v4725_v58 = vld [vmem:[%s6682_s2 + $0x8] ss:$12 sps:$4 sm:$0xff]   ;;  %v4726_v59 = vld [vmem:[%s6682_s2 + $0x20] ss:$12 sps:$4 sm:$0xff]   ;;  %v4727_v60 = vld [vmem:[%s6682_s2 + $0x38] ss:$12 sps:$4 sm:$0xff]  }
  0x5b   : > { %v4729_v62 = vld [vmem:[%s6682_s2 + $0x68] ss:$12 sps:$4 sm:$0xff]   ;;  %v4730_v63 = vld [vmem:[%s6682_s2 + $0x80] ss:$12 sps:$4 sm:$0xff]   ;;  %v4731_v0 = vld [vmem:[%s6682_s2 + $0x98] ss:$12 sps:$4 sm:$0xff]  }
  0x5c   : > { %v4732_v1 = vld [vmem:[%s6682_s2 + $0xb0] ss:$12 sps:$4 sm:$0xff]  }
  0x5d   : > { %3796 = vmatpush3.bf16.msra.mxu0 %v4660_v9 }
  0x5e   : > { %3797 = vmatprep.subr.bf16.mxu0 %v4661_v10 }
  0x60   : > { %4201 = vmatmul.mubr.msk.bf16.gmra.mrb[4].mxu1 %vm824_vm0, %v4705_v26 }
  0x61   : > { %3798 = vmatpush3.bf16.msra.mxu0 %v4662_v12  ;;  %4204 = vmatprep.mubr.msk.bf16.mxu1 %vm824_vm0, %v4712_v27 }
  0x62   : > { %3799 = vmatprep.subr.bf16.mxu0 %v4663_v13 }
  0x65   : > { %3800 = vmatpush3.bf16.msra.mxu0 %v4664_v14 }
  0x66   : > { %3801 = vmatprep.subr.bf16.mxu0 %v4665_v15 }
  0x68   : > { %4205 = vmatmul.mubr.msk.bf16.gmra.mrb[8].mxu1 %vm824_vm0, %v4713_v30 }
  0x69   : > { %3802 = vmatpush3.bf16.msra.mxu0 %v4666_v16  ;;  %4208 = vmatprep.mubr.msk.bf16.mxu1 %vm824_vm0, %v4720_v31 }
  0x6a   : > { %4176 = vmatprep.subr.bf16.mxu0 %v4691_v17 }
  0x6c   : > { %906 = vmatmul.mubr.bf16.vlgmr.msra.gmra.mrb[0].mxu0 %v4667_v19 }
  0x6d   : > { %913 = vmatprep.mubr.bf16.mxu0 %v4670_v21  ;;  %4177 = vmatpush3.bf16.msra.mxu0 %v4691_v17 }
  0x6e   : > { %4178 = vmatprep.subr.bf16.mxu0 %v4692_v18 }
  0x70   : > { %4209 = vmatmul.mubr.msk.bf16.gmra.mrb[12].mxu1 %vm824_vm0, %v4721_v34 }
  0x71   : > { %4179 = vmatpush3.bf16.msra.mxu0 %v4692_v18 }
  0x74   : > { %914 = vmatmul.mubr.bf16.gmra.mrb[4].mxu0 %v4672_v24 }
  0x75   : > { %921 = vmatprep.mubr.bf16.mxu0 %v4673_v25 }
  0x7c   : > { %922 = vmatmul.mubr.bf16.gmra.mrb[8].mxu0 %v4675_v28 }
  0x7d   : > { %929 = vmatprep.mubr.bf16.mxu0 %v4676_v29 }
  0x84   : > { %930 = vmatmul.mubr.bf16.gmra.mrb[12].mxu0 %v4678_v32 }
  0x85   : > { %937 = vmatprep.mubr.bf16.mxu0 %v4679_v33 }
  0x8c   : > { %938 = vmatmul.mubr.bf16.gmra.mrb[16].mxu0 %v4681_v35 }
  0x8d   : > { %945 = vmatprep.mubr.bf16.mxu0 %v4682_v36 }
  0x94   : > { %946 = vmatmul.mubr.bf16.gmra.mrb[20].mxu0 %v4684_v37 }
  0x95   : > { %953 = vmatprep.mubr.bf16.mxu0 %v4685_v38 }
  0x9c   : > { %954 = vmatmul.mubr.bf16.gmra.mrb[24].mxu0 %v4687_v39 }
  0x9d   : > { %961 = vmatprep.mubr.bf16.mxu0 %v4688_v40 }
  0xa4   : > { %962 = vmatmul.mubr.bf16.gmra.mrb[28].mxu0 %v4690_v41 }
  0xa5   : > { %969 = vmatprep.mubr.bf16.mxu0 %v4693_v42 }
  0xac   : > { %970 = vmatmul.mubr.bf16.gmra.mrb[32].mxu0 %v4695_v43 }
  0xad   : > { %977 = vmatprep.mubr.bf16.mxu0 %v4698_v44 }
  0xb4   : > { %978 = vmatmul.mubr.bf16.gmra.mrb[36].mxu0 %v4700_v45 }
  0xb5   : > { %985 = vmatprep.mubr.bf16.mxu0 %v4701_v46 }
  0xbc   : > { %986 = vmatmul.mubr.bf16.gmra.mrb[40].mxu0 %v4703_v47 }
  0xbd   : > { %993 = vmatprep.mubr.bf16.mxu0 %v4706_v48 }
  0xc4   : > { %994 = vmatmul.mubr.bf16.gmra.mrb[44].mxu0 %v4708_v49 }
  0xc5   : > { %1001 = vmatprep.mubr.bf16.mxu0 %v4709_v50 }
  0xcc   : > { %1002 = vmatmul.mubr.bf16.gmra.mrb[48].mxu0 %v4711_v51 }
  0xcd   : > { %1009 = vmatprep.mubr.bf16.mxu0 %v4714_v52 }
  0xd4   : > { %1010 = vmatmul.mubr.bf16.gmra.mrb[52].mxu0 %v4716_v53 }
  0xd5   : > { %1017 = vmatprep.mubr.bf16.mxu0 %v4717_v54 }
  0xdc   : > { %1018 = vmatmul.mubr.bf16.gmra.mrb[56].mxu0 %v4719_v55 }
  0xdd   : > { %1025 = vmatprep.mubr.bf16.mxu0 %v4722_v56 }
  0xe4   : > { %1026 = vmatmul.mubr.bf16.gmra.mrb[60].mxu0 %v4724_v57 }
  0xe5   : > { %4180 = vmatprep.mubr.msk.bf16.mxu0 %vm824_vm0, %v4725_v58 }
  0xec   : > { %4181 = vmatmul.mubr.msk.bf16.vlgmr.msra.gmra.mrb[64].mxu0 %vm824_vm0, %v4726_v59 }
  0xed   : > { %4184 = vmatprep.mubr.msk.bf16.mxu0 %vm824_vm0, %v4727_v60 }
  0xf4   : > { %4185 = vmatmul.mubr.msk.bf16.gmra.mrb[68].mxu0 %vm824_vm0, %v4728_v61 }
  0xf5   : > { %4188 = vmatprep.mubr.msk.bf16.mxu0 %vm824_vm0, %v4729_v62 }
  0xfc   : > { %4189 = vmatmul.mubr.msk.bf16.gmra.mrb[72].mxu0 %vm824_vm0, %v4730_v63 }
  0xfd   : > { %4192 = vmatprep.mubr.msk.bf16.mxu0 %vm824_vm0, %v4731_v0 }
 0x104   : > { %4193 = vmatmul.mubr.msk.bf16.gmra.mrb[76].mxu0 %vm824_vm0, %v4732_v1 }
 0x12b   : > { %v5544_v7 = vpop.f32.mrb[0].mxu1 }
 0x12c   : > { %v5548_v9 = vpop.f32.mrb[1].mxu1 }
 0x12d   : > { %v5550_v10 = vpop.f32.mrb[2].mxu1 }
 0x12e   : > { %v5552_v11 = vpop.f32.mrb[3].mxu1 }
 0x133   : > { %v5556_v17 = vpop.f32.mrb[4].mxu1 }
 0x134   : > { %v5560_v19 = vpop.f32.mrb[5].mxu1 }
 0x135   : > { %v5562_v20 = vpop.f32.mrb[6].mxu1 }
 0x136   : > { %v5564_v21 = vpop.f32.mrb[7].mxu1 }
 0x13b   : > { %v5568_v27 = vpop.f32.mrb[8].mxu1 }
 0x13c   : > { %v5572_v29 = vpop.f32.mrb[9].mxu1 }
 0x13d   : > { %v5574_v30 = vpop.f32.mrb[10].mxu1 }
 0x13e   : > { %v5576_v31 = vpop.f32.mrb[11].mxu1 }
 0x13f   : > { %v3803_v2 = vpop.f32.mrb[0].mxu0 }
 0x140   : > { %v3804_v3 = vpop.f32.mrb[1].mxu0 }
 0x141   : > { %v5542_v4 = vadd.f32 %v3804_v3, %v3803_v2  ;;  %v3806_v5 = vpop.f32.mrb[2].mxu0 }
 0x142   : > { %v3807_v6 = vpop.f32.mrb[3].mxu0 }
 0x143   : > { %v5546_v8 = vadd.f32 %v3807_v6, %v3806_v5  ;;  %v5580_v37 = vpop.f32.mrb[12].mxu1 }
 0x144   : > { %v5584_v39 = vpop.f32.mrb[13].mxu1 }
 0x145   : > { %v5586_v40 = vpop.f32.mrb[14].mxu1 }
 0x146   : > { %v5588_v41 = vpop.f32.mrb[15].mxu1 }
 0x147   : > { %v3809_v12 = vpop.f32.mrb[4].mxu0 }
 0x148   : > { %v3810_v13 = vpop.f32.mrb[5].mxu0 }
 0x149   : > { %v5554_v14 = vadd.f32 %v3810_v13, %v3809_v12  ;;  %v3812_v15 = vpop.f32.mrb[6].mxu0 }
 0x14a   : > { %v3813_v16 = vpop.f32.mrb[7].mxu0 }
 0x14b   : > { %v5558_v18 = vadd.f32 %v3813_v16, %v3812_v15  ;;  %v4735_v16 = vld [vmem:[#allocation3 + $0x4] ss:$8 sps:$4 sm:$0xff]  }
 0x14c   : > { %1451 = vmatprep.mubr.bf16.mxu1 %v4735_v16  ;;  %v1325_v16 = vld [vmem:[%s6684_s4 + $0x10] sm:$0xff] }
 0x14f   : > { %v3815_v22 = vpop.f32.mrb[8].mxu0 }
 0x150   : > { %v3816_v23 = vpop.f32.mrb[9].mxu0 }
 0x151   : > { %v5566_v24 = vadd.f32 %v3816_v23, %v3815_v22  ;;  %v3818_v25 = vpop.f32.mrb[10].mxu0 }
 0x152   : > { %v3819_v26 = vpop.f32.mrb[11].mxu0 }
 0x153   : > { %v5570_v28 = vadd.f32 %v3819_v26, %v3818_v25 }
 0x157   : > { %v3821_v32 = vpop.f32.mrb[12].mxu0 }
 0x158   : > { %v3822_v33 = vpop.f32.mrb[13].mxu0 }
 0x159   : > { %v5578_v34 = vadd.f32 %v3822_v33, %v3821_v32  ;;  %v3824_v35 = vpop.f32.mrb[14].mxu0 }
 0x15a   : > { %v3825_v36 = vpop.f32.mrb[15].mxu0 }
 0x15b   : > { %v5582_v38 = vadd.f32 %v3825_v36, %v3824_v35 }
 0x15f   : > { %v3827_v42 = vpop.f32.mrb[16].mxu0 }
 0x160   : > { %v3828_v43 = vpop.f32.mrb[17].mxu0 }
 0x161   : > { %v5590_v44 = vadd.f32 %v3828_v43, %v3827_v42  ;;  %v3830_v45 = vpop.f32.mrb[18].mxu0 }
 0x162   : > { %v3831_v46 = vpop.f32.mrb[19].mxu0 }
 0x163   : > { %v5592_v47 = vadd.f32 %v3831_v46, %v3830_v45 }
 0x167   : > { %v3833_v48 = vpop.f32.mrb[20].mxu0 }
 0x168   : > { %v3834_v49 = vpop.f32.mrb[21].mxu0 }
 0x169   : > { %v5594_v50 = vadd.f32 %v3834_v49, %v3833_v48  ;;  %v3836_v51 = vpop.f32.mrb[22].mxu0 }
 0x16a   : > { %v3837_v52 = vpop.f32.mrb[23].mxu0 }
 0x16b   : > { %v5596_v53 = vadd.f32 %v3837_v52, %v3836_v51 }
 0x16f   : > { %v3839_v54 = vpop.f32.mrb[24].mxu0 }
 0x170   : > { %v3840_v55 = vpop.f32.mrb[25].mxu0 }
 0x171   : > { %v5598_v56 = vadd.f32 %v3840_v55, %v3839_v54  ;;  %v3842_v57 = vpop.f32.mrb[26].mxu0 }
 0x172   : > { %v3843_v58 = vpop.f32.mrb[27].mxu0 }
 0x173   : > { %v5600_v59 = vadd.f32 %v3843_v58, %v3842_v57 }
 0x177   : > { %v3845_v60 = vpop.f32.mrb[28].mxu0 }
 0x178   : > { %v3846_v61 = vpop.f32.mrb[29].mxu0 }
 0x179   : > { %v5602_v62 = vadd.f32 %v3846_v61, %v3845_v60  ;;  %v3848_v63 = vpop.f32.mrb[30].mxu0 }
 0x17a   : > { %v3849_v0 = vpop.f32.mrb[31].mxu0 }
 0x17b   : > { %v5604_v1 = vadd.f32 %v3849_v0, %v3848_v63 }
 0x17f   : > { %v3851_v2 = vpop.f32.mrb[32].mxu0 }
 0x180   : > { %v3852_v3 = vpop.f32.mrb[33].mxu0 }
 0x181   : > { %v3853_v5 = vadd.f32 %v3852_v3, %v3851_v2  ;;  %v3854_v6 = vpop.f32.mrb[34].mxu0 }
 0x182   : > { %v3855_v12 = vpop.f32.mrb[35].mxu0 }
 0x183   : > { %v3856_v13 = vadd.f32 %v3855_v12, %v3854_v6  ;;  %v1133_v15 = vadd.f32 %v3853_v5, %v5548_v9 }
 0x185   : > { %v1136_v22 = vadd.f32 %v3856_v13, %v5552_v11 }
 0x187   : > { %v1203_v23 = vpack.c.bf16 %v1136_v22, %v1133_v15  ;;  %v3857_v25 = vpop.f32.mrb[36].mxu0  ;;  %v5211_v15 = vmov 74  }
 0x188   : > { %v3858_v26 = vpop.f32.mrb[37].mxu0  ;;  %4649 = vset.pattern.permute.xlu0 %v5211_v15  ;;  %4650 = vset.pattern.permute.xlu1 %v5211_v15 }
 0x189   : > { %v1219_v32 = vmul.bf16 3218784218, %v1203_v23  ;;  %v3859_v33 = vadd.f32 %v3858_v26, %v3857_v25  ;;  %v3860_v35 = vpop.f32.mrb[38].mxu0  ;;  %1351 = vperm.xlu1 %4650, %v1325_v16   ;;  %v1324_v25 = vld [vmem:[%s6684_s4 + $0x8] sm:$0xff]  ;;  %v1326_v26 = vld [vmem:[%s6684_s4 + $0x18] sm:$0xff] }
 0x18a   : > { %v3861_v36 = vpop.f32.mrb[39].mxu0 }
 0x18b   : > { %v1252_v42 = vmul.bf16 1069105081, %v1219_v32  ;;  %v1141_v43 = vadd.f32 %v5544_v7, %v3859_v33  ;;  %v3862_v45 = vadd.f32 %v3861_v36, %v3860_v35 }
 0x18d   : > { %4745 = vpow.bf16 %v1252_v42  ;;  %v1144_v46 = vadd.f32 %v5550_v10, %v3862_v45  ;;  %1356 = vperm.xlu1 %4650, %v1326_v26   ;;  %v1327_v42 = vld [vmem:[%s6684_s4 + $0x20] sm:$0xff] }
 0x18f   : > { %v5610_v48 = vpack.c.bf16 %v1144_v46, %v1141_v43  ;;  %v3863_v9 = vpop.f32.mrb[40].mxu0 }
 0x190   : > { %v3864_v49 = vpop.f32.mrb[41].mxu0 }
 0x191   : > { %v3865_v11 = vadd.f32 %v3864_v49, %v3863_v9  ;;  %v3866_v51 = vpop.f32.mrb[42].mxu0  ;;  %v1328_v9 = vld [vmem:[%s6684_s4 + $0x28] sm:$0xff] }
 0x192   : > { %v3867_v52 = vpop.f32.mrb[43].mxu0  ;;  %1366 = vperm.xlu1 %4650, %v1328_v9  }
 0x193   : > { %v3868_v54 = vadd.f32 %v3867_v52, %v3866_v51  ;;  %v1149_v55 = vadd.f32 %v3865_v11, %v5560_v19  ;;  %v1329_v51 = vld [vmem:[%s6684_s4 + $0x30] sm:$0xff] }
 0x195   : > { %v1152_v57 = vadd.f32 %v3868_v54, %v5564_v21  ;;  %v1323_v21 = vld [vmem:[%s6684_s4] sm:$0xff] }
 0x196   : > { %1341 = vperm.xlu0 %4649, %v1323_v21  }
 0x197   : > { %v5614_v58 = vpack.c.bf16 %v1152_v57, %v1149_v55  ;;  %v3869_v60 = vpop.f32.mrb[44].mxu0 }
 0x198   : > { %v4746_v7 = vpop.eup %4745  ;;  %v3870_v61 = vpop.f32.mrb[45].mxu0 }
 0x199   : > { %v1283_v63 = vadd.bf16 1065369472, %v4746_v7  ;;  %v3871_v0 = vadd.f32 %v3870_v61, %v3869_v60  ;;  %v3872_v10 = vpop.f32.mrb[46].mxu0 }
 0x19a   : > { %v3873_v2 = vpop.f32.mrb[47].mxu0  ;;  %1346 = vperm.xlu0 %4649, %v1324_v25  }
 0x19b   : > { %4747 = vrcp.bf16 %v1283_v63  ;;  %v1157_v3 = vadd.f32 %v5556_v17, %v3871_v0  ;;  %v3874_v5 = vadd.f32 %v3873_v2, %v3872_v10 }
 0x19d   : > { %v1160_v6 = vadd.f32 %v5562_v20, %v3874_v5 }
 0x19e   : > { %1361 = vperm.xlu0 %4649, %v1327_v42  }
 0x19f   : > { %v5618_v12 = vpack.c.bf16 %v1160_v6, %v1157_v3  ;;  %v3875_v19 = vpop.f32.mrb[48].mxu0 }
 0x1a0   : > { %v3876_v13 = vpop.f32.mrb[49].mxu0 }
 0x1a1   : > { %v3877_v22 = vadd.f32 %v3876_v13, %v3875_v19  ;;  %v3878_v17 = vpop.f32.mrb[50].mxu0 }
 0x1a2   : > { %v3879_v20 = vpop.f32.mrb[51].mxu0  ;;  %1371 = vperm.xlu0 %4649, %v1329_v51  }
 0x1a3   : > { %v3880_v32 = vadd.f32 %v3879_v20, %v3878_v17  ;;  %v1165_v33 = vadd.f32 %v3877_v22, %v5572_v29 }
 0x1a5   : > { %v1168_v35 = vadd.f32 %v3880_v32, %v5576_v31 }
 0x1a6   : > { %v4748_v36 = vpop.eup %4747  ;;  %1758 = vrot.lane.b32.xlu0 %v1323_v21, %s5212_s12 }
 0x1a7   : > { %v5637_v43 = vpack.c.bf16 %v1168_v35, %v1165_v33  ;;  %v3881_v45 = vpop.f32.mrb[52].mxu0  ;;  %v1308_v46 = vmul.bf16 %v4748_v36, %v1203_v23  ;;  %v1330_v23 = vld [vmem:[%s6684_s4 + $0x38] sm:$0xff]  ;;  %v1672_v36 = vld [vmem:[%s6684_s4 + $0x50] sm:$0xff] }
 0x1a8   : > { %v3882_v49 = vpop.f32.mrb[53].mxu0  ;;  %1376 = vperm.xlu1 %4650, %v1330_v23  }
 0x1a9   : > { %v3883_v11 = vadd.f32 %v3882_v49, %v3881_v45  ;;  %v3884_v29 = vpop.f32.mrb[54].mxu0  ;;  %3917 = vmatprep.subr.bf16.mxu1 %v1308_v46 }
 0x1aa   : > { %v3885_v31 = vpop.f32.mrb[55].mxu0  ;;  %1762 = vrot.lane.b32.xlu0 %v1325_v16, %s5212_s12  ;;  %v1670_v16 = vld [vmem:[%s6684_s4 + $0x40] sm:$0xff] }
 0x1ab   : > { %v1173_v52 = vadd.f32 %v5568_v27, %v3883_v11  ;;  %v3886_v54 = vadd.f32 %v3885_v31, %v3884_v29  ;;  %v1675_v31 = vld [vmem:[%s6684_s4 + $0x68] sm:$0xff] }
 0x1ac   : > { %1760 = vrot.lane.b32.xlu1 %v1324_v25, %s5212_s12 }
 0x1ad   : > { %v1176_v55 = vadd.f32 %v5574_v30, %v3886_v54 }
 0x1ae   : > { %1766 = vrot.lane.b32.xlu0 %v1327_v42, %s5212_s12  ;;  %v1221_v42 = vmul.bf16 3218784218, %v5614_v58 }
 0x1af   : > { %v5650_v57 = vpack.c.bf16 %v1176_v55, %v1173_v52  ;;  %v3887_v60 = vpop.f32.mrb[56].mxu0 }
 0x1b0   : > { %v3888_v7 = vpop.f32.mrb[57].mxu0  ;;  %1764 = vrot.lane.b32.xlu1 %v1326_v26, %s5212_s12  ;;  %v1258_v49 = vmul.bf16 1069105081, %v1221_v42 }
 0x1b1   : > { %v3889_v61 = vadd.f32 %v3888_v7, %v3887_v60  ;;  %v3890_v63 = vpop.f32.mrb[58].mxu0 }
 0x1b2   : > { %v3891_v0 = vpop.f32.mrb[59].mxu0  ;;  %1770 = vrot.lane.b32.xlu0 %v1329_v51, %s5212_s12 }
 0x1b3   : > { %v3892_v27 = vadd.f32 %v3891_v0, %v3890_v63  ;;  %v1181_v10 = vadd.f32 %v3889_v61, %v5584_v39  ;;  %v1223_v61 = vmul.bf16 3218784218, %v5637_v43 }
 0x1b4   : > { %1768 = vrot.lane.b32.xlu1 %v1328_v9, %s5212_s12 }
 0x1b5   : > { %v1184_v2 = vadd.f32 %v3892_v27, %v5588_v41  ;;  %v1220_v41 = vmul.bf16 3218784218, %v5610_v48 }
 0x1b6   : > { %1774 = vrot.lane.b32.xlu0 %v1670_v16, %s5212_s12 }
 0x1b7   : > { %v5658_v30 = vpack.c.bf16 %v1184_v2, %v1181_v10  ;;  %v3893_v3 = vpop.f32.mrb[60].mxu0  ;;  %v1255_v20 = vmul.bf16 1069105081, %v1220_v41 }
 0x1b8   : > { %v3894_v5 = vpop.f32.mrb[61].mxu0  ;;  %1772 = vrot.lane.b32.xlu1 %v1330_v23, %s5212_s12 }
 0x1b9   : > { %v3895_v6 = vadd.f32 %v3894_v5, %v3893_v3  ;;  %v3896_v19 = vpop.f32.mrb[62].mxu0  ;;  %4749 = vpow.bf16 %v1255_v20 }
 0x1ba   : > { %v3897_v21 = vpop.f32.mrb[63].mxu0  ;;  %1778 = vrot.lane.b32.xlu0 %v1672_v36, %s5212_s12 }
 0x1bb   : > { %v1189_v13 = vadd.f32 %v5580_v37, %v3895_v6  ;;  %v3898_v39 = vadd.f32 %v3897_v21, %v3896_v19  ;;  %v1671_v37 = vld [vmem:[%s6684_s4 + $0x48] sm:$0xff]  ;;  %v1224_v6 = vmul.bf16 3218784218, %v5650_v57 }
 0x1bc   : > { %1776 = vrot.lane.b32.xlu1 %v1671_v37, %s5212_s12 }
 0x1bd   : > { %v1192_v15 = vadd.f32 %v5586_v40, %v3898_v39  ;;  %v1225_v39 = vmul.bf16 3218784218, %v5658_v30 }
 0x1bf   : > { %v5670_v22 = vpack.c.bf16 %v1192_v15, %v1189_v13  ;;  %v4182_v17 = vpop.f32.mrb[64].mxu0  ;;  %v1679_v13 = vld [vmem:[%s6684_s4 + $0x88] sm:$0xff] }
 0x1c0   : > { %v1077_v25 = vadd.f32 %v4182_v17, %v5554_v14  ;;  %v1068_v26 = vpop.f32.mrb[65].mxu0 }
 0x1c1   : > { %v1069_v40 = vadd.f32 %v5542_v4, %v1068_v26  ;;  %v4183_v32 = vpop.f32.mrb[66].mxu0  ;;  %v1673_v4 = vld [vmem:[%s6684_s4 + $0x58] sm:$0xff] }
 0x1c2   : > { %v1080_v33 = vadd.f32 %v4183_v32, %v5558_v18  ;;  %v1071_v35 = vpop.f32.mrb[67].mxu0  ;;  %v1222_v18 = vmul.bf16 3218784218, %v5618_v12  ;;  %1780 = vrot.lane.b32.xlu1 %v1673_v4, %s5212_s12  ;;  %v1680_v32 = vld [vmem:[%s6684_s4 + $0x90] sm:$0xff] }
 0x1c3   : > { %v1072_v45 = vadd.f32 %v5546_v8, %v1071_v35  ;;  %v1674_v8 = vld [vmem:[%s6684_s4 + $0x60] sm:$0xff]  ;;  %v1270_v35 = vmul.bf16 1069105081, %v1225_v39 }
 0x1c4   : > { %v5688_v14 = vpack.c.bf16 %v1080_v33, %v1077_v25  ;;  %1782 = vrot.lane.b32.xlu0 %v1674_v8, %s5212_s12  ;;  %v1261_v7 = vmul.bf16 1069105081, %v1222_v18  ;;  %v4750_v5 = vpop.eup %4749  ;;  %v1226_v8 = vmul.bf16 3218784218, %v5670_v22 }
 0x1c5   : > { %v5690_v46 = vpack.c.bf16 %v1072_v45, %v1069_v40  ;;  %v1284_v25 = vadd.bf16 1065369472, %v4750_v5 }
 0x1c6   : > { %v1212_v9 = vmul.bf16 3218784218, %v5688_v14  ;;  %1784 = vrot.lane.b32.xlu1 %v1675_v31, %s5212_s12 }
 0x1c7   : > { %v1211_v11 = vmul.bf16 3218784218, %v5690_v46  ;;  %v4186_v29 = vpop.f32.mrb[68].mxu0 }
 0x1c8   : > { %v1231_v51 = vmul.bf16 1069105081, %v1212_v9  ;;  %v1093_v52 = vadd.f32 %v4186_v29, %v5578_v34  ;;  %v1084_v54 = vpop.f32.mrb[69].mxu0  ;;  %v1676_v34 = vld [vmem:[%s6684_s4 + $0x70] sm:$0xff]  ;;  %v5761_v29 = vld [vmem:[%s6684_s4 + $0xa8] sm:$0xff] }
 0x1c9   : > { %v1228_v23 = vmul.bf16 1069105081, %v1211_v11  ;;  %v1085_v55 = vadd.f32 %v5566_v24, %v1084_v54  ;;  %v4187_v60 = vpop.f32.mrb[70].mxu0  ;;  %v1677_v24 = vld [vmem:[%s6684_s4 + $0x78] sm:$0xff]  ;;  %1786 = vrot.lane.b32.xlu0 %v1676_v34, %s5212_s12  ;;  %v1273_v34 = vmul.bf16 1069105081, %v1226_v8 }
 0x1ca   : > { %4751 = vpow.bf16 %v1231_v51  ;;  %v1096_v63 = vadd.f32 %v4187_v60, %v5582_v38  ;;  %v1087_v0 = vpop.f32.mrb[71].mxu0  ;;  %v1264_v38 = vmul.bf16 1069105081, %v1223_v61  ;;  %1788 = vrot.lane.b32.xlu1 %v1677_v24, %s5212_s12 }
 0x1cb   : > { %4753 = vpow.bf16 %v1258_v49  ;;  %v1088_v27 = vadd.f32 %v5570_v28, %v1087_v0  ;;  %v1678_v28 = vld [vmem:[%s6684_s4 + $0x80] sm:$0xff] }
 0x1cc   : > { %4755 = vpow.bf16 %v1228_v23  ;;  %v5716_v10 = vpack.c.bf16 %v1096_v63, %v1093_v52 }
 0x1cd   : > { %v5718_v2 = vpack.c.bf16 %v1088_v27, %v1085_v55  ;;  %4757 = vpow.bf16 %v1261_v7  ;;  %1790 = vrot.lane.b32.xlu0 %v1678_v28, %s5212_s12  ;;  %v5779_v27 = vld [vmem:[%s6684_s4 + $0xb8] sm:$0xff] }
 0x1ce   : > { %v1214_v3 = vmul.bf16 3218784218, %v5716_v10  ;;  %1792 = vrot.lane.b32.xlu1 %v1679_v13, %s5212_s12  ;;  %v5799_v13 = vld [vmem:[%s6684_s4 + $0xc8] sm:$0xff] }
 0x1cf   : > { %v1213_v19 = vmul.bf16 3218784218, %v5718_v2  ;;  %v4190_v21 = vpop.f32.mrb[72].mxu0 }
 0x1d0   : > { %v1237_v41 = vmul.bf16 1069105081, %v1214_v3  ;;  %v1109_v15 = vadd.f32 %v4190_v21, %v5594_v50  ;;  %v1100_v16 = vpop.f32.mrb[73].mxu0  ;;  %v1267_v50 = vmul.bf16 1069105081, %v1224_v6  ;;  %v5793_v6 = vld [vmem:[%s6684_s4 + $0xc0] sm:$0xff] }
 0x1d1   : > { %v1234_v17 = vmul.bf16 1069105081, %v1213_v19  ;;  %v1101_v37 = vadd.f32 %v5590_v44, %v1100_v16  ;;  %v4191_v20 = vpop.f32.mrb[74].mxu0  ;;  %v1681_v44 = vld [vmem:[%s6684_s4 + $0x98] sm:$0xff]  ;;  %1794 = vrot.lane.b32.xlu0 %v1680_v32, %s5212_s12 }
 0x1d2   : > { %4759 = vpow.bf16 %v1237_v41  ;;  %v1112_v26 = vadd.f32 %v4191_v20, %v5596_v53  ;;  %v1103_v40 = vpop.f32.mrb[75].mxu0  ;;  %1796 = vrot.lane.b32.xlu1 %v1681_v44, %s5212_s12  ;;  %v5808_v20 = vld [vmem:[%s6684_s4 + $0xd0] sm:$0xff] }
 0x1d3   : > { %4761 = vpow.bf16 %v1264_v38  ;;  %v1104_v33 = vadd.f32 %v5592_v47, %v1103_v40  ;;  %v5754_v47 = vld [vmem:[%s6684_s4 + $0xa0] sm:$0xff] }
 0x1d4   : > { %4763 = vpow.bf16 %v1234_v17  ;;  %v5744_v36 = vpack.c.bf16 %v1112_v26, %v1109_v15  ;;  %v5813_v26 = vld [vmem:[%s6684_s4 + $0xe0] sm:$0xff] }
 0x1d5   : > { %v4752_v53 = vpop.eup %4751  ;;  %v5746_v42 = vpack.c.bf16 %v1104_v33, %v1101_v37  ;;  %4765 = vrcp.bf16 %v1284_v25  ;;  %1798 = vrot.lane.b32.xlu0 %v5754_v47, %s5212_s12 }
 0x1d6   : > { %v4754_v45 = vpop.eup %4753  ;;  %v1276_v4 = vadd.bf16 1065369472, %v4752_v53  ;;  %v1216_v18 = vmul.bf16 3218784218, %v5744_v36  ;;  %4767 = vpow.bf16 %v1267_v50  ;;  %1800 = vrot.lane.b32.xlu1 %v5761_v29, %s5212_s12 }
 0x1d7   : > { %v4756_v9 = vpop.eup %4755  ;;  %v1215_v49 = vmul.bf16 3218784218, %v5746_v42  ;;  %v4194_v11 = vpop.f32.mrb[76].mxu0  ;;  %4769 = vpow.bf16 %v1270_v35  ;;  %v1285_v55 = vadd.bf16 1065369472, %v4754_v45  ;;  %v5823_v35 = vld [vmem:[%s6684_s4 + $0xd8] sm:$0xff] }
 0x1d8   : > { %v1275_v31 = vadd.bf16 1065369472, %v4756_v9  ;;  %v1243_v51 = vmul.bf16 1069105081, %v1216_v18  ;;  %v1125_v52 = vadd.f32 %v4194_v11, %v5602_v62  ;;  %v1116_v54 = vpop.f32.mrb[77].mxu0  ;;  %v4758_v23 = vpop.eup %4757  ;;  %4771 = vrcp.bf16 %v1276_v4  ;;  %v5773_v62 = vld [vmem:[%s6684_s4 + $0xb0] sm:$0xff] }
 0x1d9   : > { %v1240_v60 = vmul.bf16 1069105081, %v1215_v49  ;;  %v1117_v7 = vadd.f32 %v5598_v56, %v1116_v54  ;;  %v4195_v61 = vpop.f32.mrb[78].mxu0  ;;  %v1286_v24 = vadd.bf16 1065369472, %v4758_v23  ;;  %1802 = vrot.lane.b32.xlu0 %v5773_v62, %s5212_s12  ;;  %v5829_v4 = vld [vmem:[%s6684_s4 + $0xf0] sm:$0xff] }
 0x1da   : > { %4773 = vrcp.bf16 %v1275_v31  ;;  %v1128_v63 = vadd.f32 %v4195_v61, %v5604_v1  ;;  %v1119_v0 = vpop.f32.mrb[79].mxu0  ;;  %1804 = vrot.lane.b32.xlu1 %v5779_v27, %s5212_s12 }
 0x1db   : > { %4775 = vpow.bf16 %v1243_v51  ;;  %v1120_v56 = vadd.f32 %v5600_v59, %v1119_v0 }
 0x1dc   : > { %4777 = vpow.bf16 %v1240_v60  ;;  %v5781_v1 = vpack.c.bf16 %v1128_v63, %v1125_v52  ;;  %v5845_v52 = vld [vmem:[%s6684_s4 + $0x100] sm:$0xff]  ;;  %v5861_v63 = vld [vmem:[%s6684_s4 + $0x110] sm:$0xff] }
 0x1dd   : > { %v4760_v38 = vpop.eup %4759  ;;  %4779 = vrcp.bf16 %v1285_v55  ;;  %v5783_v3 = vpack.c.bf16 %v1120_v56, %v1117_v7  ;;  %1806 = vrot.lane.b32.xlu0 %v5793_v6, %s5212_s12 }
 0x1de   : > { %v4762_v28 = vpop.eup %4761  ;;  %v1278_v5 = vadd.bf16 1065369472, %v4760_v38  ;;  %v1218_v59 = vmul.bf16 3218784218, %v5781_v1  ;;  %4781 = vpow.bf16 %v1273_v34  ;;  %1808 = vrot.lane.b32.xlu1 %v5799_v13, %s5212_s12  ;;  %v5877_v38 = vld [vmem:[%s6684_s4 + $0x118] sm:$0xff] }
 0x1df   : > { %v4764_v19 = vpop.eup %4763  ;;  %v1217_v21 = vmul.bf16 3218784218, %v5783_v3  ;;  %4783 = vrcp.bf16 %v1286_v24  ;;  %v1287_v16 = vadd.bf16 1065369472, %v4762_v28 }
 0x1e0   : > { %v1277_v39 = vadd.bf16 1065369472, %v4764_v19  ;;  %v1249_v41 = vmul.bf16 1069105081, %v1218_v59  ;;  %v4766_v15 = vpop.eup %4765  ;;  %4785 = vrcp.bf16 %v1278_v5 }
 0x1e1   : > { %v1246_v17 = vmul.bf16 1069105081, %v1217_v21  ;;  %v4768_v37 = vpop.eup %4767  ;;  %1810 = vrot.lane.b32.xlu0 %v5808_v20, %s5212_s12  ;;  %v1310_v45 = vmul.bf16 %v4766_v15, %v5610_v48  ;;  %v5839_v48 = vld [vmem:[%s6684_s4 + $0xe8] sm:$0xff]  ;;  %v5909_v15 = vld [vmem:[%s6684_s4 + $0x138] sm:$0xff] }
 0x1e2   : > { %4787 = vrcp.bf16 %v1277_v39  ;;  %v4770_v25 = vpop.eup %4769  ;;  %v1288_v50 = vadd.bf16 1065369472, %v4768_v37  ;;  %1814 = vrot.lane.b32.xlu1 %v5813_v26, %s5212_s12  ;;  %v5893_v21 = vld [vmem:[%s6684_s4 + $0x128] sm:$0xff] }
 0x1e3   : > { %4789 = vpow.bf16 %v1249_v41  ;;  %v4772_v40 = vpop.eup %4771 }
 0x1e4   : > { %4791 = vpow.bf16 %v1246_v17  ;;  %v1294_v11 = vmul.bf16 %v4772_v40, %v5688_v14  ;;  %v5925_v40 = vld [vmem:[%s6684_s4 + $0x148] sm:$0xff] }
 0x1e5   : > { %v4774_v32 = vpop.eup %4773  ;;  %4793 = vrcp.bf16 %v1287_v16  ;;  %1812 = vrot.lane.b32.xlu0 %v5823_v35, %s5212_s12 }
 0x1e6   : > { %v4776_v33 = vpop.eup %4775  ;;  %v1292_v44 = vmul.bf16 %v4774_v32, %v5690_v46  ;;  %4795 = vrcp.bf16 %v1288_v50  ;;  %v1289_v46 = vadd.bf16 1065369472, %v4770_v25  ;;  %1818 = vrot.lane.b32.xlu1 %v5829_v4, %s5212_s12  ;;  %v5935_v32 = vld [vmem:[%s6684_s4 + $0x150] sm:$0xff]  ;;  %v5940_v50 = vld [vmem:[%s6684_s4 + $0x158] sm:$0xff] }
 0x1e7   : > { %v4778_v53 = vpop.eup %4777  ;;  %v1280_v9 = vadd.bf16 1065369472, %v4776_v33  ;;  %v4736_v33 = vld [vmem:[#allocation3 + $0x14] ss:$8 sps:$4 sm:$0xff]  }
 0x1e8   : > { %v4780_v18 = vpop.eup %4779  ;;  %v1279_v8 = vadd.bf16 1065369472, %v4778_v53  ;;  %3918 = vmatpush3.bf16.msra.mxu1 %v1292_v44  ;;  %v4739_v44 = vld [vmem:[#allocation3 + $0x24] ss:$8 sps:$4 sm:$0xff]   ;;  %v4741_v53 = vld [vmem:[#allocation3 + $0x20] ss:$8 sps:$4 sm:$0xff]  }
 0x1e9   : > { %3919 = vmatprep.subr.bf16.mxu1 %v1310_v45  ;;  %v4782_v49 = vpop.eup %4781  ;;  %v1312_v51 = vmul.bf16 %v4780_v18, %v5614_v58  ;;  %1816 = vrot.lane.b32.xlu0 %v5839_v48, %s5212_s12  ;;  %v5855_v58 = vld [vmem:[%s6684_s4 + $0xf8] sm:$0xff] }
 0x1ea   : > { %4797 = vrcp.bf16 %v1279_v8  ;;  %v4784_v31 = vpop.eup %4783  ;;  %v1290_v23 = vadd.bf16 1065369472, %v4782_v49  ;;  %1822 = vrot.lane.b32.xlu1 %v5845_v52, %s5212_s12  ;;  %v4742_v45 = vld [vmem:[#allocation3 + $0x34] ss:$8 sps:$4 sm:$0xff]   ;;  %v4744_v18 = vld [vmem:[#allocation3 + $0x30] ss:$8 sps:$4 sm:$0xff]  }
 0x1eb   : > { %v4786_v54 = vpop.eup %4785  ;;  %4799 = vrcp.bf16 %v1280_v9  ;;  %v1314_v61 = vmul.bf16 %v4784_v31, %v5618_v12  ;;  %v5871_v12 = vld [vmem:[%s6684_s4 + $0x108] sm:$0xff]  ;;  %v5956_v8 = vld [vmem:[%s6684_s4 + $0x160] sm:$0xff] }
 0x1ec   : > { %3920 = vmatpush3.bf16.msra.mxu1 %v1294_v11  ;;  %4801 = vrcp.bf16 %v1289_v46  ;;  %v5949_v9 = vld [vmem:[%s6684_s4 + $0x168] sm:$0xff] }
 0x1ed   : > { %v4788_v14 = vpop.eup %4787  ;;  %3921 = vmatprep.subr.bf16.mxu1 %v1312_v51  ;;  %4803 = vrcp.bf16 %v1290_v23  ;;  %1820 = vrot.lane.b32.xlu0 %v5855_v58, %s5212_s12 }
 0x1ee   : > { %v4790_v55 = vpop.eup %4789  ;;  %v1296_v60 = vmul.bf16 %v4788_v14, %v5718_v2  ;;  %v1298_v2 = vmul.bf16 %v4786_v54, %v5716_v10  ;;  %1826 = vrot.lane.b32.xlu1 %v5861_v63, %s5212_s12 }
 0x1ef   : > { %v4792_v7 = vpop.eup %4791  ;;  %v1282_v34 = vadd.bf16 1065369472, %v4790_v55 }
 0x1f0   : > { %v4794_v0 = vpop.eup %4793  ;;  %v1281_v56 = vadd.bf16 1065369472, %v4792_v7  ;;  %3922 = vmatpush3.bf16.msra.mxu1 %v1296_v60  ;;  %v1661_v60 = vld [vmem:[%s350_s14] sm:$0xff] }
 0x1f1   : > { %3923 = vmatprep.subr.bf16.mxu1 %v1314_v61  ;;  %v1316_v24 = vmul.bf16 %v4794_v0, %v5637_v43  ;;  %v4796_v28 = vpop.eup %4795  ;;  %1824 = vrot.lane.b32.xlu0 %v5871_v12, %s5212_s12  ;;  %v5887_v43 = vld [vmem:[%s6684_s4 + $0x120] sm:$0xff] }
 0x1f2   : > { %4805 = vrcp.bf16 %v1281_v56  ;;  %1828 = vrot.lane.b32.xlu1 %v5877_v38, %s5212_s12  ;;  %v1318_v19 = vmul.bf16 %v4796_v28, %v5650_v57  ;;  %v5903_v57 = vld [vmem:[%s6684_s4 + $0x130] sm:$0xff] }
 0x1f3   : > { %4807 = vrcp.bf16 %v1282_v34 }
 0x1f4   : > { %3924 = vmatpush3.bf16.msra.mxu1 %v1298_v2 }
 0x1f5   : > { %v4798_v10 = vpop.eup %4797  ;;  %3925 = vmatprep.subr.bf16.mxu1 %v1316_v24  ;;  %1830 = vrot.lane.b32.xlu0 %v5887_v43, %s5212_s12 }
 0x1f6   : > { %v1300_v5 = vmul.bf16 %v4798_v10, %v5746_v42  ;;  %v4800_v59 = vpop.eup %4799  ;;  %1832 = vrot.lane.b32.xlu1 %v5893_v21, %s5212_s12 }
 0x1f7   : > { %v4802_v39 = vpop.eup %4801  ;;  %v1302_v42 = vmul.bf16 %v4800_v59, %v5744_v36 }
 0x1f8   : > { %3926 = vmatpush3.bf16.msra.mxu1 %v1300_v5  ;;  %v1320_v41 = vmul.bf16 %v4802_v39, %v5658_v30  ;;  %v4804_v16 = vpop.eup %4803  ;;  %v5919_v30 = vld [vmem:[%s6684_s4 + $0x140] sm:$0xff] }
 0x1f9   : > { %3927 = vmatprep.subr.bf16.mxu1 %v1318_v19  ;;  %1834 = vrot.lane.b32.xlu0 %v5903_v57, %s5212_s12  ;;  %v1322_v25 = vmul.bf16 %v4804_v16, %v5670_v22  ;;  %v4733_v22 = vld [vmem:[#allocation3] ss:$8 sps:$4 sm:$0xff]  }
 0x1fa   : > { %1836 = vrot.lane.b32.xlu1 %v5909_v15, %s5212_s12 }
 0x1fc   : > { %3928 = vmatpush3.bf16.msra.mxu1 %v1302_v42 }
 0x1fd   : > { %v4806_v17 = vpop.eup %4805  ;;  %3929 = vmatprep.subr.bf16.mxu1 %v1320_v41  ;;  %1838 = vrot.lane.b32.xlu0 %v5919_v30, %s5212_s12 }
 0x1fe   : > { %v1304_v36 = vmul.bf16 %v4806_v17, %v5783_v3  ;;  %v4808_v37 = vpop.eup %4807  ;;  %1840 = vrot.lane.b32.xlu1 %v5925_v40, %s5212_s12 }
 0x1ff   : > { %v1306_v3 = vmul.bf16 %v4808_v37, %v5781_v1  ;;  %v4738_v1 = vld [vmem:[#allocation3 + $0x10] ss:$8 sps:$4 sm:$0xff]  }
 0x200   : > { %3930 = vmatpush3.bf16.msra.mxu1 %v1304_v36 }
 0x201   : > { %3931 = vmatprep.subr.bf16.mxu1 %v1322_v25  ;;  %1842 = vrot.lane.b32.xlu0 %v5935_v32, %s5212_s12 }
 0x202   : > { %1844 = vrot.lane.b32.xlu1 %v5940_v50, %s5212_s12 }
 0x204   : > { %3932 = vmatpush3.bf16.msra.mxu1 %v1306_v3 }
 0x205   : > { %1846 = vrot.lane.b32.xlu0 %v5956_v8, %s5212_s12  ;;  %4212 = vmatprep.subr.mxu1 %v1661_v60 }
 0x206   : > { %1848 = vrot.lane.b32.xlu1 %v5949_v9, %s5212_s12 }
 0x207   : > { %1452 = vmatmul.mubr.bf16.vlgmr.msra.gmra.mrb[16].mxu1 %v4733_v22 }
 0x208   : > { %1459 = vmatprep.mubr.bf16.mxu1 %v4736_v33  ;;  %v5962_v49 = vpop.permute.xlu1 %1351  ;;  %4213 = vmatpush3.msra.mxu1 %v1661_v60 }
 0x20c   : > { %v5966_v31 = vpop.permute.xlu1 %1356 }
 0x20f   : > { %1460 = vmatmul.mubr.bf16.gmra.mrb[20].mxu1 %v4738_v1 }
 0x210   : > { %1467 = vmatprep.mubr.bf16.mxu1 %v4739_v44  ;;  %v5213_v44 = vmov 0.0  }
 0x211   : > { %v5970_v54 = vpop.permute.xlu1 %1366  ;;  %368 = vst.msk [vmem:[#allocation2] sm:$0xff] %vm367_vm2, %v5213_v44  ;;  %369 = vst.msk [vmem:[#allocation2 + $0x8] sm:$0xff] %vm367_vm2, %v5213_v44 }
 0x212   : > { %370 = vst.msk [vmem:[#allocation2 + $0x10] sm:$0xff] %vm367_vm2, %v5213_v44  ;;  %371 = vst.msk [vmem:[#allocation2 + $0x18] sm:$0xff] %vm367_vm2, %v5213_v44 }
 0x213   : > { %372 = vst.msk [vmem:[#allocation2 + $0x20] sm:$0xff] %vm367_vm2, %v5213_v44  ;;  %373 = vst.msk [vmem:[#allocation2 + $0x28] sm:$0xff] %vm367_vm2, %v5213_v44 }
 0x214   : > { %374 = vst.msk [vmem:[#allocation2 + $0x30] sm:$0xff] %vm367_vm2, %v5213_v44  ;;  %375 = vst.msk [vmem:[#allocation2 + $0x38] sm:$0xff] %vm367_vm2, %v5213_v44 }
 0x215   : > { %v5960_v46 = vpop.permute.xlu0 %1341 }
 0x217   : > { %1468 = vmatmul.mubr.bf16.gmra.mrb[24].mxu1 %v4741_v53 }
 0x218   : > { %1475 = vmatprep.mubr.bf16.mxu1 %v4742_v45 }
 0x219   : > { %v5964_v11 = vpop.permute.xlu0 %1346 }
 0x21d   : > { %v5968_v51 = vpop.permute.xlu0 %1361 }
 0x21f   : > { %1476 = vmatmul.mubr.bf16.gmra.mrb[28].mxu1 %v4744_v18 }
 0x221   : > { %v5972_v14 = vpop.permute.xlu0 %1371 }
 0x225   : > { %v1759_v55 = vpop.permute.xlu0 %1758 }
 0x226   : > { %4214 = vmatprep.mubr.msk.f32.mxu1 %vm1854_vm1, %v1759_v55 }
 0x227   : > { %v5974_v23 = vpop.permute.xlu1 %1376 }
 0x229   : > { %v1763_v61 = vpop.permute.xlu0 %1762 }
 0x22b   : > { %v1761_v7 = vpop.permute.xlu1 %1760 }
 0x22c   : > { %4215 = vmatmul.mubr.msk.f32.vlgmr.msra.gmra.mrb[32].mxu1 %vm1854_vm1, %v1761_v7 }
 0x22d   : > { %4217 = vmatprep.mubr.msk.f32.mxu1 %vm1854_vm1, %v1763_v61  ;;  %v1767_v34 = vpop.permute.xlu0 %1766 }
 0x22f   : > { %v1765_v0 = vpop.permute.xlu1 %1764 }
 0x230   : > { %4218 = vmatmul.mubr.msk.f32.gmra.mrb[34].mxu1 %vm1854_vm1, %v1765_v0 }
 0x231   : > { %4220 = vmatprep.mubr.msk.f32.mxu1 %vm1854_vm1, %v1767_v34  ;;  %v1771_v2 = vpop.permute.xlu0 %1770 }
 0x233   : > { %v1769_v56 = vpop.permute.xlu1 %1768 }
 0x234   : > { %4221 = vmatmul.mubr.msk.f32.gmra.mrb[36].mxu1 %vm1854_vm1, %v1769_v56 }
 0x235   : > { %4223 = vmatprep.mubr.msk.f32.mxu1 %vm1854_vm1, %v1771_v2  ;;  %v1775_v28 = vpop.permute.xlu0 %1774 }
 0x237   : > { %v1773_v24 = vpop.permute.xlu1 %1772 }
 0x238   : > { %4224 = vmatmul.mubr.msk.f32.gmra.mrb[38].mxu1 %vm1854_vm1, %v1773_v24 }
 0x239   : > { %4226 = vmatprep.mubr.msk.f32.mxu1 %vm1854_vm1, %v1775_v28  ;;  %v1779_v5 = vpop.permute.xlu0 %1778 }
 0x23b   : > { %v1777_v10 = vpop.permute.xlu1 %1776 }
 0x23c   : > { %4227 = vmatmul.mubr.msk.f32.gmra.mrb[40].mxu1 %vm1854_vm1, %v1777_v10 }
 0x23d   : > { %4229 = vmatprep.mubr.msk.f32.mxu1 %vm1854_vm1, %v1779_v5  ;;  %v1783_v19 = vpop.permute.xlu0 %1782 }
 0x23f   : > { %v1781_v59 = vpop.permute.xlu1 %1780 }
 0x240   : > { %4230 = vmatmul.mubr.msk.f32.gmra.mrb[42].mxu1 %vm1854_vm1, %v1781_v59 }
 0x241   : > { %4232 = vmatprep.mubr.msk.f32.mxu1 %vm1854_vm1, %v1783_v19  ;;  %v1787_v42 = vpop.permute.xlu0 %1786 }
 0x243   : > { %v1785_v39 = vpop.permute.xlu1 %1784 }
 0x244   : > { %4233 = vmatmul.mubr.msk.f32.gmra.mrb[44].mxu1 %vm1854_vm1, %v1785_v39 }
 0x245   : > { %4235 = vmatprep.mubr.msk.f32.mxu1 %vm1854_vm1, %v1787_v42  ;;  %v1791_v16 = vpop.permute.xlu0 %1790 }
 0x247   : > { %v1789_v41 = vpop.permute.xlu1 %1788 }
 0x248   : > { %4236 = vmatmul.mubr.msk.f32.gmra.mrb[46].mxu1 %vm1854_vm1, %v1789_v41 }
 0x249   : > { %4238 = vmatprep.mubr.msk.f32.mxu1 %vm1854_vm1, %v1791_v16  ;;  %v1795_v36 = vpop.permute.xlu0 %1794 }
 0x24b   : > { %v1793_v17 = vpop.permute.xlu1 %1792 }
 0x24c   : > { %4239 = vmatmul.mubr.msk.f32.gmra.mrb[48].mxu1 %vm1854_vm1, %v1793_v17 }
 0x24d   : > { %4241 = vmatprep.mubr.msk.f32.mxu1 %vm1854_vm1, %v1795_v36  ;;  %v1799_v25 = vpop.permute.xlu0 %1798 }
 0x24f   : > { %v1797_v37 = vpop.permute.xlu1 %1796 }
 0x250   : > { %4242 = vmatmul.mubr.msk.f32.gmra.mrb[50].mxu1 %vm1854_vm1, %v1797_v37 }
 0x251   : > { %4244 = vmatprep.mubr.msk.f32.mxu1 %vm1854_vm1, %v1799_v25  ;;  %v1803_v22 = vpop.permute.xlu0 %1802 }
 0x253   : > { %v1801_v3 = vpop.permute.xlu1 %1800 }
 0x254   : > { %4245 = vmatmul.mubr.msk.f32.gmra.mrb[52].mxu1 %vm1854_vm1, %v1801_v3 }
 0x255   : > { %4247 = vmatprep.mubr.msk.f32.mxu1 %vm1854_vm1, %v1803_v22  ;;  %v1807_v1 = vpop.permute.xlu0 %1806 }
 0x257   : > { %v1805_v33 = vpop.permute.xlu1 %1804 }
 0x258   : > { %4248 = vmatmul.mubr.msk.f32.gmra.mrb[54].mxu1 %vm1854_vm1, %v1805_v33 }
 0x259   : > { %4250 = vmatprep.mubr.msk.f32.mxu1 %vm1854_vm1, %v1807_v1  ;;  %v1811_v45 = vpop.permute.xlu0 %1810 }
 0x25b   : > { %v1809_v53 = vpop.permute.xlu1 %1808 }
 0x25c   : > { %4251 = vmatmul.mubr.msk.f32.gmra.mrb[56].mxu1 %vm1854_vm1, %v1809_v53 }
 0x25d   : > { %4253 = vmatprep.mubr.msk.f32.mxu1 %vm1854_vm1, %v1811_v45  ;;  %v1813_v18 = vpop.permute.xlu0 %1812 }
 0x25f   : > { %v1815_v55 = vpop.permute.xlu1 %1814 }
 0x260   : > { %4254 = vmatmul.mubr.msk.f32.gmra.mrb[58].mxu1 %vm1854_vm1, %v1813_v18 }
 0x261   : > { %4256 = vmatprep.mubr.msk.f32.mxu1 %vm1854_vm1, %v1815_v55  ;;  %v1817_v60 = vpop.permute.xlu0 %1816 }
 0x263   : > { %v1819_v7 = vpop.permute.xlu1 %1818 }
 0x264   : > { %4257 = vmatmul.mubr.msk.f32.gmra.mrb[60].mxu1 %vm1854_vm1, %v1817_v60 }
 0x265   : > { %4259 = vmatprep.mubr.msk.f32.mxu1 %vm1854_vm1, %v1819_v7  ;;  %v1821_v61 = vpop.permute.xlu0 %1820 }
 0x267   : > { %v1823_v0 = vpop.permute.xlu1 %1822 }
 0x268   : > { %4260 = vmatmul.mubr.msk.f32.gmra.mrb[62].mxu1 %vm1854_vm1, %v1821_v61 }
 0x269   : > { %4262 = vmatprep.mubr.msk.f32.mxu1 %vm1854_vm1, %v1823_v0  ;;  %v1825_v34 = vpop.permute.xlu0 %1824 }
 0x26b   : > { %v1827_v56 = vpop.permute.xlu1 %1826 }
 0x26c   : > { %4263 = vmatmul.mubr.msk.f32.gmra.mrb[64].mxu1 %vm1854_vm1, %v1825_v34 }
 0x26d   : > { %4265 = vmatprep.mubr.msk.f32.mxu1 %vm1854_vm1, %v1827_v56  ;;  %v1831_v24 = vpop.permute.xlu0 %1830 }
 0x26f   : > { %v1829_v2 = vpop.permute.xlu1 %1828 }
 0x270   : > { %4266 = vmatmul.mubr.msk.f32.gmra.mrb[66].mxu1 %vm1854_vm1, %v1829_v2 }
 0x271   : > { %4268 = vmatprep.mubr.msk.f32.mxu1 %vm1854_vm1, %v1831_v24  ;;  %v1835_v10 = vpop.permute.xlu0 %1834 }
 0x273   : > { %v1833_v28 = vpop.permute.xlu1 %1832 }
 0x274   : > { %4269 = vmatmul.mubr.msk.f32.gmra.mrb[68].mxu1 %vm1854_vm1, %v1833_v28 }
 0x275   : > { %4271 = vmatprep.mubr.msk.f32.mxu1 %vm1854_vm1, %v1835_v10  ;;  %v1839_v59 = vpop.permute.xlu0 %1838 }
 0x277   : > { %v1837_v5 = vpop.permute.xlu1 %1836 }
 0x278   : > { %4272 = vmatmul.mubr.msk.f32.gmra.mrb[70].mxu1 %vm1854_vm1, %v1837_v5 }
 0x279   : > { %4274 = vmatprep.mubr.msk.f32.mxu1 %vm1854_vm1, %v1839_v59  ;;  %v1843_v39 = vpop.permute.xlu0 %1842 }
 0x27b   : > { %v1841_v19 = vpop.permute.xlu1 %1840 }
 0x27c   : > { %4275 = vmatmul.mubr.msk.f32.gmra.mrb[72].mxu1 %vm1854_vm1, %v1841_v19 }
 0x27d   : > { %4277 = vmatprep.mubr.msk.f32.mxu1 %vm1854_vm1, %v1843_v39  ;;  %v1847_v41 = vpop.permute.xlu0 %1846 }
 0x27f   : > { %v1845_v42 = vpop.permute.xlu1 %1844 }
 0x280   : > { %4278 = vmatmul.mubr.msk.f32.gmra.mrb[74].mxu1 %vm1854_vm1, %v1845_v42 }
 0x281   : > { %4280 = vmatprep.mubr.msk.f32.mxu1 %vm1854_vm1, %v1847_v41 }
 0x283   : > { %v1849_v36 = vpop.permute.xlu1 %1848 }
 0x284   : > { %4281 = vmatmul.mubr.msk.f32.gmra.mrb[76].mxu1 %vm1854_vm1, %v1849_v36 }
 0x2da   : > { %v3933_v16 = vpop.f32.mrb[16].mxu1 }
 0x2db   : > { %v3934_v17 = vpop.f32.mrb[17].mxu1 }
 0x2dc   : > { %v3935_v37 = vadd.f32 %v3934_v17, %v3933_v16  ;;  %v3936_v25 = vpop.f32.mrb[18].mxu1 }
 0x2dd   : > { %v3937_v3 = vpop.f32.mrb[19].mxu1 }
 0x2de   : > { %v6045_v22 = vadd.f32 %v3935_v37, %v5960_v46  ;;  %v3938_v33 = vadd.f32 %v3937_v3, %v3936_v25  ;;  %v1580_v25 = vlaneseq }
 0x2e0   : > { %v1484_v1 = vmul.f32 -1.702, %v6045_v22  ;;  %v6049_v53 = vadd.f32 %v3938_v33, %v5964_v11 }
 0x2e2   : > { %v1492_v45 = vmul.f32 1.442695, %v1484_v1  ;;  %v1485_v18 = vmul.f32 -1.702, %v6049_v53  ;;  %v3939_v55 = vpop.f32.mrb[20].mxu1 }
 0x2e3   : > { %v3940_v60 = vpop.f32.mrb[21].mxu1 }
 0x2e4   : > { %4809 = vpow2.f32 %v1492_v45  ;;  %v1494_v7 = vmul.f32 1.442695, %v1485_v18  ;;  %v3941_v61 = vadd.f32 %v3940_v60, %v3939_v55  ;;  %v3942_v0 = vpop.f32.mrb[22].mxu1 }
 0x2e5   : > { %v3943_v34 = vpop.f32.mrb[23].mxu1 }
 0x2e6   : > { %4811 = vpow2.f32 %v1494_v7  ;;  %v6053_v46 = vadd.f32 %v3941_v61, %v5962_v49  ;;  %v3944_v56 = vadd.f32 %v3943_v34, %v3942_v0  ;;  %v1581_v7 = vand.u32 127, %v1580_v25 }
 0x2e8   : > { %v1486_v2 = vmul.f32 -1.702, %v6053_v46  ;;  %v6057_v11 = vadd.f32 %v3944_v56, %v5966_v31  ;;  %vm1585_vm3 = vcmp.lt.s32.totalorder %v1581_v7, 50 }
 0x2ea   : > { %v1496_v24 = vmul.f32 1.442695, %v1486_v2  ;;  %v1487_v28 = vmul.f32 -1.702, %v6057_v11  ;;  %v3945_v10 = vpop.f32.mrb[24].mxu1 }
 0x2eb   : > { %v3946_v5 = vpop.f32.mrb[25].mxu1 }
 0x2ec   : > { %4813 = vpow2.f32 %v1496_v24  ;;  %v1498_v59 = vmul.f32 1.442695, %v1487_v28  ;;  %v3947_v19 = vadd.f32 %v3946_v5, %v3945_v10  ;;  %v3948_v39 = vpop.f32.mrb[26].mxu1 }
 0x2ed   : > { %v3949_v42 = vpop.f32.mrb[27].mxu1 }
 0x2ee   : > { %v4810_v41 = vpop.eup %4809  ;;  %4815 = vpow2.f32 %v1498_v59  ;;  %v6061_v49 = vadd.f32 %v3947_v19, %v5968_v51  ;;  %v3950_v16 = vadd.f32 %v3949_v42, %v3948_v39  ;;  %v3687_v39 = vsel %vm1585_vm3, 1.0, %v5213_v44 }
 0x2ef   : > { %v1508_v17 = vadd.f32 1.0, %v4810_v41 }
 0x2f0   : > { %v4812_v36 = vpop.eup %4811  ;;  %v1488_v31 = vmul.f32 -1.702, %v6061_v49  ;;  %v6065_v37 = vadd.f32 %v3950_v16, %v5970_v54 }
 0x2f1   : > { %4817 = vrcp.f32 %v1508_v17  ;;  %v1509_v3 = vadd.f32 1.0, %v4812_v36 }
 0x2f2   : > { %v1500_v33 = vmul.f32 1.442695, %v1488_v31  ;;  %v1489_v1 = vmul.f32 -1.702, %v6065_v37  ;;  %v3951_v45 = vpop.f32.mrb[28].mxu1 }
 0x2f3   : > { %4819 = vrcp.f32 %v1509_v3  ;;  %v3952_v18 = vpop.f32.mrb[29].mxu1 }
 0x2f4   : > { %4821 = vpow2.f32 %v1500_v33  ;;  %v1502_v51 = vmul.f32 1.442695, %v1489_v1  ;;  %v3953_v55 = vadd.f32 %v3952_v18, %v3951_v45  ;;  %v3954_v60 = vpop.f32.mrb[30].mxu1 }
 0x2f5   : > { %v3955_v61 = vpop.f32.mrb[31].mxu1 }
 0x2f6   : > { %v4814_v0 = vpop.eup %4813  ;;  %4823 = vpow2.f32 %v1502_v51  ;;  %v1478_v54 = vadd.f32 %v3953_v55, %v5972_v14  ;;  %v3956_v34 = vadd.f32 %v3955_v61, %v3954_v60 }
 0x2f7   : > { %v1510_v56 = vadd.f32 1.0, %v4814_v0 }
 0x2f8   : > { %v4816_v2 = vpop.eup %4815  ;;  %v1490_v24 = vmul.f32 -1.702, %v1478_v54  ;;  %v1481_v28 = vadd.f32 %v3956_v34, %v5974_v23 }
 0x2f9   : > { %4825 = vrcp.f32 %v1510_v56  ;;  %v1511_v10 = vadd.f32 1.0, %v4816_v2 }
 0x2fa   : > { %v1504_v5 = vmul.f32 1.442695, %v1490_v24  ;;  %v1491_v59 = vmul.f32 -1.702, %v1481_v28 }
 0x2fb   : > { %v4818_v19 = vpop.eup %4817  ;;  %4827 = vrcp.f32 %v1511_v10 }
 0x2fc   : > { %4829 = vpow2.f32 %v1504_v5  ;;  %v1506_v42 = vmul.f32 1.442695, %v1491_v59  ;;  %v1524_v41 = vmul.f32 %v4818_v19, %v6045_v22 }
 0x2fd   : > { %v4820_v14 = vpop.eup %4819 }
 0x2fe   : > { %v4822_v16 = vpop.eup %4821  ;;  %4831 = vpow2.f32 %v1506_v42  ;;  %v1596_v17 = vmul.f32 %v3687_v39, %v1524_v41  ;;  %v1525_v36 = vmul.f32 %v4820_v14, %v6049_v53 }
 0x2ff   : > { %v1512_v23 = vadd.f32 1.0, %v4822_v16  ;;  %v1590_v16 = vld [vmem:[#allocation2 + $0x10] sm:$0xff] }
 0x300   : > { %v4824_v31 = vpop.eup %4823  ;;  %1604 = vadd.xlane.f32.xlu1 %v1596_v17  ;;  %v1597_v25 = vmul.f32 %v3687_v39, %v1525_v36  ;;  %v1591_v36 = vld [vmem:[#allocation2 + $0x18] sm:$0xff] }
 0x301   : > { %4833 = vrcp.f32 %v1512_v23  ;;  %v1513_v3 = vadd.f32 1.0, %v4824_v31 }
 0x302   : > { %1606 = vadd.xlane.f32.xlu0 %v1597_v25 }
 0x303   : > { %v4826_v33 = vpop.eup %4825  ;;  %4835 = vrcp.f32 %v1513_v3 }
 0x304   : > { %v1526_v1 = vmul.f32 %v4826_v33, %v6053_v46 }
 0x305   : > { %v4828_v45 = vpop.eup %4827 }
 0x306   : > { %v4830_v18 = vpop.eup %4829  ;;  %v1527_v22 = vmul.f32 %v4828_v45, %v6057_v11  ;;  %v1598_v51 = vmul.f32 %v3687_v39, %v1526_v1 }
 0x307   : > { %v1514_v55 = vadd.f32 1.0, %v4830_v18  ;;  %v1592_v18 = vld [vmem:[#allocation2 + $0x20] sm:$0xff] }
 0x308   : > { %v4832_v60 = vpop.eup %4831  ;;  %1608 = vadd.xlane.f32.xlu1 %v1598_v51  ;;  %v1599_v53 = vmul.f32 %v3687_v39, %v1527_v22 }
 0x309   : > { %4837 = vrcp.f32 %v1514_v55  ;;  %v1515_v7 = vadd.f32 1.0, %v4832_v60  ;;  %v1593_v55 = vld [vmem:[#allocation2 + $0x28] sm:$0xff] }
 0x30a   : > { %1610 = vadd.xlane.f32.xlu0 %v1599_v53 }
 0x30b   : > { %v4834_v61 = vpop.eup %4833  ;;  %4839 = vrcp.f32 %v1515_v7 }
 0x30c   : > { %v1528_v0 = vmul.f32 %v4834_v61, %v6061_v49  ;;  %v6080_v49 = vld [vmem:[%s6684_s4 + $0x178] sm:$0xff] }
 0x30d   : > { %v4836_v34 = vpop.eup %4835 }
 0x30e   : > { %v1529_v56 = vmul.f32 %v4836_v34, %v6065_v37  ;;  %v1600_v46 = vmul.f32 %v3687_v39, %v1528_v0  ;;  %v6087_v37 = vld [vmem:[%s6684_s4 + $0x170] sm:$0xff] }
 0x310   : > { %1612 = vadd.xlane.f32.xlu1 %v1600_v46  ;;  %v1601_v2 = vmul.f32 %v3687_v39, %v1529_v56  ;;  %v1594_v46 = vld [vmem:[#allocation2 + $0x30] sm:$0xff] }
 0x312   : > { %1614 = vadd.xlane.f32.xlu0 %v1601_v2 }
 0x313   : > { %v4838_v11 = vpop.eup %4837 }
 0x314   : > { %v1530_v24 = vmul.f32 %v4838_v11, %v1478_v54  ;;  %v1588_v54 = vld [vmem:[#allocation2] sm:$0xff] }
 0x315   : > { %v4840_v10 = vpop.eup %4839 }
 0x316   : > { %v1602_v5 = vmul.f32 %v3687_v39, %v1530_v24  ;;  %v1531_v59 = vmul.f32 %v4840_v10, %v1481_v28  ;;  %v1595_v24 = vld [vmem:[#allocation2 + $0x38] sm:$0xff] }
 0x318   : > { %1616 = vadd.xlane.f32.xlu1 %v1602_v5  ;;  %v1603_v19 = vmul.f32 %v3687_v39, %v1531_v59  ;;  %v1589_v39 = vld [vmem:[#allocation2 + $0x8] sm:$0xff] }
 0x31a   : > { %1618 = vadd.xlane.f32.xlu0 %v1603_v19 }
 0x329   : > { %1852 = vrot.lane.b32.xlu1 %v6080_v49, %s5212_s12 }
 0x330   : > { %1850 = vrot.lane.b32.xlu0 %v6087_v37, %s5212_s12  ;;  %s6097_s12 = scalar_lea.vmem %s6686_s6, %s3786_s18 }
 0x38d   : > { %v1605_v28 = vpop.xlane.xlu1 %1604 }
 0x38e   : > { %v1620_v42 = vadd.f32 %v1605_v28, %v1588_v54 }
 0x38f   : > { %v1607_v41 = vpop.xlane.xlu0 %1606 }
 0x390   : > { %1629 = vst.msk [vmem:[#allocation2] sm:$0xff] %vm367_vm2, %v1620_v42  ;;  %v1621_v14 = vadd.f32 %v1607_v41, %v1589_v39 }
 0x392   : > { %1630 = vst.msk [vmem:[#allocation2 + $0x8] sm:$0xff] %vm367_vm2, %v1621_v14 }
 0x395   : > { %v1609_v17 = vpop.xlane.xlu1 %1608 }
 0x396   : > { %v1622_v23 = vadd.f32 %v1609_v17, %v1590_v16  ;;  %v5097_v16 = vld [vmem:[%s6684_s4] sm:$0xff] }
 0x397   : > { %v1611_v31 = vpop.xlane.xlu0 %1610  ;;  %v1637_v25 = vld [vmem:[#allocation2] sm:$0xff] }
 0x398   : > { %1631 = vst.msk [vmem:[#allocation2 + $0x10] sm:$0xff] %vm367_vm2, %v1622_v23  ;;  %v1623_v3 = vadd.f32 %v1611_v31, %v1591_v36  ;;  %v1645_v33 = vmul.f32 0.02, %v1637_v25 }
 0x399   : > { %v1638_v1 = vld [vmem:[#allocation2 + $0x8] sm:$0xff] }
 0x39a   : > { %1632 = vst.msk [vmem:[#allocation2 + $0x18] sm:$0xff] %vm367_vm2, %v1623_v3  ;;  %v1646_v45 = vmul.f32 0.02, %v1638_v1  ;;  %1653 = vst.msk [vmem:[%s6097_s12] sm:$0xff] %vm367_vm2, %v1645_v33  ;;  %v5098_v3 = vld [vmem:[%s6684_s4 + $0x8] sm:$0xff]  ;;  %v5100_v1 = vld [vmem:[%s6684_s4 + $0x18] sm:$0xff] }
 0x39c   : > { %1654 = vst.msk [vmem:[%s6097_s12 + $0x8] sm:$0xff] %vm367_vm2, %v1646_v45  ;;  %v4444_v22 = vpack.c.bf16 %v1646_v45, %v1645_v33  ;;  %v5099_v33 = vld [vmem:[%s6684_s4 + $0x10] sm:$0xff]  ;;  %v5101_v45 = vld [vmem:[%s6684_s4 + $0x20] sm:$0xff] }
 0x39d   : > { %v1613_v51 = vpop.xlane.xlu1 %1612 }
 0x39e   : > { %v1624_v60 = vadd.f32 %v1613_v51, %v1592_v18  ;;  %4445 = vmatprep.subr.bf16.mxu1 %v4444_v22  ;;  %v5102_v18 = vld [vmem:[%s6684_s4 + $0x28] sm:$0xff]  ;;  %v5104_v51 = vld [vmem:[%s6684_s4 + $0x38] sm:$0xff] }
 0x39f   : > { %v1615_v53 = vpop.xlane.xlu0 %1614  ;;  %4447 = vmatpush3.bf16.msra.mxu1 %v4444_v22  ;;  %v1639_v7 = vld [vmem:[#allocation2 + $0x10] sm:$0xff] }
 0x3a0   : > { %1633 = vst.msk [vmem:[#allocation2 + $0x20] sm:$0xff] %vm367_vm2, %v1624_v60  ;;  %v1625_v61 = vadd.f32 %v1615_v53, %v1593_v55  ;;  %v1647_v0 = vmul.f32 0.02, %v1639_v7  ;;  %v5103_v22 = vld [vmem:[%s6684_s4 + $0x30] sm:$0xff]  ;;  %v5105_v55 = vld [vmem:[%s6684_s4 + $0x40] sm:$0xff]  ;;  %v5106_v60 = vld [vmem:[%s6684_s4 + $0x48] sm:$0xff] }
 0x3a1   : > { %v1640_v34 = vld [vmem:[#allocation2 + $0x18] sm:$0xff]  ;;  %v5107_v53 = vld [vmem:[%s6684_s4 + $0x50] sm:$0xff] }
 0x3a2   : > { %1634 = vst.msk [vmem:[#allocation2 + $0x28] sm:$0xff] %vm367_vm2, %v1625_v61  ;;  %v1648_v56 = vmul.f32 0.02, %v1640_v34  ;;  %1655 = vst.msk [vmem:[%s6097_s12 + $0x10] sm:$0xff] %vm367_vm2, %v1647_v0  ;;  %v5108_v7 = vld [vmem:[%s6684_s4 + $0x58] sm:$0xff]  ;;  %v5109_v61 = vld [vmem:[%s6684_s4 + $0x60] sm:$0xff] }
 0x3a3   : > { %v5111_v34 = vld [vmem:[%s6684_s4 + $0x70] sm:$0xff] }
 0x3a4   : > { %1656 = vst.msk [vmem:[%s6097_s12 + $0x18] sm:$0xff] %vm367_vm2, %v1648_v56  ;;  %v4448_v2 = vpack.c.bf16 %v1648_v56, %v1647_v0  ;;  %v5110_v0 = vld [vmem:[%s6684_s4 + $0x68] sm:$0xff]  ;;  %v5112_v56 = vld [vmem:[%s6684_s4 + $0x78] sm:$0xff] }
 0x3a5   : > { %v1617_v11 = vpop.xlane.xlu1 %1616 }
 0x3a6   : > { %v1626_v10 = vadd.f32 %v1617_v11, %v1594_v46  ;;  %4449 = vmatprep.subr.bf16.mxu1 %v4448_v2  ;;  %v5113_v46 = vld [vmem:[%s6684_s4 + $0x80] sm:$0xff]  ;;  %v5115_v11 = vld [vmem:[%s6684_s4 + $0x90] sm:$0xff] }
 0x3a7   : > { %v1619_v5 = vpop.xlane.xlu0 %1618  ;;  %4451 = vmatpush3.bf16.msra.mxu1 %v4448_v2  ;;  %v1641_v59 = vld [vmem:[#allocation2 + $0x20] sm:$0xff]  ;;  %v5114_v2 = vld [vmem:[%s6684_s4 + $0x88] sm:$0xff] }
 0x3a8   : > { %1635 = vst.msk [vmem:[#allocation2 + $0x30] sm:$0xff] %vm367_vm2, %v1626_v10  ;;  %v1627_v19 = vadd.f32 %v1619_v5, %v1595_v24  ;;  %v1649_v54 = vmul.f32 0.02, %v1641_v59  ;;  %v5116_v24 = vld [vmem:[%s6684_s4 + $0x98] sm:$0xff] }
 0x3a9   : > { %v1642_v28 = vld [vmem:[#allocation2 + $0x28] sm:$0xff]  ;;  %v1853_v42 = vpop.permute.xlu1 %1852 }
 0x3aa   : > { %1636 = vst.msk [vmem:[#allocation2 + $0x38] sm:$0xff] %vm367_vm2, %v1627_v19  ;;  %v1650_v39 = vmul.f32 0.02, %v1642_v28  ;;  %1657 = vst.msk [vmem:[%s6097_s12 + $0x20] sm:$0xff] %vm367_vm2, %v1649_v54 }
 0x3ab   : > { %v1851_v41 = vpop.permute.xlu0 %1850 }
 0x3ac   : > { %1658 = vst.msk [vmem:[%s6097_s12 + $0x28] sm:$0xff] %vm367_vm2, %v1650_v39  ;;  %v4452_v14 = vpack.c.bf16 %v1650_v39, %v1649_v54  ;;  %4283 = vmatprep.mubr.msk.f32.mxu1 %vm1854_vm1, %v1851_v41 }
 0x3ad   : > { %4284 = vmatmul.mubr.msk.f32.gmra.mrb[78].mxu1 %vm1854_vm1, %v1853_v42 }
 0x3ae   : > { %4453 = vmatprep.subr.bf16.mxu1 %v4452_v14  ;;  %4302 = vmatprep.mubr.msk.f32.mxu1 %vm2256_vm4, %v5097_v16 }
 0x3af   : > { %4455 = vmatpush3.bf16.msra.mxu1 %v4452_v14  ;;  %v1643_v17 = vld [vmem:[#allocation2 + $0x30] sm:$0xff] }
 0x3b0   : > { %v1651_v36 = vmul.f32 0.02, %v1643_v17 }
 0x3b1   : > { %v1644_v23 = vld [vmem:[#allocation2 + $0x38] sm:$0xff] }
 0x3b2   : > { %v1652_v31 = vmul.f32 0.02, %v1644_v23  ;;  %1659 = vst.msk [vmem:[%s6097_s12 + $0x30] sm:$0xff] %vm367_vm2, %v1651_v36 }
 0x3b4   : > { %1660 = vst.msk [vmem:[%s6097_s12 + $0x38] sm:$0xff] %vm367_vm2, %v1652_v31  ;;  %v4456_v25 = vpack.c.bf16 %v1652_v31, %v1651_v36 }
 0x3b6   : > { %4457 = vmatprep.subr.bf16.mxu1 %v4456_v25 }
 0x3b7   : > { %4459 = vmatpush3.bf16.msra.mxu1 %v4456_v25 }
 0x3ba   : > { %4303 = vmatmul.mubr.msk.f32.vlgmr.msra.gmra.mrb[32].mxu1 %vm2256_vm4, %v5098_v3 }
 0x3bb   : > { %4305 = vmatprep.mubr.msk.f32.mxu1 %vm2256_vm4, %v5099_v33 }
 0x3be   : > { %4306 = vmatmul.mubr.msk.f32.gmra.mrb[34].mxu1 %vm2256_vm4, %v5100_v1 }
 0x3bf   : > { %4308 = vmatprep.mubr.msk.f32.mxu1 %vm2256_vm4, %v5101_v45 }
 0x3c2   : > { %4309 = vmatmul.mubr.msk.f32.gmra.mrb[36].mxu1 %vm2256_vm4, %v5102_v18 }
 0x3c3   : > { %4311 = vmatprep.mubr.msk.f32.mxu1 %vm2256_vm4, %v5103_v22 }
 0x3c6   : > { %4312 = vmatmul.mubr.msk.f32.gmra.mrb[38].mxu1 %vm2256_vm4, %v5104_v51 }
 0x3c7   : > { %4314 = vmatprep.mubr.msk.f32.mxu1 %vm2256_vm4, %v5105_v55 }
 0x3ca   : > { %4315 = vmatmul.mubr.msk.f32.gmra.mrb[40].mxu1 %vm2256_vm4, %v5106_v60 }
 0x3cb   : > { %4317 = vmatprep.mubr.msk.f32.mxu1 %vm2256_vm4, %v5107_v53 }
 0x3ce   : > { %4318 = vmatmul.mubr.msk.f32.gmra.mrb[42].mxu1 %vm2256_vm4, %v5108_v7 }
 0x3cf   : > { %4320 = vmatprep.mubr.msk.f32.mxu1 %vm2256_vm4, %v5109_v61 }
 0x3d2   : > { %4321 = vmatmul.mubr.msk.f32.gmra.mrb[44].mxu1 %vm2256_vm4, %v5110_v0 }
 0x3d3   : > { %4323 = vmatprep.mubr.msk.f32.mxu1 %vm2256_vm4, %v5111_v34 }
 0x3d6   : > { %4324 = vmatmul.mubr.msk.f32.gmra.mrb[46].mxu1 %vm2256_vm4, %v5112_v56 }
 0x3d7   : > { %4326 = vmatprep.mubr.msk.f32.mxu1 %vm2256_vm4, %v5113_v46 }
 0x3da   : > { %4327 = vmatmul.mubr.msk.f32.gmra.mrb[48].mxu1 %vm2256_vm4, %v5114_v2 }
 0x3db   : > { %4329 = vmatprep.mubr.msk.f32.mxu1 %vm2256_vm4, %v5115_v11 }
 0x3de   : > { %4330 = vmatmul.mubr.msk.f32.gmra.mrb[50].mxu1 %vm2256_vm4, %v5116_v24 }
 0x3df   : > { %4332 = vmatprep.mubr.msk.f32.mxu1 %vm2256_vm4, %v5754_v47  ;;  %v2963_v47 = vld [vmem:[#allocation5 + $0x8] sm:$0xff] }
 0x3e0   : > { %3122 = vmatprep.mubr.f32.mxu0 %v2963_v47 }
 0x3e2   : > { %4333 = vmatmul.mubr.msk.f32.gmra.mrb[52].mxu1 %vm2256_vm4, %v5761_v29  ;;  %v5214_v29 = vmov 0.0|0.0  }
 0x3e3   : > { %4335 = vmatprep.mubr.msk.f32.mxu1 %vm2256_vm4, %v5773_v62  ;;  %4492 = vmatprep.subr.bf16.mxu1 %v5214_v29 }
 0x3e6   : > { %4336 = vmatmul.mubr.msk.f32.gmra.mrb[54].mxu1 %vm2256_vm4, %v5779_v27 }
 0x3e7   : > { %4338 = vmatprep.mubr.msk.f32.mxu1 %vm2256_vm4, %v5793_v6 }
 0x3ea   : > { %4339 = vmatmul.mubr.msk.f32.gmra.mrb[56].mxu1 %vm2256_vm4, %v5799_v13 }
 0x3eb   : > { %4341 = vmatprep.mubr.msk.f32.mxu1 %vm2256_vm4, %v5808_v20 }
 0x3ee   : > { %4342 = vmatmul.mubr.msk.f32.gmra.mrb[58].mxu1 %vm2256_vm4, %v5823_v35 }
 0x3ef   : > { %4344 = vmatprep.mubr.msk.f32.mxu1 %vm2256_vm4, %v5813_v26 }
 0x3f2   : > { %4345 = vmatmul.mubr.msk.f32.gmra.mrb[60].mxu1 %vm2256_vm4, %v5839_v48 }
 0x3f3   : > { %4347 = vmatprep.mubr.msk.f32.mxu1 %vm2256_vm4, %v5829_v4 }
 0x3f6   : > { %4348 = vmatmul.mubr.msk.f32.gmra.mrb[62].mxu1 %vm2256_vm4, %v5855_v58 }
 0x3f7   : > { %4350 = vmatprep.mubr.msk.f32.mxu1 %vm2256_vm4, %v5845_v52 }
 0x3fa   : > { %4351 = vmatmul.mubr.msk.f32.gmra.mrb[64].mxu1 %vm2256_vm4, %v5871_v12 }
 0x3fb   : > { %4353 = vmatprep.mubr.msk.f32.mxu1 %vm2256_vm4, %v5861_v63 }
 0x3fe   : > { %4354 = vmatmul.mubr.msk.f32.gmra.mrb[66].mxu1 %vm2256_vm4, %v5877_v38 }
 0x3ff   : > { %4356 = vmatprep.mubr.msk.f32.mxu1 %vm2256_vm4, %v5887_v43 }
 0x402   : > { %4357 = vmatmul.mubr.msk.f32.gmra.mrb[68].mxu1 %vm2256_vm4, %v5893_v21 }
 0x403   : > { %4359 = vmatprep.mubr.msk.f32.mxu1 %vm2256_vm4, %v5903_v57 }
 0x406   : > { %4360 = vmatmul.mubr.msk.f32.gmra.mrb[70].mxu1 %vm2256_vm4, %v5909_v15 }
 0x407   : > { %4362 = vmatprep.mubr.msk.f32.mxu1 %vm2256_vm4, %v5919_v30 }
 0x40a   : > { %4363 = vmatmul.mubr.msk.f32.gmra.mrb[72].mxu1 %vm2256_vm4, %v5925_v40 }
 0x40b   : > { %4365 = vmatprep.mubr.msk.f32.mxu1 %vm2256_vm4, %v5935_v32 }
 0x40e   : > { %4366 = vmatmul.mubr.msk.f32.gmra.mrb[74].mxu1 %vm2256_vm4, %v5940_v50 }
 0x40f   : > { %4368 = vmatprep.mubr.msk.f32.mxu1 %vm2256_vm4, %v5956_v8 }
 0x412   : > { %4369 = vmatmul.mubr.msk.f32.gmra.mrb[76].mxu1 %vm2256_vm4, %v5949_v9 }
 0x413   : > { %4371 = vmatprep.mubr.msk.f32.mxu1 %vm2256_vm4, %v6087_v37 }
 0x416   : > { %4372 = vmatmul.mubr.msk.f32.gmra.mrb[78].mxu1 %vm2256_vm4, %v6080_v49 }
 0x417   : > { %4406 = vmatprep.mubr.msk.f32.mxu1 %vm5216_vm5, %v5213_v44 }
 0x48d   : > { %v6260_v62 = vpop.f32.mrb[32].mxu1 }
 0x48e   : > { %v2659_v27 = vmul.f32 -1.702, %v6260_v62  ;;  %v6263_v6 = vpop.f32.mrb[33].mxu1 }
 0x48f   : > { %v2658_v13 = vmul.f32 -1.702, %v6263_v6 }
 0x490   : > { %v2708_v20 = vmul.f32 1.442695, %v2659_v27 }
 0x491   : > { %v2706_v26 = vmul.f32 1.442695, %v2658_v13  ;;  %v6266_v35 = vpop.f32.mrb[34].mxu1 }
 0x492   : > { %4841 = vpow2.f32 %v2708_v20  ;;  %v2661_v4 = vmul.f32 -1.702, %v6266_v35  ;;  %v6269_v48 = vpop.f32.mrb[35].mxu1 }
 0x493   : > { %4843 = vpow2.f32 %v2706_v26  ;;  %v2660_v52 = vmul.f32 -1.702, %v6269_v48 }
 0x494   : > { %v2712_v58 = vmul.f32 1.442695, %v2661_v4 }
 0x495   : > { %v2710_v63 = vmul.f32 1.442695, %v2660_v52  ;;  %v6272_v12 = vpop.f32.mrb[36].mxu1 }
 0x496   : > { %4845 = vpow2.f32 %v2712_v58  ;;  %v2663_v38 = vmul.f32 -1.702, %v6272_v12  ;;  %v6275_v43 = vpop.f32.mrb[37].mxu1 }
 0x497   : > { %4847 = vpow2.f32 %v2710_v63  ;;  %v2662_v21 = vmul.f32 -1.702, %v6275_v43 }
 0x498   : > { %v2716_v57 = vmul.f32 1.442695, %v2663_v38 }
 0x499   : > { %v2714_v15 = vmul.f32 1.442695, %v2662_v21  ;;  %v6278_v30 = vpop.f32.mrb[38].mxu1 }
 0x49a   : > { %4849 = vpow2.f32 %v2716_v57  ;;  %v2665_v40 = vmul.f32 -1.702, %v6278_v30  ;;  %v6281_v32 = vpop.f32.mrb[39].mxu1 }
 0x49b   : > { %4851 = vpow2.f32 %v2714_v15  ;;  %v2664_v50 = vmul.f32 -1.702, %v6281_v32 }
 0x49c   : > { %v4842_v9 = vpop.eup %4841  ;;  %v2720_v8 = vmul.f32 1.442695, %v2665_v40 }
 0x49d   : > { %v4844_v49 = vpop.eup %4843  ;;  %v2803_v37 = vadd.f32 1.0, %v4842_v9  ;;  %v2718_v10 = vmul.f32 1.442695, %v2664_v50  ;;  %v6284_v5 = vpop.f32.mrb[40].mxu1  ;;  %v6327_v50 = vld [vmem:[%s6684_s4] sm:$0xff]  ;;  %v2947_v9 = vld [vmem:[%s6684_s4 + $0x8] sm:$0xff] }
 0x49e   : > { %v2802_v59 = vadd.f32 1.0, %v4844_v49  ;;  %4853 = vpow2.f32 %v2720_v8  ;;  %v2667_v19 = vmul.f32 -1.702, %v6284_v5  ;;  %v6287_v54 = vpop.f32.mrb[41].mxu1  ;;  %3010 = vrot.lane.b32.xlu0 %v6327_v50, %s5215_s13  ;;  %3012 = vrot.lane.b32.xlu1 %v2947_v9, %s5215_s13 }
 0x49f   : > { %4855 = vrcp.f32 %v2803_v37  ;;  %v2666_v28 = vmul.f32 -1.702, %v6287_v54 }
 0x4a0   : > { %v4846_v39 = vpop.eup %4845  ;;  %4857 = vrcp.f32 %v2802_v59  ;;  %v2724_v42 = vmul.f32 1.442695, %v2667_v19  ;;  %v2948_v19 = vld [vmem:[%s6684_s4 + $0x10] sm:$0xff] }
 0x4a1   : > { %v4848_v41 = vpop.eup %4847  ;;  %v2805_v14 = vadd.f32 1.0, %v4846_v39  ;;  %4859 = vpow2.f32 %v2718_v10  ;;  %v2722_v16 = vmul.f32 1.442695, %v2666_v28  ;;  %v6290_v17 = vpop.f32.mrb[42].mxu1 }
 0x4a2   : > { %v2804_v36 = vadd.f32 1.0, %v4848_v41  ;;  %4861 = vpow2.f32 %v2724_v42  ;;  %v2669_v23 = vmul.f32 -1.702, %v6290_v17  ;;  %v6293_v31 = vpop.f32.mrb[43].mxu1  ;;  %3014 = vrot.lane.b32.xlu0 %v2948_v19, %s5215_s13 }
 0x4a3   : > { %4863 = vrcp.f32 %v2805_v14  ;;  %v2668_v25 = vmul.f32 -1.702, %v6293_v31 }
 0x4a4   : > { %v4850_v3 = vpop.eup %4849  ;;  %4865 = vrcp.f32 %v2804_v36  ;;  %v2728_v33 = vmul.f32 1.442695, %v2669_v23 }
 0x4a5   : > { %v4852_v1 = vpop.eup %4851  ;;  %v2807_v45 = vadd.f32 1.0, %v4850_v3  ;;  %4867 = vpow2.f32 %v2722_v16  ;;  %v2726_v18 = vmul.f32 1.442695, %v2668_v25  ;;  %v6296_v22 = vpop.f32.mrb[44].mxu1 }
 0x4a6   : > { %v2806_v51 = vadd.f32 1.0, %v4852_v1  ;;  %4869 = vpow2.f32 %v2728_v33  ;;  %v2671_v55 = vmul.f32 -1.702, %v6296_v22  ;;  %v6299_v60 = vpop.f32.mrb[45].mxu1 }
 0x4a7   : > { %4871 = vrcp.f32 %v2807_v45  ;;  %v2670_v53 = vmul.f32 -1.702, %v6299_v60 }
 0x4a8   : > { %v4854_v7 = vpop.eup %4853  ;;  %4873 = vrcp.f32 %v2806_v51  ;;  %v2732_v61 = vmul.f32 1.442695, %v2671_v55  ;;  %v2950_v51 = vld [vmem:[%s6684_s4 + $0x20] sm:$0xff] }
 0x4a9   : > { %v4856_v0 = vpop.eup %4855  ;;  %v2809_v34 = vadd.f32 1.0, %v4854_v7  ;;  %4875 = vpow2.f32 %v2726_v18  ;;  %v2730_v56 = vmul.f32 1.442695, %v2670_v53  ;;  %v6302_v46 = vpop.f32.mrb[46].mxu1  ;;  %3018 = vrot.lane.b32.xlu0 %v2950_v51, %s5215_s13 }
 0x4aa   : > { %v4858_v2 = vpop.eup %4857  ;;  %v6305_v11 = vmul.f32 %v4856_v0, %v6260_v62  ;;  %4877 = vpow2.f32 %v2732_v61  ;;  %v2673_v24 = vmul.f32 -1.702, %v6302_v46  ;;  %v6308_v47 = vpop.f32.mrb[47].mxu1 }
 0x4ab   : > { %v4860_v27 = vpop.eup %4859  ;;  %v6311_v13 = vmul.f32 %v4858_v2, %v6263_v6  ;;  %4879 = vrcp.f32 %v2809_v34  ;;  %v2672_v20 = vmul.f32 -1.702, %v6308_v47 }
 0x4ac   : > { %v4862_v26 = vpop.eup %4861  ;;  %v2808_v4 = vadd.f32 1.0, %v4860_v27  ;;  %4881 = vpow2.f32 %v2730_v56  ;;  %v2736_v52 = vmul.f32 1.442695, %v2673_v24 }
 0x4ad   : > { %v4864_v58 = vpop.eup %4863  ;;  %v4462_v62 = vpack.c.bf16 %v6305_v11, %v6311_v13  ;;  %v2811_v63 = vadd.f32 1.0, %v4862_v26  ;;  %v2734_v38 = vmul.f32 1.442695, %v2672_v20  ;;  %v6316_v21 = vpop.f32.mrb[48].mxu1 }
 0x4ae   : > { %v4866_v57 = vpop.eup %4865  ;;  %v6319_v15 = vmul.f32 %v4864_v58, %v6266_v35  ;;  %4883 = vrcp.f32 %v2808_v4  ;;  %v2675_v6 = vmul.f32 -1.702, %v6316_v21  ;;  %v6322_v40 = vpop.f32.mrb[49].mxu1 }
 0x4af   : > { %v4868_v8 = vpop.eup %4867  ;;  %v6333_v49 = vmul.f32 %v4866_v57, %v6269_v48  ;;  %4885 = vrcp.f32 %v2811_v63  ;;  %v2674_v35 = vmul.f32 -1.702, %v6322_v40  ;;  %v2949_v48 = vld [vmem:[%s6684_s4 + $0x18] sm:$0xff] }
 0x4b0   : > { %v4870_v37 = vpop.eup %4869  ;;  %v2810_v10 = vadd.f32 1.0, %v4868_v8  ;;  %4887 = vpow2.f32 %v2736_v52  ;;  %v2740_v59 = vmul.f32 1.442695, %v2675_v6  ;;  %3016 = vrot.lane.b32.xlu1 %v2949_v48, %s5215_s13  ;;  %v2952_v52 = vld [vmem:[%s6684_s4 + $0x30] sm:$0xff] }
 0x4b1   : > { %v4872_v28 = vpop.eup %4871  ;;  %v4466_v39 = vpack.c.bf16 %v6319_v15, %v6333_v49  ;;  %v2813_v42 = vadd.f32 1.0, %v4870_v37  ;;  %4889 = vpow2.f32 %v2734_v38  ;;  %v2738_v41 = vmul.f32 1.442695, %v2674_v35  ;;  %v6347_v14 = vpop.f32.mrb[50].mxu1  ;;  %3022 = vrot.lane.b32.xlu0 %v2952_v52, %s5215_s13 }
 0x4b2   : > { %v4874_v16 = vpop.eup %4873  ;;  %v6350_v36 = vmul.f32 %v4872_v28, %v6272_v12  ;;  %4891 = vrcp.f32 %v2810_v10  ;;  %v2677_v23 = vmul.f32 -1.702, %v6347_v14  ;;  %v6353_v25 = vpop.f32.mrb[51].mxu1  ;;  %v2954_v28 = vld [vmem:[%s6684_s4 + $0x40] sm:$0xff] }
 0x4b3   : > { %v4876_v3 = vpop.eup %4875  ;;  %v6356_v33 = vmul.f32 %v4874_v16, %v6275_v43  ;;  %4893 = vrcp.f32 %v2813_v42  ;;  %v2676_v1 = vmul.f32 -1.702, %v6353_v25  ;;  %v2951_v43 = vld [vmem:[%s6684_s4 + $0x28] sm:$0xff] }
 0x4b4   : > { %v4878_v45 = vpop.eup %4877  ;;  %v2812_v18 = vadd.f32 1.0, %v4876_v3  ;;  %4895 = vpow2.f32 %v2740_v59  ;;  %v2744_v12 = vmul.f32 1.442695, %v2677_v23  ;;  %3020 = vrot.lane.b32.xlu1 %v2951_v43, %s5215_s13  ;;  %v2955_v42 = vld [vmem:[%s6684_s4 + $0x48] sm:$0xff] }
 0x4b5   : > { %v4880_v55 = vpop.eup %4879  ;;  %v4470_v53 = vpack.c.bf16 %v6350_v36, %v6356_v33  ;;  %v2815_v7 = vadd.f32 1.0, %v4878_v45  ;;  %4897 = vpow2.f32 %v2738_v41  ;;  %v6369_v61 = vpop.f32.mrb[52].mxu1  ;;  %v2742_v34 = vmul.f32 1.442695, %v2676_v1  ;;  %3026 = vrot.lane.b32.xlu0 %v2954_v28, %s5215_s13 }
 0x4b6   : > { %v4882_v0 = vpop.eup %4881  ;;  %4899 = vrcp.f32 %v2812_v18  ;;  %v2679_v56 = vmul.f32 -1.702, %v6369_v61  ;;  %v6372_v2 = vpop.f32.mrb[53].mxu1  ;;  %v6375_v24 = vmul.f32 %v4880_v55, %v6278_v30  ;;  %v2953_v30 = vld [vmem:[%s6684_s4 + $0x38] sm:$0xff] }
 0x4b7   : > { %4901 = vrcp.f32 %v2815_v7  ;;  %v2814_v27 = vadd.f32 1.0, %v4882_v0  ;;  %v2678_v20 = vmul.f32 -1.702, %v6372_v2 }
 0x4b8   : > { %v4884_v26 = vpop.eup %4883  ;;  %4903 = vpow2.f32 %v2744_v12  ;;  %v2748_v4 = vmul.f32 1.442695, %v2679_v56  ;;  %3024 = vrot.lane.b32.xlu1 %v2953_v30, %s5215_s13  ;;  %v2957_v56 = vld [vmem:[%s6684_s4 + $0x58] sm:$0xff] }
 0x4b9   : > { %v4886_v58 = vpop.eup %4885  ;;  %v6387_v63 = vmul.f32 %v4884_v26, %v6281_v32  ;;  %4905 = vrcp.f32 %v2814_v27  ;;  %v2746_v38 = vmul.f32 1.442695, %v2678_v20  ;;  %v6389_v57 = vpop.f32.mrb[54].mxu1 }
 0x4ba   : > { %v4888_v6 = vpop.eup %4887  ;;  %v6392_v9 = vmul.f32 %v4886_v58, %v6284_v5  ;;  %4907 = vpow2.f32 %v2742_v34  ;;  %v2681_v8 = vmul.f32 -1.702, %v6389_v57  ;;  %v6395_v35 = vpop.f32.mrb[55].mxu1  ;;  %v2956_v34 = vld [vmem:[%s6684_s4 + $0x50] sm:$0xff] }
 0x4bb   : > { %v4890_v37 = vpop.eup %4889  ;;  %v4474_v10 = vpack.c.bf16 %v6375_v24, %v6387_v63  ;;  %v2817_v59 = vadd.f32 1.0, %v4888_v6  ;;  %4909 = vpow2.f32 %v2748_v4  ;;  %v2680_v32 = vmul.f32 -1.702, %v6395_v35  ;;  %3030 = vrot.lane.b32.xlu0 %v2956_v34, %s5215_s13 }
 0x4bc   : > { %v4892_v19 = vpop.eup %4891  ;;  %v2816_v5 = vadd.f32 1.0, %v4890_v37  ;;  %4911 = vpow2.f32 %v2746_v38  ;;  %v2752_v48 = vmul.f32 1.442695, %v2681_v8  ;;  %3028 = vrot.lane.b32.xlu1 %v2955_v42, %s5215_s13 }
 0x4bd   : > { %v4894_v41 = vpop.eup %4893  ;;  %v6409_v16 = vmul.f32 %v4892_v19, %v6287_v54  ;;  %4913 = vrcp.f32 %v2817_v59  ;;  %v2750_v23 = vmul.f32 1.442695, %v2680_v32  ;;  %v6411_v3 = vpop.f32.mrb[56].mxu1  ;;  %v2958_v19 = vld [vmem:[%s6684_s4 + $0x60] sm:$0xff] }
 0x4be   : > { %v4896_v1 = vpop.eup %4895  ;;  %v6414_v45 = vmul.f32 %v4894_v41, %v6290_v17  ;;  %4915 = vrcp.f32 %v2816_v5  ;;  %v2683_v18 = vmul.f32 -1.702, %v6411_v3  ;;  %v6417_v12 = vpop.f32.mrb[57].mxu1  ;;  %v2959_v5 = vld [vmem:[%s6684_s4 + $0x68] sm:$0xff] }
 0x4bf   : > { %v4898_v51 = vpop.eup %4897  ;;  %v4478_v43 = vpack.c.bf16 %v6392_v9, %v6409_v16  ;;  %v2819_v55 = vadd.f32 1.0, %v4896_v1  ;;  %4917 = vpow2.f32 %v2752_v48  ;;  %v2682_v54 = vmul.f32 -1.702, %v6417_v12  ;;  %3034 = vrot.lane.b32.xlu0 %v2958_v19, %s5215_s13 }
 0x4c0   : > { %v4900_v7 = vpop.eup %4899  ;;  %v2818_v17 = vadd.f32 1.0, %v4898_v51  ;;  %4919 = vpow2.f32 %v2750_v23  ;;  %v2756_v0 = vmul.f32 1.442695, %v2683_v18  ;;  %3032 = vrot.lane.b32.xlu1 %v2957_v56, %s5215_s13  ;;  %v2960_v56 = vld [vmem:[%s6684_s4 + $0x70] sm:$0xff] }
 0x4c1   : > { %v4902_v27 = vpop.eup %4901  ;;  %v6431_v20 = vmul.f32 %v4900_v7, %v6293_v31  ;;  %4921 = vrcp.f32 %v2819_v55  ;;  %v2754_v26 = vmul.f32 1.442695, %v2682_v54  ;;  %v6433_v4 = vpop.f32.mrb[58].mxu1 }
 0x4c2   : > { %v4904_v52 = vpop.eup %4903  ;;  %v6436_v30 = vmul.f32 %v4902_v27, %v6296_v22  ;;  %4923 = vrcp.f32 %v2818_v17  ;;  %v2685_v58 = vmul.f32 -1.702, %v6433_v4  ;;  %v6439_v38 = vpop.f32.mrb[59].mxu1  ;;  %v2961_v27 = vld [vmem:[%s6684_s4 + $0x78] sm:$0xff] }
 0x4c3   : > { %v4906_v6 = vpop.eup %4905  ;;  %v4482_v8 = vpack.c.bf16 %v6414_v45, %v6431_v20  ;;  %v2821_v37 = vadd.f32 1.0, %v4904_v52  ;;  %4925 = vpow2.f32 %v2756_v0  ;;  %v2684_v31 = vmul.f32 -1.702, %v6439_v38  ;;  %3038 = vrot.lane.b32.xlu0 %v2960_v56, %s5215_s13 }
 0x4c4   : > { %v4908_v59 = vpop.eup %4907  ;;  %v6447_v22 = vmul.f32 %v4906_v6, %v6299_v60  ;;  %4927 = vpow2.f32 %v2754_v26  ;;  %v2760_v32 = vmul.f32 1.442695, %v2685_v58  ;;  %3036 = vrot.lane.b32.xlu1 %v2959_v5, %s5215_s13 }
 0x4c5   : > { %v4910_v48 = vpop.eup %4909  ;;  %4929 = vrcp.f32 %v2821_v37  ;;  %v2820_v28 = vadd.f32 1.0, %v4908_v59  ;;  %v2758_v42 = vmul.f32 1.442695, %v2684_v31  ;;  %v6455_v41 = vpop.f32.mrb[60].mxu1 }
 0x4c6   : > { %v4912_v23 = vpop.eup %4911  ;;  %v4486_v60 = vpack.c.bf16 %v6436_v30, %v6447_v22  ;;  %v2823_v1 = vadd.f32 1.0, %v4910_v48  ;;  %4931 = vpow2.f32 %v2760_v32  ;;  %v2687_v18 = vmul.f32 -1.702, %v6455_v41  ;;  %v6460_v51 = vpop.f32.mrb[61].mxu1 }
 0x4c7   : > { %v4914_v55 = vpop.eup %4913  ;;  %4933 = vrcp.f32 %v2820_v28  ;;  %v2822_v54 = vadd.f32 1.0, %v4912_v23  ;;  %v2686_v7 = vmul.f32 -1.702, %v6460_v51 }
 0x4c8   : > { %v4916_v17 = vpop.eup %4915  ;;  %v6466_v0 = vmul.f32 %v4914_v55, %v6302_v46  ;;  %4935 = vrcp.f32 %v2823_v1  ;;  %v2764_v34 = vmul.f32 1.442695, %v2687_v18  ;;  %3040 = vrot.lane.b32.xlu1 %v2961_v27, %s5215_s13  ;;  %s5217_s13 = smov 55  }
 0x4c9   : > { %v4918_v26 = vpop.eup %4917  ;;  %v6475_v52 = vmul.f32 %v4916_v17, %v6308_v47  ;;  %4937 = vrcp.f32 %v2822_v54  ;;  %v6477_v58 = vpop.f32.mrb[62].mxu1  ;;  %v2762_v37 = vmul.f32 1.442695, %v2686_v7  ;;  %3443 = vrot.lane.b32.xlu0 %v6327_v50, %s5217_s13 }
 0x4ca   : > { %v4920_v6 = vpop.eup %4919  ;;  %v2825_v46 = vadd.f32 1.0, %v4918_v26  ;;  %4939 = vpow2.f32 %v2758_v42  ;;  %v2689_v31 = vmul.f32 -1.702, %v6477_v58  ;;  %v6480_v59 = vpop.f32.mrb[63].mxu1 }
 0x4cb   : > { %v4922_v32 = vpop.eup %4921  ;;  %v4490_v19 = vpack.c.bf16 %v6466_v0, %v6475_v52  ;;  %v2824_v5 = vadd.f32 1.0, %v4920_v6  ;;  %4941 = vpow2.f32 %v2764_v34  ;;  %v2688_v47 = vmul.f32 -1.702, %v6480_v59 }
 0x4cc   : > { %v4924_v48 = vpop.eup %4923  ;;  %v2915_v28 = vmul.f32 %v4922_v32, %v6316_v21  ;;  %4943 = vrcp.f32 %v2825_v46  ;;  %v2768_v42 = vmul.f32 1.442695, %v2689_v31 }
 0x4cd   : > { %v4926_v23 = vpop.eup %4925  ;;  %v2914_v1 = vmul.f32 %v4924_v48, %v6322_v40  ;;  %4945 = vrcp.f32 %v2824_v5  ;;  %v6489_v18 = vpop.f32.mrb[64].mxu1  ;;  %v2766_v7 = vmul.f32 1.442695, %v2688_v47 }
 0x4ce   : > { %v4928_v55 = vpop.eup %4927  ;;  %v2827_v54 = vadd.f32 1.0, %v4926_v23  ;;  %4947 = vpow2.f32 %v2762_v37  ;;  %v2691_v17 = vmul.f32 -1.702, %v6489_v18  ;;  %v6492_v34 = vpop.f32.mrb[65].mxu1 }
 0x4cf   : > { %v4930_v56 = vpop.eup %4929  ;;  %v4460_v27 = vpack.c.bf16 %v2915_v28, %v2914_v1  ;;  %v2826_v26 = vadd.f32 1.0, %v4928_v55  ;;  %4949 = vpow2.f32 %v2768_v42  ;;  %v2690_v21 = vmul.f32 -1.702, %v6492_v34 }
 0x4d0   : > { %v4932_v6 = vpop.eup %4931  ;;  %v2917_v40 = vmul.f32 %v4930_v56, %v6347_v14  ;;  %4951 = vrcp.f32 %v2827_v54  ;;  %v2772_v46 = vmul.f32 1.442695, %v2691_v17 }
 0x4d1   : > { %v4934_v31 = vpop.eup %4933  ;;  %4953 = vrcp.f32 %v2826_v26  ;;  %v2829_v32 = vadd.f32 1.0, %v4932_v6  ;;  %v2770_v37 = vmul.f32 1.442695, %v2690_v21  ;;  %4461 = vmatprep.subr.bf16.mxu0 %v4460_v27  ;;  %v6496_v5 = vpop.f32.mrb[66].mxu1 }
 0x4d2   : > { %v4936_v47 = vpop.eup %4935  ;;  %v2916_v48 = vmul.f32 %v4934_v31, %v6353_v25  ;;  %4955 = vpow2.f32 %v2766_v7  ;;  %4463 = vmatpush3.bf16.msra.mxu0 %v4462_v62  ;;  %v2693_v28 = vmul.f32 -1.702, %v6496_v5  ;;  %v6503_v14 = vpop.f32.mrb[67].mxu1 }
 0x4d3   : > { %v4938_v42 = vpop.eup %4937  ;;  %v2919_v23 = vmul.f32 %v4936_v47, %v6369_v61  ;;  %4957 = vrcp.f32 %v2829_v32  ;;  %v2692_v1 = vmul.f32 -1.702, %v6503_v14 }
 0x4d4   : > { %v4940_v55 = vpop.eup %4939  ;;  %v4464_v54 = vpack.c.bf16 %v2917_v40, %v2916_v48  ;;  %v2918_v17 = vmul.f32 %v4938_v42, %v6372_v2  ;;  %4959 = vpow2.f32 %v2772_v46  ;;  %v2776_v25 = vmul.f32 1.442695, %v2693_v28 }
 0x4d5   : > { %v4942_v7 = vpop.eup %4941  ;;  %v2828_v56 = vadd.f32 1.0, %v4940_v55  ;;  %4961 = vpow2.f32 %v2770_v37  ;;  %v2774_v11 = vmul.f32 1.442695, %v2692_v1  ;;  %v6508_v13 = vpop.f32.mrb[68].mxu1 }
 0x4d6   : > { %v4944_v62 = vpop.eup %4943  ;;  %v4468_v27 = vpack.c.bf16 %v2919_v23, %v2918_v17  ;;  %v2831_v26 = vadd.f32 1.0, %v4942_v7  ;;  %4963 = vpow2.f32 %v2776_v25  ;;  %4465 = vmatprep.subr.bf16.mxu0 %v4464_v54  ;;  %v2695_v61 = vmul.f32 -1.702, %v6508_v13  ;;  %v6511_v21 = vpop.f32.mrb[69].mxu1 }
 0x4d7   : > { %v4946_v6 = vpop.eup %4945  ;;  %v2921_v2 = vmul.f32 %v4944_v62, %v6389_v57  ;;  %4965 = vrcp.f32 %v2828_v56  ;;  %4467 = vmatpush3.bf16.msra.mxu0 %v4466_v39  ;;  %v2694_v40 = vmul.f32 -1.702, %v6511_v21 }
 0x4d8   : > { %v4948_v46 = vpop.eup %4947  ;;  %v2920_v31 = vmul.f32 %v4946_v6, %v6395_v35  ;;  %4967 = vrcp.f32 %v2831_v26  ;;  %v2780_v32 = vmul.f32 1.442695, %v2695_v61  ;;  %4469 = vmatprep.subr.bf16.mxu0 %v4468_v27 }
 0x4d9   : > { %v4950_v37 = vpop.eup %4949  ;;  %v2830_v47 = vadd.f32 1.0, %v4948_v46  ;;  %4969 = vpow2.f32 %v2774_v11  ;;  %v2778_v48 = vmul.f32 1.442695, %v2694_v40  ;;  %v6519_v28 = vpop.f32.mrb[70].mxu1 }
 0x4da   : > { %v4952_v57 = vpop.eup %4951  ;;  %v4472_v42 = vpack.c.bf16 %v2921_v2, %v2920_v31  ;;  %v2833_v23 = vadd.f32 1.0, %v4950_v37  ;;  %4971 = vpow2.f32 %v2780_v32  ;;  %v2697_v15 = vmul.f32 -1.702, %v6519_v28  ;;  %v6522_v49 = vpop.f32.mrb[71].mxu1 }
 0x4db   : > { %v4954_v39 = vpop.eup %4953  ;;  %v2923_v35 = vmul.f32 %v4952_v57, %v6411_v3  ;;  %4973 = vrcp.f32 %v2830_v47  ;;  %4471 = vmatpush3.bf16.msra.mxu0 %v4470_v53  ;;  %v2696_v1 = vmul.f32 -1.702, %v6522_v49 }
 0x4dc   : > { %v4956_v55 = vpop.eup %4955  ;;  %v2922_v54 = vmul.f32 %v4954_v39, %v6417_v12  ;;  %4975 = vrcp.f32 %v2833_v23  ;;  %v2784_v17 = vmul.f32 1.442695, %v2697_v15  ;;  %4473 = vmatprep.subr.bf16.mxu0 %v4472_v42 }
 0x4dd   : > { %v4958_v25 = vpop.eup %4957  ;;  %v2832_v7 = vadd.f32 1.0, %v4956_v55  ;;  %4977 = vpow2.f32 %v2778_v48  ;;  %v2782_v56 = vmul.f32 1.442695, %v2696_v1  ;;  %v6530_v11 = vpop.f32.mrb[72].mxu1 }
 0x4de   : > { %v4960_v3 = vpop.eup %4959  ;;  %v4476_v62 = vpack.c.bf16 %v2923_v35, %v2922_v54  ;;  %4979 = vpow2.f32 %v2784_v17  ;;  %v2699_v36 = vmul.f32 -1.702, %v6530_v11  ;;  %v6533_v33 = vpop.f32.mrb[73].mxu1  ;;  %v2925_v61 = vmul.f32 %v4958_v25, %v6433_v4 }
 0x4df   : > { %v4962_v53 = vpop.eup %4961  ;;  %4981 = vrcp.f32 %v2832_v7  ;;  %v2835_v27 = vadd.f32 1.0, %v4960_v3  ;;  %4475 = vmatpush3.bf16.msra.mxu0 %v4474_v10  ;;  %v2698_v12 = vmul.f32 -1.702, %v6533_v33 }
 0x4e0   : > { %v4964_v26 = vpop.eup %4963  ;;  %v2834_v6 = vadd.f32 1.0, %v4962_v53  ;;  %4983 = vpow2.f32 %v2782_v56  ;;  %v2788_v2 = vmul.f32 1.442695, %v2699_v36  ;;  %4477 = vmatprep.subr.bf16.mxu0 %v4476_v62 }
 0x4e1   : > { %v4966_v40 = vpop.eup %4965  ;;  %4985 = vrcp.f32 %v2835_v27  ;;  %v2837_v46 = vadd.f32 1.0, %v4964_v26  ;;  %v2786_v31 = vmul.f32 1.442695, %v2698_v12  ;;  %v6540_v32 = vpop.f32.mrb[74].mxu1 }
 0x4e2   : > { %v4968_v37 = vpop.eup %4967  ;;  %v2924_v47 = vmul.f32 %v4966_v40, %v6439_v38  ;;  %4987 = vrcp.f32 %v2834_v6  ;;  %v2701_v24 = vmul.f32 -1.702, %v6540_v32  ;;  %v6544_v63 = vpop.f32.mrb[75].mxu1 }
 0x4e3   : > { %v4970_v10 = vpop.eup %4969  ;;  %v2927_v4 = vmul.f32 %v4968_v37, %v6455_v41  ;;  %4989 = vrcp.f32 %v2837_v46  ;;  %4479 = vmatpush3.bf16.msra.mxu0 %v4478_v43  ;;  %v2700_v48 = vmul.f32 -1.702, %v6544_v63 }
 0x4e4   : > { %v4972_v57 = vpop.eup %4971  ;;  %v4480_v42 = vpack.c.bf16 %v2925_v61, %v2924_v47  ;;  %v2836_v23 = vadd.f32 1.0, %v4970_v10  ;;  %4991 = vpow2.f32 %v2788_v2  ;;  %v2792_v38 = vmul.f32 1.442695, %v2701_v24 }
 0x4e5   : > { %v4974_v15 = vpop.eup %4973  ;;  %v2839_v39 = vadd.f32 1.0, %v4972_v57  ;;  %4993 = vpow2.f32 %v2786_v31  ;;  %v2790_v35 = vmul.f32 1.442695, %v2700_v48  ;;  %v6551_v1 = vpop.f32.mrb[76].mxu1 }
 0x4e6   : > { %v4976_v55 = vpop.eup %4975  ;;  %v2926_v41 = vmul.f32 %v4974_v15, %v6460_v51  ;;  %4995 = vrcp.f32 %v2836_v23  ;;  %4481 = vmatprep.subr.bf16.mxu0 %v4480_v42  ;;  %v2703_v9 = vmul.f32 -1.702, %v6551_v1  ;;  %v6555_v16 = vpop.f32.mrb[77].mxu1  ;;  %v2964_v42 = vld [vmem:[#allocation5 + $0x10] sm:$0xff]  ;;  %v2967_v15 = vld [vmem:[#allocation5 + $0x28] sm:$0xff] }
 0x4e7   : > { %v4978_v43 = vpop.eup %4977  ;;  %v2929_v54 = vmul.f32 %v4976_v55, %v6477_v58  ;;  %4997 = vrcp.f32 %v2839_v39  ;;  %4483 = vmatpush3.bf16.msra.mxu0 %v4482_v8  ;;  %v2702_v17 = vmul.f32 -1.702, %v6555_v16 }
 0x4e8   : > { %v4980_v25 = vpop.eup %4979  ;;  %v4484_v7 = vpack.c.bf16 %v2927_v4, %v2926_v41  ;;  %v2838_v56 = vadd.f32 1.0, %v4978_v43  ;;  %4999 = vpow2.f32 %v2792_v38  ;;  %v2796_v51 = vmul.f32 1.442695, %v2703_v9  ;;  %v2966_v43 = vld [vmem:[#allocation5 + $0x20] sm:$0xff] }
 0x4e9   : > { %v4982_v3 = vpop.eup %4981  ;;  %v2841_v62 = vadd.f32 1.0, %v4980_v25  ;;  %5001 = vpow2.f32 %v2790_v35  ;;  %v6562_v36 = vpop.f32.mrb[78].mxu1  ;;  %v2794_v27 = vmul.f32 1.442695, %v2702_v17  ;;  %v2969_v25 = vld [vmem:[#allocation5 + $0x38] sm:$0xff] }
 0x4ea   : > { %v4984_v53 = vpop.eup %4983  ;;  %v2928_v58 = vmul.f32 %v4982_v3, %v6480_v59  ;;  %5003 = vrcp.f32 %v2838_v56  ;;  %4485 = vmatprep.subr.bf16.mxu0 %v4484_v7  ;;  %v2705_v45 = vmul.f32 -1.702, %v6562_v36  ;;  %v6566_v20 = vpop.f32.mrb[79].mxu1 }
 0x4eb   : > { %v4986_v8 = vpop.eup %4985  ;;  %5005 = vrcp.f32 %v2841_v62  ;;  %v2840_v12 = vadd.f32 1.0, %v4984_v53  ;;  %4487 = vmatpush3.bf16.msra.mxu0 %v4486_v60  ;;  %v2704_v26 = vmul.f32 -1.702, %v6566_v20  ;;  %v2962_v60 = vld [vmem:[#allocation5] sm:$0xff]  ;;  %v2968_v53 = vld [vmem:[#allocation5 + $0x30] sm:$0xff] }
 0x4ec   : > { %v4988_v61 = vpop.eup %4987  ;;  %v4488_v6 = vpack.c.bf16 %v2929_v54, %v2928_v58  ;;  %v2931_v59 = vmul.f32 %v4986_v8, %v6489_v18  ;;  %5007 = vpow2.f32 %v2796_v51  ;;  %v2800_v2 = vmul.f32 1.442695, %v2705_v45 }
 0x4ed   : > { %v4990_v40 = vpop.eup %4989  ;;  %v2930_v46 = vmul.f32 %v4988_v61, %v6492_v34  ;;  %5009 = vrcp.f32 %v2840_v12  ;;  %v2798_v31 = vmul.f32 1.442695, %v2704_v26  ;;  %v2965_v34 = vld [vmem:[#allocation5 + $0x18] sm:$0xff]  ;;  %v2970_v26 = vld [vmem:[#allocation5 + $0x40] sm:$0xff] }
 0x4ee   : > { %v4992_v37 = vpop.eup %4991  ;;  %5011 = vpow2.f32 %v2794_v27  ;;  %4489 = vmatprep.subr.bf16.mxu0 %v4488_v6  ;;  %v2933_v30 = vmul.f32 %v4990_v40, %v6496_v5  ;;  %v2972_v40 = vld [vmem:[#allocation5 + $0x50] sm:$0xff] }
 0x4ef   : > { %v4994_v47 = vpop.eup %4993  ;;  %v4493_v24 = vpack.c.bf16 %v2931_v59, %v2930_v46  ;;  %v2843_v22 = vadd.f32 1.0, %v4992_v37  ;;  %5013 = vpow2.f32 %v2800_v2  ;;  %4491 = vmatpush3.bf16.msra.mxu0 %v4490_v19  ;;  %v2973_v59 = vld [vmem:[#allocation5 + $0x58] sm:$0xff] }
 0x4f0   : > { %v4996_v18 = vpop.eup %4995  ;;  %v2842_v10 = vadd.f32 1.0, %v4994_v47  ;;  %5015 = vpow2.f32 %v2798_v31  ;;  %4516 = vmatprep.subr.bf16.mxu0 %v5214_v29  ;;  %v2975_v31 = vld [vmem:[#allocation5 + $0x68] sm:$0xff] }
 0x4f1   : > { %v4998_v4 = vpop.eup %4997  ;;  %v2932_v48 = vmul.f32 %v4996_v18, %v6503_v14  ;;  %5017 = vrcp.f32 %v2843_v22  ;;  %4494 = vmatpush3.bf16.msra.mxu1 %v4493_v24  ;;  %v2977_v18 = vld [vmem:[#allocation5 + $0x78] sm:$0xff] }
 0x4f2   : > { %v5000_v57 = vpop.eup %4999  ;;  %5019 = vrcp.f32 %v2842_v10  ;;  %4495 = vmatprep.subr.bf16.mxu1 %v5214_v29  ;;  %3123 = vmatmul.mubr.f32.vlgmr.msra.gmra.mrb[80].mxu0 %v2962_v60  ;;  %v2935_v52 = vmul.f32 %v4998_v4, %v6508_v13  ;;  %v2981_v4 = vld [vmem:[#allocation5 + $0x98] sm:$0xff] }
 0x4f3   : > { %v5002_v5 = vpop.eup %5001  ;;  %v4496_v0 = vpack.c.bf16 %v2933_v30, %v2932_v48  ;;  %v2845_v19 = vadd.f32 1.0, %v5000_v57  ;;  %3127 = vmatprep.mubr.f32.mxu0 %v2965_v34  ;;  %v2974_v30 = vld [vmem:[#allocation5 + $0x60] sm:$0xff]  ;;  %v2983_v48 = vld [vmem:[#allocation5 + $0xa8] sm:$0xff]  ;;  %v2985_v57 = vld [vmem:[#allocation5 + $0xb8] sm:$0xff] }
 0x4f4   : > { %v5004_v23 = vpop.eup %5003  ;;  %v2844_v38 = vadd.f32 1.0, %v5002_v5  ;;  %v2978_v34 = vld [vmem:[#allocation5 + $0x80] sm:$0xff]  ;;  %v2984_v5 = vld [vmem:[#allocation5 + $0xb0] sm:$0xff] }
 0x4f5   : > { %v5006_v39 = vpop.eup %5005  ;;  %v2934_v14 = vmul.f32 %v5004_v23, %v6511_v21  ;;  %5021 = vrcp.f32 %v2845_v19  ;;  %4497 = vmatpush3.bf16.msra.mxu1 %v4496_v0  ;;  %v2987_v0 = vld [vmem:[#allocation5 + $0xc8] sm:$0xff]  ;;  %v2989_v19 = vld [vmem:[#allocation5 + $0xd8] sm:$0xff] }
 0x4f6   : > { %v5008_v35 = vpop.eup %5007  ;;  %v2937_v55 = vmul.f32 %v5006_v39, %v6519_v28  ;;  %5023 = vrcp.f32 %v2844_v38  ;;  %4498 = vmatprep.subr.bf16.mxu1 %v5214_v29  ;;  %3128 = vmatmul.mubr.f32.gmra.mrb[82].mxu0 %v2964_v42  ;;  %v2988_v42 = vld [vmem:[#allocation5 + $0xd0] sm:$0xff]  ;;  %v2991_v23 = vld [vmem:[#allocation5 + $0xe8] sm:$0xff]  ;;  %v2990_v38 = vld [vmem:[#allocation5 + $0xe0] sm:$0xff] }
 0x4f7   : > { %v5010_v41 = vpop.eup %5009  ;;  %v4499_v13 = vpack.c.bf16 %v2935_v52, %v2934_v14  ;;  %v2847_v9 = vadd.f32 1.0, %v5008_v35  ;;  %3132 = vmatprep.mubr.f32.mxu0 %v2967_v15  ;;  %v2986_v52 = vld [vmem:[#allocation5 + $0xc0] sm:$0xff]  ;;  %v2993_v15 = vld [vmem:[#allocation5 + $0xf8] sm:$0xff]  ;;  %v2992_v39 = vld [vmem:[#allocation5 + $0xf0] sm:$0xff] }
 0x4f8   : > { %v5012_v54 = vpop.eup %5011  ;;  %v2936_v17 = vmul.f32 %v5010_v41, %v6522_v49  ;;  %v2971_v49 = vld [vmem:[#allocation5 + $0x48] sm:$0xff] }
 0x4f9   : > { %v5014_v7 = vpop.eup %5013  ;;  %5025 = vrcp.f32 %v2847_v9  ;;  %v2846_v21 = vadd.f32 1.0, %v5012_v54  ;;  %4500 = vmatpush3.bf16.msra.mxu1 %v4499_v13  ;;  %v3301_v14 = vld [vmem:[#allocation5 + $0x108] sm:$0xff] }
 0x4fa   : > { %v5016_v56 = vpop.eup %5015  ;;  %v4502_v51 = vpack.c.bf16 %v2937_v55, %v2936_v17  ;;  %v2849_v28 = vadd.f32 1.0, %v5014_v7  ;;  %4501 = vmatprep.subr.bf16.mxu1 %v5214_v29  ;;  %3133 = vmatmul.mubr.f32.gmra.mrb[84].mxu0 %v2966_v43 }
 0x4fb   : > { %v5018_v3 = vpop.eup %5017  ;;  %5027 = vrcp.f32 %v2846_v21  ;;  %v2848_v62 = vadd.f32 1.0, %v5016_v56  ;;  %3137 = vmatprep.mubr.f32.mxu0 %v2969_v25 }
 0x4fc   : > { %v5020_v58 = vpop.eup %5019  ;;  %v2939_v27 = vmul.f32 %v5018_v3, %v6530_v11  ;;  %5029 = vrcp.f32 %v2849_v28 }
 0x4fd   : > { %v2938_v45 = vmul.f32 %v5020_v58, %v6533_v33  ;;  %5031 = vrcp.f32 %v2848_v62  ;;  %4503 = vmatpush3.bf16.msra.mxu1 %v4502_v51 }
 0x4fe   : > { %4504 = vmatprep.subr.bf16.mxu1 %v5214_v29  ;;  %3138 = vmatmul.mubr.f32.gmra.mrb[86].mxu0 %v2968_v53 }
 0x4ff   : > { %v5022_v8 = vpop.eup %5021  ;;  %v4505_v12 = vpack.c.bf16 %v2939_v27, %v2938_v45  ;;  %3142 = vmatprep.mubr.f32.mxu0 %v2971_v49 }
 0x500   : > { %v5024_v61 = vpop.eup %5023  ;;  %v2941_v6 = vmul.f32 %v5022_v8, %v6540_v32 }
 0x501   : > { %v2940_v2 = vmul.f32 %v5024_v61, %v6544_v63  ;;  %4506 = vmatpush3.bf16.msra.mxu1 %v4505_v12 }
 0x502   : > { %4507 = vmatprep.subr.bf16.mxu1 %v5214_v29  ;;  %3143 = vmatmul.mubr.f32.gmra.mrb[88].mxu0 %v2970_v26 }
 0x503   : > { %v5026_v11 = vpop.eup %5025  ;;  %v4508_v33 = vpack.c.bf16 %v2941_v6, %v2940_v2  ;;  %3147 = vmatprep.mubr.f32.mxu0 %v2973_v59 }
 0x504   : > { %v2943_v46 = vmul.f32 %v5026_v11, %v6551_v1  ;;  %v2976_v1 = vld [vmem:[#allocation5 + $0x70] sm:$0xff] }
 0x505   : > { %v5028_v37 = vpop.eup %5027  ;;  %4509 = vmatpush3.bf16.msra.mxu1 %v4508_v33 }
 0x506   : > { %v5030_v47 = vpop.eup %5029  ;;  %v2942_v24 = vmul.f32 %v5028_v37, %v6555_v16  ;;  %4510 = vmatprep.subr.bf16.mxu1 %v5214_v29  ;;  %3148 = vmatmul.mubr.f32.gmra.mrb[90].mxu0 %v2972_v40  ;;  %v2979_v16 = vld [vmem:[#allocation5 + $0x88] sm:$0xff] }
 0x507   : > { %v5032_v32 = vpop.eup %5031  ;;  %v2945_v63 = vmul.f32 %v5030_v47, %v6562_v36  ;;  %3152 = vmatprep.mubr.f32.mxu0 %v2975_v31  ;;  %v2980_v36 = vld [vmem:[#allocation5 + $0x90] sm:$0xff] }
 0x508   : > { %v4511_v22 = vpack.c.bf16 %v2943_v46, %v2942_v24  ;;  %v2944_v60 = vmul.f32 %v5032_v32, %v6566_v20  ;;  %v2982_v20 = vld [vmem:[#allocation5 + $0xa0] sm:$0xff] }
 0x50a   : > { %v4514_v10 = vpack.c.bf16 %v2945_v63, %v2944_v60  ;;  %4512 = vmatpush3.bf16.msra.mxu1 %v4511_v22  ;;  %3153 = vmatmul.mubr.f32.gmra.mrb[92].mxu0 %v2974_v30 }
 0x50b   : > { %4513 = vmatprep.subr.bf16.mxu1 %v5214_v29  ;;  %3157 = vmatprep.mubr.f32.mxu0 %v2977_v18 }
 0x50e   : > { %4515 = vmatpush3.bf16.msra.mxu1 %v4514_v10  ;;  %3158 = vmatmul.mubr.f32.gmra.mrb[94].mxu0 %v2976_v1 }
 0x50f   : > { %3162 = vmatprep.mubr.f32.mxu0 %v2979_v16 }
 0x510   : > { %v3011_v41 = vpop.permute.xlu0 %3010  ;;  %v3013_v17 = vpop.permute.xlu1 %3012 }
 0x511   : > { %4407 = vmatmul.mubr.f32.vlgmr.msra.gmra.mrb[80].mxu1 %v3301_v14 }
 0x512   : > { %3163 = vmatmul.mubr.f32.gmra.mrb[96].mxu0 %v2978_v34 }
 0x513   : > { %3167 = vmatprep.mubr.f32.mxu0 %v2981_v4 }
 0x514   : > { %v3015_v28 = vpop.permute.xlu0 %3014 }
 0x516   : > { %3168 = vmatmul.mubr.f32.gmra.mrb[98].mxu0 %v2980_v36 }
 0x517   : > { %3172 = vmatprep.mubr.f32.mxu0 %v2983_v48 }
 0x51a   : > { %3173 = vmatmul.mubr.f32.gmra.mrb[100].mxu0 %v2982_v20 }
 0x51b   : > { %3177 = vmatprep.mubr.f32.mxu0 %v2985_v57  ;;  %v3019_v59 = vpop.permute.xlu0 %3018 }
 0x51e   : > { %3178 = vmatmul.mubr.f32.gmra.mrb[102].mxu0 %v2984_v5 }
 0x51f   : > { %3182 = vmatprep.mubr.f32.mxu0 %v2987_v0 }
 0x522   : > { %3183 = vmatmul.mubr.f32.gmra.mrb[104].mxu0 %v2986_v52  ;;  %v3017_v49 = vpop.permute.xlu1 %3016 }
 0x523   : > { %3187 = vmatprep.mubr.f32.mxu0 %v2989_v19  ;;  %v3023_v16 = vpop.permute.xlu0 %3022 }
 0x526   : > { %3188 = vmatmul.mubr.f32.gmra.mrb[106].mxu0 %v2988_v42  ;;  %v3021_v24 = vpop.permute.xlu1 %3020 }
 0x527   : > { %3192 = vmatprep.mubr.f32.mxu0 %v2991_v23 }
 0x52a   : > { %3193 = vmatmul.mubr.f32.gmra.mrb[108].mxu0 %v2990_v38  ;;  %v3025_v52 = vpop.permute.xlu1 %3024 }
 0x52b   : > { %3197 = vmatprep.mubr.f32.mxu0 %v2993_v15 }
 0x52e   : > { %3198 = vmatmul.mubr.f32.gmra.mrb[110].mxu0 %v2992_v39 }
 0x52f   : > { %4441 = vmatprep.mubr.msk.f32.mxu0 %vm5216_vm5, %v5213_v44 }
 0x5c5   : > { %v4094_v35 = vpop.f32.mrb[80].mxu0 }
 0x5c6   : > { %v4095_v55 = vpop.f32.mrb[81].mxu0 }
 0x5c7   : > { %v4096_v13 = vadd.f32 %v4095_v55, %v4094_v35  ;;  %v3027_v55 = vpop.permute.xlu0 %3026 }
 0x5c9   : > { %v4097_v9 = vpop.f32.mrb[82].mxu0  ;;  %v6602_v43 = vadd.f32 %v4096_v13, %v3011_v41 }
 0x5ca   : > { %v4098_v54 = vpop.f32.mrb[83].mxu0 }
 0x5cb   : > { %v4099_v25 = vadd.f32 %v4098_v54, %v4097_v9  ;;  %v3203_v7 = vmul.f32 -1.702, %v6602_v43 }
 0x5cd   : > { %v3219_v21 = vmul.f32 1.442695, %v3203_v7  ;;  %v6605_v56 = vadd.f32 %v4099_v25, %v3013_v17  ;;  %v4100_v44 = vpop.f32.mrb[84].mxu0 }
 0x5ce   : > { %v4101_v51 = vpop.f32.mrb[85].mxu0 }
 0x5cf   : > { %5033 = vpow2.f32 %v3219_v21  ;;  %v3204_v50 = vmul.f32 -1.702, %v6605_v56  ;;  %v4102_v3 = vadd.f32 %v4101_v51, %v4100_v44 }
 0x5d1   : > { %v3221_v62 = vmul.f32 1.442695, %v3204_v50  ;;  %v4103_v53 = vpop.f32.mrb[86].mxu0  ;;  %v6608_v58 = vadd.f32 %v4102_v3, %v3015_v28  ;;  %v3029_v50 = vpop.permute.xlu1 %3028 }
 0x5d2   : > { %v4104_v27 = vpop.f32.mrb[87].mxu0 }
 0x5d3   : > { %5035 = vpow2.f32 %v3221_v62  ;;  %v4105_v45 = vadd.f32 %v4104_v27, %v4103_v53  ;;  %v3205_v8 = vmul.f32 -1.702, %v6608_v58 }
 0x5d5   : > { %v3223_v12 = vmul.f32 1.442695, %v3205_v8  ;;  %v6611_v26 = vadd.f32 %v4105_v45, %v3017_v49  ;;  %v4106_v61 = vpop.f32.mrb[88].mxu0 }
 0x5d6   : > { %v4107_v6 = vpop.f32.mrb[89].mxu0 }
 0x5d7   : > { %5037 = vpow2.f32 %v3223_v12  ;;  %v3206_v2 = vmul.f32 -1.702, %v6611_v26  ;;  %v4108_v11 = vadd.f32 %v4107_v6, %v4106_v61 }
 0x5d9   : > { %v5034_v33 = vpop.eup %5033  ;;  %v3225_v40 = vmul.f32 1.442695, %v3206_v2  ;;  %v4109_v46 = vpop.f32.mrb[90].mxu0  ;;  %v6614_v31 = vadd.f32 %v4108_v11, %v3019_v59 }
 0x5da   : > { %v3251_v37 = vadd.f32 1.0, %v5034_v33  ;;  %v4110_v47 = vpop.f32.mrb[91].mxu0  ;;  %v3031_v59 = vpop.permute.xlu0 %3030 }
 0x5db   : > { %5039 = vpow2.f32 %v3225_v40  ;;  %v4111_v32 = vadd.f32 %v4110_v47, %v4109_v46  ;;  %v3207_v63 = vmul.f32 -1.702, %v6614_v31 }
 0x5dc   : > { %5041 = vrcp.f32 %v3251_v37 }
 0x5dd   : > { %v5036_v30 = vpop.eup %5035  ;;  %v3227_v22 = vmul.f32 1.442695, %v3207_v63  ;;  %v6617_v60 = vadd.f32 %v4111_v32, %v3021_v24  ;;  %v4112_v18 = vpop.f32.mrb[92].mxu0 }
 0x5de   : > { %v3252_v10 = vadd.f32 1.0, %v5036_v30  ;;  %v4113_v1 = vpop.f32.mrb[93].mxu0  ;;  %v3033_v63 = vpop.permute.xlu1 %3032 }
 0x5df   : > { %5043 = vpow2.f32 %v3227_v22  ;;  %v3208_v34 = vmul.f32 -1.702, %v6617_v60  ;;  %v4114_v4 = vadd.f32 %v4113_v1, %v4112_v18 }
 0x5e0   : > { %5045 = vrcp.f32 %v3252_v10 }
 0x5e1   : > { %v5038_v36 = vpop.eup %5037  ;;  %v3229_v48 = vmul.f32 1.442695, %v3208_v34  ;;  %v4115_v20 = vpop.f32.mrb[94].mxu0  ;;  %v6620_v57 = vadd.f32 %v4114_v4, %v3023_v16 }
 0x5e2   : > { %v3253_v5 = vadd.f32 1.0, %v5038_v36  ;;  %v4116_v0 = vpop.f32.mrb[95].mxu0 }
 0x5e3   : > { %5047 = vpow2.f32 %v3229_v48  ;;  %v4117_v19 = vadd.f32 %v4116_v0, %v4115_v20  ;;  %v3209_v42 = vmul.f32 -1.702, %v6620_v57  ;;  %v3035_v20 = vpop.permute.xlu0 %3034 }
 0x5e4   : > { %5049 = vrcp.f32 %v3253_v5 }
 0x5e5   : > { %v5040_v23 = vpop.eup %5039  ;;  %v3231_v38 = vmul.f32 1.442695, %v3209_v42  ;;  %v6623_v15 = vadd.f32 %v4117_v19, %v3025_v52  ;;  %v4118_v39 = vpop.f32.mrb[96].mxu0 }
 0x5e6   : > { %v3254_v14 = vadd.f32 1.0, %v5040_v23  ;;  %v4119_v35 = vpop.f32.mrb[97].mxu0  ;;  %v5042_v41 = vpop.eup %5041 }
 0x5e7   : > { %5051 = vpow2.f32 %v3231_v38  ;;  %v3210_v13 = vmul.f32 -1.702, %v6623_v15  ;;  %v4120_v9 = vadd.f32 %v4119_v35, %v4118_v39  ;;  %v3283_v44 = vmul.f32 %v5042_v41, %v6602_v43  ;;  %v3037_v35 = vpop.permute.xlu1 %3036 }
 0x5e8   : > { %5053 = vrcp.f32 %v3254_v14 }
 0x5e9   : > { %v5044_v54 = vpop.eup %5043  ;;  %v3233_v17 = vmul.f32 1.442695, %v3210_v13  ;;  %v4121_v25 = vpop.f32.mrb[98].mxu0  ;;  %v6626_v7 = vadd.f32 %v4120_v9, %v3027_v55 }
 0x5ea   : > { %v5046_v21 = vpop.eup %5045  ;;  %v3255_v51 = vadd.f32 1.0, %v5044_v54  ;;  %v4122_v28 = vpop.f32.mrb[99].mxu0 }
 0x5eb   : > { %v3284_v3 = vmul.f32 %v5046_v21, %v6605_v56  ;;  %5055 = vpow2.f32 %v3233_v17  ;;  %v4123_v62 = vadd.f32 %v4122_v28, %v4121_v25  ;;  %v3211_v53 = vmul.f32 -1.702, %v6626_v7  ;;  %v3039_v28 = vpop.permute.xlu0 %3038 }
 0x5ec   : > { %5057 = vrcp.f32 %v3255_v51 }
 0x5ed   : > { %v5048_v27 = vpop.eup %5047  ;;  %v4517_v49 = vpack.c.bf16 %v3284_v3, %v3283_v44  ;;  %v3235_v45 = vmul.f32 1.442695, %v3211_v53  ;;  %v6631_v8 = vadd.f32 %v4123_v62, %v3029_v50  ;;  %v4124_v12 = vpop.f32.mrb[100].mxu0 }
 0x5ee   : > { %v3256_v61 = vadd.f32 1.0, %v5048_v27  ;;  %v4125_v6 = vpop.f32.mrb[101].mxu0  ;;  %v5050_v43 = vpop.eup %5049 }
 0x5ef   : > { %5059 = vpow2.f32 %v3235_v45  ;;  %v3212_v2 = vmul.f32 -1.702, %v6631_v8  ;;  %4518 = vmatpush3.bf16.msra.mxu0 %v4517_v49  ;;  %v4126_v56 = vadd.f32 %v4125_v6, %v4124_v12  ;;  %v3285_v47 = vmul.f32 %v5050_v43, %v6608_v58  ;;  %v3041_v6 = vpop.permute.xlu1 %3040 }
 0x5f0   : > { %5061 = vrcp.f32 %v3256_v61  ;;  %4519 = vmatprep.subr.bf16.mxu0 %v5214_v29 }
 0x5f1   : > { %v5052_v11 = vpop.eup %5051  ;;  %v3237_v33 = vmul.f32 1.442695, %v3212_v2  ;;  %v4127_v40 = vpop.f32.mrb[102].mxu0  ;;  %v6635_v46 = vadd.f32 %v4126_v56, %v3031_v59 }
 0x5f2   : > { %v5054_v37 = vpop.eup %5053  ;;  %v3257_v24 = vadd.f32 1.0, %v5052_v11  ;;  %v4128_v32 = vpop.f32.mrb[103].mxu0 }
 0x5f3   : > { %v3286_v30 = vmul.f32 %v5054_v37, %v6611_v26  ;;  %5063 = vpow2.f32 %v3237_v33  ;;  %v4129_v22 = vadd.f32 %v4128_v32, %v4127_v40  ;;  %v3213_v18 = vmul.f32 -1.702, %v6635_v46 }
 0x5f4   : > { %5065 = vrcp.f32 %v3257_v24 }
 0x5f5   : > { %v5056_v10 = vpop.eup %5055  ;;  %v4520_v1 = vpack.c.bf16 %v3286_v30, %v3285_v47  ;;  %v3239_v16 = vmul.f32 1.442695, %v3213_v18  ;;  %v6640_v34 = vadd.f32 %v4129_v22, %v3033_v63  ;;  %v4130_v4 = vpop.f32.mrb[104].mxu0 }
 0x5f6   : > { %v3258_v36 = vadd.f32 1.0, %v5056_v10  ;;  %v4131_v48 = vpop.f32.mrb[105].mxu0  ;;  %v5058_v58 = vpop.eup %5057 }
 0x5f7   : > { %5067 = vpow2.f32 %v3239_v16  ;;  %v3214_v5 = vmul.f32 -1.702, %v6640_v34  ;;  %4521 = vmatpush3.bf16.msra.mxu0 %v4520_v1  ;;  %v4132_v26 = vadd.f32 %v4131_v48, %v4130_v4  ;;  %v3287_v38 = vmul.f32 %v5058_v58, %v6614_v31 }
 0x5f8   : > { %5069 = vrcp.f32 %v3258_v36  ;;  %4522 = vmatprep.subr.bf16.mxu0 %v5214_v29 }
 0x5f9   : > { %v5060_v0 = vpop.eup %5059  ;;  %v3241_v52 = vmul.f32 1.442695, %v3214_v5  ;;  %v4133_v19 = vpop.f32.mrb[106].mxu0  ;;  %v6644_v42 = vadd.f32 %v4132_v26, %v3035_v20 }
 0x5fa   : > { %v5062_v23 = vpop.eup %5061  ;;  %v3259_v39 = vadd.f32 1.0, %v5060_v0  ;;  %v4134_v14 = vpop.f32.mrb[107].mxu0 }
 0x5fb   : > { %v3288_v55 = vmul.f32 %v5062_v23, %v6617_v60  ;;  %5071 = vpow2.f32 %v3241_v52  ;;  %v4135_v41 = vadd.f32 %v4134_v14, %v4133_v19  ;;  %v3215_v13 = vmul.f32 -1.702, %v6644_v42 }
 0x5fc   : > { %5073 = vrcp.f32 %v3259_v39 }
 0x5fd   : > { %v5064_v9 = vpop.eup %5063  ;;  %v4523_v54 = vpack.c.bf16 %v3288_v55, %v3287_v38  ;;  %v3243_v17 = vmul.f32 1.442695, %v3215_v13  ;;  %v6649_v25 = vadd.f32 %v4135_v41, %v3037_v35  ;;  %v4136_v21 = vpop.f32.mrb[108].mxu0  ;;  %v3300_v35 = vld [vmem:[#allocation5 + $0x100] sm:$0xff] }
 0x5fe   : > { %v3260_v44 = vadd.f32 1.0, %v5064_v9  ;;  %v4137_v51 = vpop.f32.mrb[109].mxu0  ;;  %v5066_v31 = vpop.eup %5065 }
 0x5ff   : > { %5075 = vpow2.f32 %v3243_v17  ;;  %v3216_v50 = vmul.f32 -1.702, %v6649_v25  ;;  %4524 = vmatpush3.bf16.msra.mxu0 %v4523_v54  ;;  %v4138_v60 = vadd.f32 %v4137_v51, %v4136_v21  ;;  %v3289_v45 = vmul.f32 %v5066_v31, %v6620_v57  ;;  %v3368_v55 = vpop.f32.mrb[80].mxu1  ;;  %v3444_v9 = vpop.permute.xlu0 %3443 }
 0x600   : > { %5077 = vrcp.f32 %v3260_v44  ;;  %4525 = vmatprep.subr.bf16.mxu0 %v5214_v29  ;;  %v4408_v41 = vpop.f32.mrb[81].mxu1 }
 0x601   : > { %v5068_v3 = vpop.eup %5067  ;;  %v3245_v62 = vmul.f32 1.442695, %v3216_v50  ;;  %v4139_v53 = vpop.f32.mrb[110].mxu0  ;;  %v3195_v27 = vadd.f32 %v4138_v60, %v3039_v28 }
 0x602   : > { %v5070_v49 = vpop.eup %5069  ;;  %v3261_v12 = vadd.f32 1.0, %v5068_v3  ;;  %v4140_v61 = vpop.f32.mrb[111].mxu0 }
 0x603   : > { %v3290_v59 = vmul.f32 %v5070_v49, %v6623_v15  ;;  %5079 = vpow2.f32 %v3245_v62  ;;  %v4141_v43 = vadd.f32 %v4140_v61, %v4139_v53  ;;  %v3217_v2 = vmul.f32 -1.702, %v3195_v27 }
 0x604   : > { %5081 = vrcp.f32 %v3261_v12 }
 0x605   : > { %v5072_v56 = vpop.eup %5071  ;;  %v4526_v11 = vpack.c.bf16 %v3290_v59, %v3289_v45  ;;  %v3247_v33 = vmul.f32 1.442695, %v3217_v2  ;;  %v3200_v40 = vadd.f32 %v4141_v43, %v3041_v6 }
 0x606   : > { %v3262_v37 = vadd.f32 1.0, %v5072_v56  ;;  %v5074_v24 = vpop.eup %5073 }
 0x607   : > { %5083 = vpow2.f32 %v3247_v33  ;;  %v3218_v47 = vmul.f32 -1.702, %v3200_v40  ;;  %4527 = vmatpush3.bf16.msra.mxu0 %v4526_v11  ;;  %v3291_v30 = vmul.f32 %v5074_v24, %v6626_v7 }
 0x608   : > { %5085 = vrcp.f32 %v3262_v37  ;;  %4528 = vmatprep.subr.bf16.mxu0 %v5214_v29 }
 0x609   : > { %v5076_v57 = vpop.eup %5075  ;;  %v3249_v32 = vmul.f32 1.442695, %v3218_v47 }
 0x60a   : > { %v5078_v63 = vpop.eup %5077  ;;  %v3263_v15 = vadd.f32 1.0, %v5076_v57 }
 0x60b   : > { %v3292_v22 = vmul.f32 %v5078_v63, %v6631_v8  ;;  %5087 = vpow2.f32 %v3249_v32 }
 0x60c   : > { %5089 = vrcp.f32 %v3263_v15 }
 0x60d   : > { %v5080_v18 = vpop.eup %5079  ;;  %v4529_v10 = vpack.c.bf16 %v3292_v22, %v3291_v30 }
 0x60e   : > { %v3264_v1 = vadd.f32 1.0, %v5080_v18  ;;  %v5082_v16 = vpop.eup %5081 }
 0x60f   : > { %4530 = vmatpush3.bf16.msra.mxu0 %v4529_v10  ;;  %v3293_v20 = vmul.f32 %v5082_v16, %v6635_v46 }
 0x610   : > { %5091 = vrcp.f32 %v3264_v1  ;;  %4531 = vmatprep.subr.bf16.mxu0 %v5214_v29 }
 0x611   : > { %v5084_v4 = vpop.eup %5083 }
 0x612   : > { %v5086_v36 = vpop.eup %5085  ;;  %v3265_v48 = vadd.f32 1.0, %v5084_v4 }
 0x613   : > { %v3294_v58 = vmul.f32 %v5086_v36, %v6640_v34 }
 0x614   : > { %5093 = vrcp.f32 %v3265_v48 }
 0x615   : > { %v5088_v7 = vpop.eup %5087  ;;  %v4532_v5 = vpack.c.bf16 %v3294_v58, %v3293_v20 }
 0x616   : > { %v3266_v8 = vadd.f32 1.0, %v5088_v7  ;;  %v5090_v26 = vpop.eup %5089 }
 0x617   : > { %4533 = vmatpush3.bf16.msra.mxu0 %v4532_v5  ;;  %v3295_v52 = vmul.f32 %v5090_v26, %v6644_v42 }
 0x618   : > { %5095 = vrcp.f32 %v3266_v8  ;;  %4534 = vmatprep.subr.bf16.mxu0 %v5214_v29 }
 0x61a   : > { %v5092_v0 = vpop.eup %5091 }
 0x61b   : > { %v3296_v19 = vmul.f32 %v5092_v0, %v6649_v25 }
 0x61d   : > { %v4535_v23 = vpack.c.bf16 %v3296_v19, %v3295_v52 }
 0x61e   : > { %v5094_v46 = vpop.eup %5093 }
 0x61f   : > { %4536 = vmatpush3.bf16.msra.mxu0 %v4535_v23  ;;  %v3297_v38 = vmul.f32 %v5094_v46, %v3195_v27 }
 0x620   : > { %4537 = vmatprep.subr.bf16.mxu0 %v5214_v29 }
 0x622   : > { %v5096_v34 = vpop.eup %5095 }
 0x623   : > { %v3298_v39 = vmul.f32 %v5096_v34, %v3200_v40 }
 0x625   : > { %v4538_v14 = vpack.c.bf16 %v3298_v39, %v3297_v38 }
 0x627   : > { %4539 = vmatpush3.bf16.msra.mxu0 %v4538_v14 }
 0x62a   : > { %4442 = vmatmul.mubr.f32.vlgmr.msra.gmra.mrb[112].mxu0 %v3300_v35 }
 0x6fd   : > { %v3438_v13 = vpop.f32.mrb[112].mxu0 }
 0x6fe   : > { %v3439_v42 = vadd.f32 %v3438_v13, %v3368_v55  ;;  %v4443_v54 = vpop.f32.mrb[113].mxu0 }
 0x700   : > { %v3446_v17 = vadd.f32 %v3444_v9, %v3439_v42 }
 0x702   : > { %3447 = vst.msk [vmem:[%s359_s30] sm:$0xff] %vm367_vm2, %v3446_v17 }
 0x703 PF: > { %s20_s26 = sadd.s32 1, %s5203_s26   ;;  %s6696_s24 = smov %s5199_s25 }
 0x704   : > { %p17_p6 = scmp.ge.s32.totalorder %s20_s26, 4   ;;  %s6697_s25 = smov %s6699_s28 }
 0x706   :  { %19 = sbr.rel (!%p17_p6) target bundleno = 3 (0x3), region = 110 }
 0x70d   :  { %3483 = vsyncpa [#allocation4], 1 }
 0x70e   :  { %3485 = vsyncpa [#allocation4 + $0x1], 1 }
 0x70f   :  { %3486 = vsyncpa [#allocation6], 1 }

</bundles_post_ra>
